<compile_context>
chip_gen: v5e
topology: v5e:2x2
jax: 0.10.0
libtpu: 0.0.40
codegen_flags: <defaults>
</compile_context>

<pallas_src>
import numpy as np
import jax
import jax.numpy as jnp
from jax.experimental import pallas as pl
from jax.experimental.pallas import tpu as pltpu


# ----------------------------------------------------------------------------
# SESN steerable Hermite-Gaussian basis (deterministic parameter setup = glue).
# ----------------------------------------------------------------------------
def _hermite_poly(X, n):
    coeff = [0.0] * n + [1.0]
    return np.polynomial.hermite_e.hermeval(X, coeff)


def _onescale_grid_hermite_gaussian(size, scale, max_order):
    X = np.linspace(-(size // 2), size // 2, size)
    order_y, order_x = np.indices([max_order + 1, max_order + 1])
    G = np.exp(-X ** 2 / (2 * scale ** 2)) / scale
    basis_x = np.stack([G * _hermite_poly(X / scale, n) for n in order_x.ravel()])
    basis_y = np.stack([G * _hermite_poly(X / scale, n) for n in order_y.ravel()])
    return basis_x[:, :, None] * basis_y[:, None, :]            # [F, size, size]


def steerable_basis_A(size, scales, effective_size):
    """Returns basis [F, S, ks, ks] normalized by the min-scale norm (as in sesn)."""
    max_order = effective_size - 1
    max_scale = max(scales)
    per_scale = []
    for scale in scales:
        size_before_pad = int(size * scale / max_scale) // 2 * 2 + 1
        b = _onescale_grid_hermite_gaussian(size_before_pad, scale, max_order)
        pad = (size - size_before_pad) // 2
        b = np.pad(b, ((0, 0), (pad, pad), (pad, pad)))
        per_scale.append(b)
    basis = np.stack(per_scale, 1)                              # [F, S, ks, ks]
    norm = np.sqrt((basis ** 2).sum(axis=(2, 3), keepdims=True))[:, [0]]
    return (basis / norm).astype(np.float32)


# ----------------------------------------------------------------------------
# One-time parameter prep (glue, outside jit):
#  * eval-mode BN folded into per-channel scale/bias, tiled to W*C rows
#  * per-scale banded-Toeplitz conv weights, with the KS kh-blocks CONCATENATED
#    along the contraction dim so each conv is a single deep-K matmul
#  * conv2 Toeplitz and the 1x1 shortcut stacked into one RHS
# ----------------------------------------------------------------------------
def prepare_block_params(scale1, bias1, K1, scale2, bias2, K2, Wsc, *, W,
                         matmul_dtype=jnp.bfloat16):
    K1 = np.asarray(K1, dtype=np.float32)      # [S, KS, KS, Cin,  Cout]
    K2 = np.asarray(K2, dtype=np.float32)      # [S, KS, KS, Cout, Cout]
    Wsc = np.asarray(Wsc, dtype=np.float32)    # [Cin, Cout]
    S, KS = K1.shape[0], K1.shape[1]
    pad = (KS - 1) // 2
    cin, cout = Wsc.shape

    def conv_toeplitz(K):
        _, _, _, ci, co = K.shape
        M = np.zeros((S, KS, W, ci, W, co), np.float32)
        for w in range(W):
            for kw in range(KS):
                wi = w + kw - pad
                if 0 <= wi < W:                      # W zero-padding folded in here
                    M[:, :, wi, :, w, :] = K[:, :, kw, :, :]
        # concatenate the KS kh-blocks along the contraction dim
        return M.reshape(S, KS * W * ci, W * co)

    w1cat = conv_toeplitz(K1)                        # (S, KS*W*Cin,  W*Cout)
    w2toep = conv_toeplitz(K2)                       # (S, KS*W*Cout, W*Cout)

    Msc = np.zeros((W, cin, W, cout), np.float32)    # block-diagonal 1x1 shortcut
    for w in range(W):
        Msc[w, :, w, :] = Wsc
    Msc = Msc.reshape(W * cin, W * cout)
    # [conv2 Toeplitz ; shortcut] -> one RHS per scale, K = KS*W*Cout + W*Cin
    w2cat = np.concatenate(
        [w2toep, np.broadcast_to(Msc[None], (S,) + Msc.shape)], axis=1)

    def tile_row(v):
        v = np.asarray(v, np.float32).reshape(-1)
        return jnp.asarray(np.tile(v, W).reshape(1, -1), jnp.float32)

    return {
        "bn1_scale": tile_row(scale1),
        "bn1_bias": tile_row(bias1),
        "conv1_w": jnp.asarray(w1cat, matmul_dtype),
        "bn2_scale": tile_row(scale2),
        "bn2_bias": tile_row(bias2),
        "conv2_w": jnp.asarray(w2cat, matmul_dtype),
    }


# ----------------------------------------------------------------------------
# Fused Pallas kernel: one grid step = one scale s, all batches at once.
# ----------------------------------------------------------------------------
def fused_block_kernel(x_ref, s1_ref, b1_ref, w1_ref, s2_ref, b2_ref, w2_ref,
                       o_ref, ypad_ref, opad_ref, im1_ref, im2_ref):
    B, H, WCin = x_ref.shape            # (B, H, W*Cin) f32 activation rows
    WCout = o_ref.shape[-1]             # W*Cout (lane-dense output)
    Kd1 = w1_ref.shape[0]               # KS * W*Cin
    Kd2 = w2_ref.shape[0]               # KS * W*Cout + W*Cin
    KS = Kd1 // WCin
    pad = (KS - 1) // 2
    q = pad + (pad % 2)                 # even interior row offset -> word-aligned
    Hp = ypad_ref.shape[1]              # padded-H extent (multiple of 8)
    mm = w1_ref.dtype                   # bf16 MXU operands (f32 accumulate) or f32

    # ---- stage 1: y = relu(bn1(x)); f32 epilogue math, cast ONCE to mm dtype ----
    y = jnp.maximum(x_ref[...] * s1_ref[...] + b1_ref[...], 0.0)
    y_mm = y.astype(mm)

    # H-padded copy of y: zero ONLY the halo row bands, one interior store.
    if q > 0:
        ypad_ref[:, 0:q, :] = jnp.zeros((B, q, WCin), mm)
    if Hp > q + H:
        ypad_ref[:, q + H:Hp, :] = jnp.zeros((B, Hp - q - H, WCin), mm)
    ypad_ref[:, q:q + H, :] = y_mm

    # im2row: lane slot kh <- padded rows [q-pad+kh, q-pad+kh+H).  Slots are
    # 128-lane aligned, full-height (unmasked) stores; the +/-pad shift is on
    # the load side.
    for kh in range(KS):
        r0 = q - pad + kh
        im1_ref[:, :, kh * WCin:(kh + 1) * WCin] = ypad_ref[:, r0:r0 + H, :]

    # ---- stage 2: out1 = relu(bn2(conv1(y))) as ONE deep-K matmul ---------------
    out1 = jnp.dot(im1_ref[...].reshape(B * H, Kd1), w1_ref[...],
                   preferred_element_type=jnp.float32)
    out1 = jnp.maximum(out1 * s2_ref[...] + b2_ref[...], 0.0)          # f32 epilogue
    out1_mm = out1.reshape(B, H, WCout).astype(mm)                     # cast ONCE

    # ---- stage 3: out = conv2(out1) + 1x1 shortcut(y), also ONE matmul ----------
    if q > 0:
        opad_ref[:, 0:q, :] = jnp.zeros((B, q, WCout), mm)
    if Hp > q + H:
        opad_ref[:, q + H:Hp, :] = jnp.zeros((B, Hp - q - H, WCout), mm)
    opad_ref[:, q:q + H, :] = out1_mm
    for kh in range(KS):
        r0 = q - pad + kh
        im2_ref[:, :, kh * WCout:(kh + 1) * WCout] = opad_ref[:, r0:r0 + H, :]
    im2_ref[:, :, KS * WCout:Kd2] = y_mm           # shortcut lanes (1x1 conv input)

    o_ref[...] = jnp.dot(im2_ref[...].reshape(B * H, Kd2), w2_ref[...],
                         preferred_element_type=jnp.float32).astype(o_ref.dtype)


# ----------------------------------------------------------------------------
# Wrapper: NCSHW in / NCSHW out, one fused pallas_call over grid=(S,).
# ----------------------------------------------------------------------------
def basic_block_forward(x_ncshw, params):
    s1, b1, w1 = params["bn1_scale"], params["bn1_bias"], params["conv1_w"]
    s2, b2, w2 = params["bn2_scale"], params["bn2_bias"], params["conv2_w"]

    B, Cin, S, H, W = x_ncshw.shape
    WCin = W * Cin
    kd1 = w1.shape[1]                     # KS * W*Cin
    kd2 = w2.shape[1]                     # KS * W*Cout + W*Cin
    WCout = w1.shape[2]
    Cout = WCout // W
    KS = kd1 // WCin
    pad = (KS - 1) // 2
    q = pad + (pad % 2)
    Hp = ((q + H + pad + 7) // 8) * 8     # padded-H scratch extent, 8-sublane aligned
    mm_dtype = w1.dtype

    # NCSHW -> [S, B, H, W*Cin] channel-minor rows (single boundary transpose)
    x_r = jnp.transpose(x_ncshw, (2, 0, 3, 4, 1)).reshape(S, B, H, WCin)

    out = pl.pallas_call(
        fused_block_kernel,
        out_shape=jax.ShapeDtypeStruct((S, B * H, WCout), jnp.float32),
        grid=(S,),
        in_specs=[
            pl.BlockSpec((None, B, H, WCin), lambda s: (s, 0, 0, 0)),     # x rows
            pl.BlockSpec((1, WCin), lambda s: (0, 0)),                    # bn1 scale
            pl.BlockSpec((1, WCin), lambda s: (0, 0)),                    # bn1 bias
            pl.BlockSpec((None, kd1, WCout), lambda s: (s, 0, 0)),        # conv1 (K-cat)
            pl.BlockSpec((1, WCout), lambda s: (0, 0)),                   # bn2 scale
            pl.BlockSpec((1, WCout), lambda s: (0, 0)),                   # bn2 bias
            pl.BlockSpec((None, kd2, WCout), lambda s: (s, 0, 0)),        # conv2+shortcut
        ],
        out_specs=pl.BlockSpec((None, B * H, WCout), lambda s: (s, 0, 0)),
        scratch_shapes=[
            pltpu.VMEM((B, Hp, WCin), mm_dtype),    # H-padded y (halo-zeroed)
            pltpu.VMEM((B, Hp, WCout), mm_dtype),   # H-padded out1 (halo-zeroed)
            pltpu.VMEM((B, H, kd1), mm_dtype),      # im2row LHS for conv1
            pltpu.VMEM((B, H, kd2), mm_dtype),      # [im2row(out1) | y] LHS for conv2+sc
        ],
        compiler_params=pltpu.CompilerParams(
            dimension_semantics=("parallel",),      # scale axis; see v7x TODO above
            vmem_limit_bytes=32 * 1024 * 1024,
        ),
    )(x_r, s1, b1, w1, s2, b2, w2)

    out = out.reshape(S, B, H, W, Cout)
    return jnp.transpose(out, (1, 4, 0, 2, 3))      # back to NCSHW [B, Cout, S, H, W]


# ----------------------------------------------------------------------------
# Pure-JAX reference for verification (f32, highest precision).
# ----------------------------------------------------------------------------
def reference_forward(x_ncshw, scale1, bias1, K1, scale2, bias2, K2, Wsc):
    x = jnp.transpose(x_ncshw, (0, 2, 3, 4, 1))     # [B, S, H, W, C]
    S = x.shape[1]
    KS = K1.shape[1]
    pad = (KS - 1) // 2

    def conv7(y, K):
        outs = []
        for s in range(S):
            outs.append(jax.lax.conv_general_dilated(
                y[:, s], K[s], window_strides=(1, 1),
                padding=((pad, pad), (pad, pad)),
                dimension_numbers=("NHWC", "HWIO", "NHWC"),
                precision=jax.lax.Precision.HIGHEST))
        return jnp.stack(outs, axis=1)

    y = jnp.maximum(x * scale1 + bias1, 0.0)
    out = conv7(y, K1)
    out = jnp.maximum(out * scale2 + bias2, 0.0)
    out = conv7(out, K2)
    sc = jnp.einsum("bshwc,co->bshwo", y, Wsc, precision=jax.lax.Precision.HIGHEST)
    return jnp.transpose(sc + out, (0, 4, 1, 2, 3))


if __name__ == "__main__":
    key = jax.random.PRNGKey(0)
    keys = jax.random.split(key, 6)

    # Small demo config.  Channels chosen so W*Cin = 128 and W*Cout = 256 (multiples
    # of 128): every im2row lane slot and the output row are vreg-lane aligned.
    B, H, W = 2, 16, 16
    in_planes, out_planes = 8, 16                 # != -> SESConv_H_H_1x1 shortcut used
    scales = [1.0, 1.25]
    S = len(scales)
    KS, eff = 7, 3

    # Input in PyTorch NCSHW layout: [B, C, S, H, W]
    x = jax.random.normal(keys[0], (B, in_planes, S, H, W), jnp.float32)

    # SES basis + synthetic weights; expand to per-scale dense 7x7 kernels (glue).
    basis = jnp.asarray(steerable_basis_A(KS, scales, eff))         # [F, S, 7, 7]
    F_num = basis.shape[0]
    w1 = 0.1 * jax.random.normal(keys[1], (out_planes, in_planes, F_num), jnp.float32)
    w2 = 0.1 * jax.random.normal(keys[2], (out_planes, out_planes, F_num), jnp.float32)
    K1 = jnp.einsum("ocf,fsij->sijco", w1, basis)                   # [S,7,7,Cin,Cout]
    K2 = jnp.einsum("ocf,fsij->sijco", w2, basis)                   # [S,7,7,Cout,Cout]
    Wsc = 0.2 * jax.random.normal(keys[3], (in_planes, out_planes), jnp.float32)

    # Eval-mode BatchNorm3d folded into per-channel scale/bias.
    def bn_params(k, c):
        k1, k2, k3, k4 = jax.random.split(k, 4)
        gamma = 1.0 + 0.1 * jax.random.normal(k1, (c,), jnp.float32)
        beta = 0.1 * jax.random.normal(k2, (c,), jnp.float32)
        mean = 0.1 * jax.random.normal(k3, (c,), jnp.float32)
        var = 1.0 + 0.1 * jax.random.uniform(k4, (c,), jnp.float32)
        scl = gamma / jnp.sqrt(var + 1e-5)
        return scl, beta - mean * scl

    scale1, bias1 = bn_params(keys[4], in_planes)
    scale2, bias2 = bn_params(keys[5], out_planes)

    ref = jax.block_until_ready(
        reference_forward(x, scale1, bias1, K1, scale2, bias2, K2, Wsc))
    ref_scale = float(jnp.max(jnp.abs(ref)))

    # Check the f32-MXU path, then the bf16-MXU production default (looser tolerance
    # reflects bf16 operand rounding; accumulation stays f32).
    for mm_dtype, tol in ((jnp.float32, 2e-2), (jnp.bfloat16, 5e-2)):
        params = prepare_block_params(scale1, bias1, K1, scale2, bias2, K2, Wsc,
                                      W=W, matmul_dtype=mm_dtype)
        out = jax.block_until_ready(jax.jit(basic_block_forward)(x, params))
        assert out.shape == (B, out_planes, S, H, W), out.shape
        err = float(jnp.max(jnp.abs(out - ref))) / (ref_scale + 1e-12)
        if err > tol:
            raise AssertionError(
                f"Pallas output (matmul dtype {jnp.dtype(mm_dtype).name}) does not "
                f"match JAX reference; normalized max abs err = {err:.3e}")

    print("KERNEL_OK")
</pallas_src>

<mosaic_0001>
module attributes {stable_mosaic.version = 11 : i64} {
  func.func @fused_block_kernel(%arg0: i32, %arg1: memref<1x2x16x128xf32, #tpu.memory_space<vmem>>, %arg2: memref<1x128xf32, #tpu.memory_space<vmem>>, %arg3: memref<1x128xf32, #tpu.memory_space<vmem>>, %arg4: memref<1x896x256xf32, #tpu.memory_space<vmem>>, %arg5: memref<1x256xf32, #tpu.memory_space<vmem>>, %arg6: memref<1x256xf32, #tpu.memory_space<vmem>>, %arg7: memref<1x1920x256xf32, #tpu.memory_space<vmem>>, %arg8: memref<1x32x256xf32, #tpu.memory_space<vmem>>, %arg9: memref<2x24x128xf32, #tpu.memory_space<vmem>>, %arg10: memref<2x24x256xf32, #tpu.memory_space<vmem>>, %arg11: memref<2x16x896xf32, #tpu.memory_space<vmem>>, %arg12: memref<2x16x1920xf32, #tpu.memory_space<vmem>>) attributes {dimension_semantics = [#tpu.dimension_semantics<parallel>], iteration_bounds = array<i64: 2>, scalar_prefetch = 0 : i64, scratch_operands = 4 : i64, tpu.core_type = #tpu.core_type<tc>, window_params = [{transform_indices = @transform_0, window_bounds = array<i64: 1, 2, 16, 128>}, {pipeline_mode = #tpu.pipeline_mode<synchronous>, transform_indices = @transform_1, window_bounds = array<i64: 1, 128>}, {pipeline_mode = #tpu.pipeline_mode<synchronous>, transform_indices = @transform_2, window_bounds = array<i64: 1, 128>}, {transform_indices = @transform_3, window_bounds = array<i64: 1, 896, 256>}, {pipeline_mode = #tpu.pipeline_mode<synchronous>, transform_indices = @transform_4, window_bounds = array<i64: 1, 256>}, {pipeline_mode = #tpu.pipeline_mode<synchronous>, transform_indices = @transform_5, window_bounds = array<i64: 1, 256>}, {transform_indices = @transform_6, window_bounds = array<i64: 1, 1920, 256>}, {transform_indices = @transform_7, window_bounds = array<i64: 1, 32, 256>}]} {
    %c0 = arith.constant 0 : index
    %c0_0 = arith.constant 0 : index
    %c0_1 = arith.constant 0 : index
    %c0_2 = arith.constant 0 : index
    %0 = vector.load %arg1[%c0, %c0_0, %c0_1, %c0_2] : memref<1x2x16x128xf32, #tpu.memory_space<vmem>>, vector<1x2x16x128xf32>
    %1 = vector.shape_cast %0 : vector<1x2x16x128xf32> to vector<2x16x128xf32>
    %c0_3 = arith.constant 0 : index
    %c0_4 = arith.constant 0 : index
    %2 = vector.load %arg2[%c0_3, %c0_4] : memref<1x128xf32, #tpu.memory_space<vmem>>, vector<1x128xf32>
    %3 = vector.shape_cast %2 : vector<1x128xf32> to vector<1x1x128xf32>
    %4 = vector.broadcast %3 : vector<1x1x128xf32> to vector<2x16x128xf32>
    %5 = arith.mulf %1, %4 : vector<2x16x128xf32>
    %c0_5 = arith.constant 0 : index
    %c0_6 = arith.constant 0 : index
    %6 = vector.load %arg3[%c0_5, %c0_6] : memref<1x128xf32, #tpu.memory_space<vmem>>, vector<1x128xf32>
    %7 = vector.shape_cast %6 : vector<1x128xf32> to vector<1x1x128xf32>
    %8 = vector.broadcast %7 : vector<1x1x128xf32> to vector<2x16x128xf32>
    %9 = arith.addf %5, %8 : vector<2x16x128xf32>
    %cst = arith.constant 0.000000e+00 : f32
    %10 = vector.broadcast %cst : f32 to vector<2x16x128xf32>
    %11 = arith.maximumf %9, %10 : vector<2x16x128xf32>
    %cst_7 = arith.constant 0.000000e+00 : f32
    %12 = vector.broadcast %cst_7 : f32 to vector<2x4x128xf32>
    %c0_8 = arith.constant 0 : index
    %c0_9 = arith.constant 0 : index
    %c0_10 = arith.constant 0 : index
    %13 = vector.load %arg9[%c0_8, %c0_9, %c0_10] : memref<2x24x128xf32, #tpu.memory_space<vmem>>, vector<2x4x128xf32>
    tpu.vector_store %arg9[%c0_8, %c0_9, %c0_10], %12 {strides = array<i32>} : memref<2x24x128xf32, #tpu.memory_space<vmem>>, vector<2x4x128xf32>,
    %cst_11 = arith.constant 0.000000e+00 : f32
    %14 = vector.broadcast %cst_11 : f32 to vector<2x4x128xf32>
    %c0_12 = arith.constant 0 : index
    %c20 = arith.constant 20 : index
    %c0_13 = arith.constant 0 : index
    %15 = vector.load %arg9[%c0_12, %c20, %c0_13] : memref<2x24x128xf32, #tpu.memory_space<vmem>>, vector<2x4x128xf32>
    tpu.vector_store %arg9[%c0_12, %c20, %c0_13], %14 {strides = array<i32>} : memref<2x24x128xf32, #tpu.memory_space<vmem>>, vector<2x4x128xf32>,
    %c0_14 = arith.constant 0 : index
    %c4 = arith.constant 4 : index
    %c0_15 = arith.constant 0 : index
    %16 = vector.load %arg9[%c0_14, %c4, %c0_15] : memref<2x24x128xf32, #tpu.memory_space<vmem>>, vector<2x16x128xf32>
    tpu.vector_store %arg9[%c0_14, %c4, %c0_15], %11 {strides = array<i32>} : memref<2x24x128xf32, #tpu.memory_space<vmem>>, vector<2x16x128xf32>,
    %c0_16 = arith.constant 0 : index
    %c1 = arith.constant 1 : index
    %c0_17 = arith.constant 0 : index
    %17 = vector.load %arg9[%c0_16, %c1, %c0_17] : memref<2x24x128xf32, #tpu.memory_space<vmem>>, vector<2x16x128xf32>
    %c0_18 = arith.constant 0 : index
    %c0_19 = arith.constant 0 : index
    %c0_20 = arith.constant 0 : index
    %18 = vector.load %arg11[%c0_18, %c0_19, %c0_20] : memref<2x16x896xf32, #tpu.memory_space<vmem>>, vector<2x16x128xf32>
    tpu.vector_store %arg11[%c0_18, %c0_19, %c0_20], %17 {strides = array<i32>} : memref<2x16x896xf32, #tpu.memory_space<vmem>>, vector<2x16x128xf32>,
    %c0_21 = arith.constant 0 : index
    %c2 = arith.constant 2 : index
    %c0_22 = arith.constant 0 : index
    %19 = vector.load %arg9[%c0_21, %c2, %c0_22] : memref<2x24x128xf32, #tpu.memory_space<vmem>>, vector<2x16x128xf32>
    %c0_23 = arith.constant 0 : index
    %c0_24 = arith.constant 0 : index
    %c128 = arith.constant 128 : index
    %20 = vector.load %arg11[%c0_23, %c0_24, %c128] : memref<2x16x896xf32, #tpu.memory_space<vmem>>, vector<2x16x128xf32>
    tpu.vector_store %arg11[%c0_23, %c0_24, %c128], %19 {strides = array<i32>} : memref<2x16x896xf32, #tpu.memory_space<vmem>>, vector<2x16x128xf32>,
    %c0_25 = arith.constant 0 : index
    %c3 = arith.constant 3 : index
    %c0_26 = arith.constant 0 : index
    %21 = vector.load %arg9[%c0_25, %c3, %c0_26] : memref<2x24x128xf32, #tpu.memory_space<vmem>>, vector<2x16x128xf32>
    %c0_27 = arith.constant 0 : index
    %c0_28 = arith.constant 0 : index
    %c256 = arith.constant 256 : index
    %22 = vector.load %arg11[%c0_27, %c0_28, %c256] : memref<2x16x896xf32, #tpu.memory_space<vmem>>, vector<2x16x128xf32>
    tpu.vector_store %arg11[%c0_27, %c0_28, %c256], %21 {strides = array<i32>} : memref<2x16x896xf32, #tpu.memory_space<vmem>>, vector<2x16x128xf32>,
    %c0_29 = arith.constant 0 : index
    %c4_30 = arith.constant 4 : index
    %c0_31 = arith.constant 0 : index
    %23 = vector.load %arg9[%c0_29, %c4_30, %c0_31] : memref<2x24x128xf32, #tpu.memory_space<vmem>>, vector<2x16x128xf32>
    %c0_32 = arith.constant 0 : index
    %c0_33 = arith.constant 0 : index
    %c384 = arith.constant 384 : index
    %24 = vector.load %arg11[%c0_32, %c0_33, %c384] : memref<2x16x896xf32, #tpu.memory_space<vmem>>, vector<2x16x128xf32>
    tpu.vector_store %arg11[%c0_32, %c0_33, %c384], %23 {strides = array<i32>} : memref<2x16x896xf32, #tpu.memory_space<vmem>>, vector<2x16x128xf32>,
    %c0_34 = arith.constant 0 : index
    %c5 = arith.constant 5 : index
    %c0_35 = arith.constant 0 : index
    %25 = vector.load %arg9[%c0_34, %c5, %c0_35] : memref<2x24x128xf32, #tpu.memory_space<vmem>>, vector<2x16x128xf32>
    %c0_36 = arith.constant 0 : index
    %c0_37 = arith.constant 0 : index
    %c512 = arith.constant 512 : index
    %26 = vector.load %arg11[%c0_36, %c0_37, %c512] : memref<2x16x896xf32, #tpu.memory_space<vmem>>, vector<2x16x128xf32>
    tpu.vector_store %arg11[%c0_36, %c0_37, %c512], %25 {strides = array<i32>} : memref<2x16x896xf32, #tpu.memory_space<vmem>>, vector<2x16x128xf32>,
    %c0_38 = arith.constant 0 : index
    %c6 = arith.constant 6 : index
    %c0_39 = arith.constant 0 : index
    %27 = vector.load %arg9[%c0_38, %c6, %c0_39] : memref<2x24x128xf32, #tpu.memory_space<vmem>>, vector<2x16x128xf32>
    %c0_40 = arith.constant 0 : index
    %c0_41 = arith.constant 0 : index
    %c640 = arith.constant 640 : index
    %28 = vector.load %arg11[%c0_40, %c0_41, %c640] : memref<2x16x896xf32, #tpu.memory_space<vmem>>, vector<2x16x128xf32>
    tpu.vector_store %arg11[%c0_40, %c0_41, %c640], %27 {strides = array<i32>} : memref<2x16x896xf32, #tpu.memory_space<vmem>>, vector<2x16x128xf32>,
    %c0_42 = arith.constant 0 : index
    %c7 = arith.constant 7 : index
    %c0_43 = arith.constant 0 : index
    %29 = vector.load %arg9[%c0_42, %c7, %c0_43] : memref<2x24x128xf32, #tpu.memory_space<vmem>>, vector<2x16x128xf32>
    %c0_44 = arith.constant 0 : index
    %c0_45 = arith.constant 0 : index
    %c768 = arith.constant 768 : index
    %30 = vector.load %arg11[%c0_44, %c0_45, %c768] : memref<2x16x896xf32, #tpu.memory_space<vmem>>, vector<2x16x128xf32>
    tpu.vector_store %arg11[%c0_44, %c0_45, %c768], %29 {strides = array<i32>} : memref<2x16x896xf32, #tpu.memory_space<vmem>>, vector<2x16x128xf32>,
    %c0_46 = arith.constant 0 : index
    %c0_47 = arith.constant 0 : index
    %c0_48 = arith.constant 0 : index
    %31 = vector.load %arg11[%c0_46, %c0_47, %c0_48] : memref<2x16x896xf32, #tpu.memory_space<vmem>>, vector<2x16x896xf32>
    %32 = vector.shape_cast %31 : vector<2x16x896xf32> to vector<32x896xf32>
    %c0_49 = arith.constant 0 : index
    %c0_50 = arith.constant 0 : index
    %c0_51 = arith.constant 0 : index
    %33 = vector.load %arg4[%c0_49, %c0_50, %c0_51] : memref<1x896x256xf32, #tpu.memory_space<vmem>>, vector<1x896x256xf32>
    %34 = vector.shape_cast %33 : vector<1x896x256xf32> to vector<896x256xf32>
    %cst_52 = arith.constant dense<0.000000e+00> : vector<32x256xf32>
    %35 = tpu.matmul %32, %34, %cst_52 {dimension_numbers = #tpu.dot_dimension_numbers<[1], [0], [0], [1], [0, 0, 1, 1], [], []>} : vector<32x896xf32>, vector<896x256xf32>, vector<32x256xf32> -> vector<32x256xf32>
    %c0_53 = arith.constant 0 : index
    %c0_54 = arith.constant 0 : index
    %36 = vector.load %arg5[%c0_53, %c0_54] : memref<1x256xf32, #tpu.memory_space<vmem>>, vector<1x256xf32>
    %37 = vector.broadcast %36 : vector<1x256xf32> to vector<32x256xf32>
    %38 = arith.mulf %35, %37 : vector<32x256xf32>
    %c0_55 = arith.constant 0 : index
    %c0_56 = arith.constant 0 : index
    %39 = vector.load %arg6[%c0_55, %c0_56] : memref<1x256xf32, #tpu.memory_space<vmem>>, vector<1x256xf32>
    %40 = vector.broadcast %39 : vector<1x256xf32> to vector<32x256xf32>
    %41 = arith.addf %38, %40 : vector<32x256xf32>
    %cst_57 = arith.constant 0.000000e+00 : f32
    %42 = vector.broadcast %cst_57 : f32 to vector<32x256xf32>
    %43 = arith.maximumf %41, %42 : vector<32x256xf32>
    %44 = vector.shape_cast %43 : vector<32x256xf32> to vector<2x16x256xf32>
    %cst_58 = arith.constant 0.000000e+00 : f32
    %45 = vector.broadcast %cst_58 : f32 to vector<2x4x256xf32>
    %c0_59 = arith.constant 0 : index
    %c0_60 = arith.constant 0 : index
    %c0_61 = arith.constant 0 : index
    %46 = vector.load %arg10[%c0_59, %c0_60, %c0_61] : memref<2x24x256xf32, #tpu.memory_space<vmem>>, vector<2x4x256xf32>
    tpu.vector_store %arg10[%c0_59, %c0_60, %c0_61], %45 {strides = array<i32>} : memref<2x24x256xf32, #tpu.memory_space<vmem>>, vector<2x4x256xf32>,
    %cst_62 = arith.constant 0.000000e+00 : f32
    %47 = vector.broadcast %cst_62 : f32 to vector<2x4x256xf32>
    %c0_63 = arith.constant 0 : index
    %c20_64 = arith.constant 20 : index
    %c0_65 = arith.constant 0 : index
    %48 = vector.load %arg10[%c0_63, %c20_64, %c0_65] : memref<2x24x256xf32, #tpu.memory_space<vmem>>, vector<2x4x256xf32>
    tpu.vector_store %arg10[%c0_63, %c20_64, %c0_65], %47 {strides = array<i32>} : memref<2x24x256xf32, #tpu.memory_space<vmem>>, vector<2x4x256xf32>,
    %c0_66 = arith.constant 0 : index
    %c4_67 = arith.constant 4 : index
    %c0_68 = arith.constant 0 : index
    %49 = vector.load %arg10[%c0_66, %c4_67, %c0_68] : memref<2x24x256xf32, #tpu.memory_space<vmem>>, vector<2x16x256xf32>
    tpu.vector_store %arg10[%c0_66, %c4_67, %c0_68], %44 {strides = array<i32>} : memref<2x24x256xf32, #tpu.memory_space<vmem>>, vector<2x16x256xf32>,
    %c0_69 = arith.constant 0 : index
    %c1_70 = arith.constant 1 : index
    %c0_71 = arith.constant 0 : index
    %50 = vector.load %arg10[%c0_69, %c1_70, %c0_71] : memref<2x24x256xf32, #tpu.memory_space<vmem>>, vector<2x16x256xf32>
    %c0_72 = arith.constant 0 : index
    %c0_73 = arith.constant 0 : index
    %c0_74 = arith.constant 0 : index
    %51 = vector.load %arg12[%c0_72, %c0_73, %c0_74] : memref<2x16x1920xf32, #tpu.memory_space<vmem>>, vector<2x16x256xf32>
    tpu.vector_store %arg12[%c0_72, %c0_73, %c0_74], %50 {strides = array<i32>} : memref<2x16x1920xf32, #tpu.memory_space<vmem>>, vector<2x16x256xf32>,
    %c0_75 = arith.constant 0 : index
    %c2_76 = arith.constant 2 : index
    %c0_77 = arith.constant 0 : index
    %52 = vector.load %arg10[%c0_75, %c2_76, %c0_77] : memref<2x24x256xf32, #tpu.memory_space<vmem>>, vector<2x16x256xf32>
    %c0_78 = arith.constant 0 : index
    %c0_79 = arith.constant 0 : index
    %c256_80 = arith.constant 256 : index
    %53 = vector.load %arg12[%c0_78, %c0_79, %c256_80] : memref<2x16x1920xf32, #tpu.memory_space<vmem>>, vector<2x16x256xf32>
    tpu.vector_store %arg12[%c0_78, %c0_79, %c256_80], %52 {strides = array<i32>} : memref<2x16x1920xf32, #tpu.memory_space<vmem>>, vector<2x16x256xf32>,
    %c0_81 = arith.constant 0 : index
    %c3_82 = arith.constant 3 : index
    %c0_83 = arith.constant 0 : index
    %54 = vector.load %arg10[%c0_81, %c3_82, %c0_83] : memref<2x24x256xf32, #tpu.memory_space<vmem>>, vector<2x16x256xf32>
    %c0_84 = arith.constant 0 : index
    %c0_85 = arith.constant 0 : index
    %c512_86 = arith.constant 512 : index
    %55 = vector.load %arg12[%c0_84, %c0_85, %c512_86] : memref<2x16x1920xf32, #tpu.memory_space<vmem>>, vector<2x16x256xf32>
    tpu.vector_store %arg12[%c0_84, %c0_85, %c512_86], %54 {strides = array<i32>} : memref<2x16x1920xf32, #tpu.memory_space<vmem>>, vector<2x16x256xf32>,
    %c0_87 = arith.constant 0 : index
    %c4_88 = arith.constant 4 : index
    %c0_89 = arith.constant 0 : index
    %56 = vector.load %arg10[%c0_87, %c4_88, %c0_89] : memref<2x24x256xf32, #tpu.memory_space<vmem>>, vector<2x16x256xf32>
    %c0_90 = arith.constant 0 : index
    %c0_91 = arith.constant 0 : index
    %c768_92 = arith.constant 768 : index
    %57 = vector.load %arg12[%c0_90, %c0_91, %c768_92] : memref<2x16x1920xf32, #tpu.memory_space<vmem>>, vector<2x16x256xf32>
    tpu.vector_store %arg12[%c0_90, %c0_91, %c768_92], %56 {strides = array<i32>} : memref<2x16x1920xf32, #tpu.memory_space<vmem>>, vector<2x16x256xf32>,
    %c0_93 = arith.constant 0 : index
    %c5_94 = arith.constant 5 : index
    %c0_95 = arith.constant 0 : index
    %58 = vector.load %arg10[%c0_93, %c5_94, %c0_95] : memref<2x24x256xf32, #tpu.memory_space<vmem>>, vector<2x16x256xf32>
    %c0_96 = arith.constant 0 : index
    %c0_97 = arith.constant 0 : index
    %c1024 = arith.constant 1024 : index
    %59 = vector.load %arg12[%c0_96, %c0_97, %c1024] : memref<2x16x1920xf32, #tpu.memory_space<vmem>>, vector<2x16x256xf32>
    tpu.vector_store %arg12[%c0_96, %c0_97, %c1024], %58 {strides = array<i32>} : memref<2x16x1920xf32, #tpu.memory_space<vmem>>, vector<2x16x256xf32>,
    %c0_98 = arith.constant 0 : index
    %c6_99 = arith.constant 6 : index
    %c0_100 = arith.constant 0 : index
    %60 = vector.load %arg10[%c0_98, %c6_99, %c0_100] : memref<2x24x256xf32, #tpu.memory_space<vmem>>, vector<2x16x256xf32>
    %c0_101 = arith.constant 0 : index
    %c0_102 = arith.constant 0 : index
    %c1280 = arith.constant 1280 : index
    %61 = vector.load %arg12[%c0_101, %c0_102, %c1280] : memref<2x16x1920xf32, #tpu.memory_space<vmem>>, vector<2x16x256xf32>
    tpu.vector_store %arg12[%c0_101, %c0_102, %c1280], %60 {strides = array<i32>} : memref<2x16x1920xf32, #tpu.memory_space<vmem>>, vector<2x16x256xf32>,
    %c0_103 = arith.constant 0 : index
    %c7_104 = arith.constant 7 : index
    %c0_105 = arith.constant 0 : index
    %62 = vector.load %arg10[%c0_103, %c7_104, %c0_105] : memref<2x24x256xf32, #tpu.memory_space<vmem>>, vector<2x16x256xf32>
    %c0_106 = arith.constant 0 : index
    %c0_107 = arith.constant 0 : index
    %c1536 = arith.constant 1536 : index
    %63 = vector.load %arg12[%c0_106, %c0_107, %c1536] : memref<2x16x1920xf32, #tpu.memory_space<vmem>>, vector<2x16x256xf32>
    tpu.vector_store %arg12[%c0_106, %c0_107, %c1536], %62 {strides = array<i32>} : memref<2x16x1920xf32, #tpu.memory_space<vmem>>, vector<2x16x256xf32>,
    %c0_108 = arith.constant 0 : index
    %c0_109 = arith.constant 0 : index
    %c1792 = arith.constant 1792 : index
    %64 = vector.load %arg12[%c0_108, %c0_109, %c1792] : memref<2x16x1920xf32, #tpu.memory_space<vmem>>, vector<2x16x128xf32>
    tpu.vector_store %arg12[%c0_108, %c0_109, %c1792], %11 {strides = array<i32>} : memref<2x16x1920xf32, #tpu.memory_space<vmem>>, vector<2x16x128xf32>,
    %c0_110 = arith.constant 0 : index
    %c0_111 = arith.constant 0 : index
    %c0_112 = arith.constant 0 : index
    %65 = vector.load %arg12[%c0_110, %c0_111, %c0_112] : memref<2x16x1920xf32, #tpu.memory_space<vmem>>, vector<2x16x1920xf32>
    %66 = vector.shape_cast %65 : vector<2x16x1920xf32> to vector<32x1920xf32>
    %c0_113 = arith.constant 0 : index
    %c0_114 = arith.constant 0 : index
    %c0_115 = arith.constant 0 : index
    %67 = vector.load %arg7[%c0_113, %c0_114, %c0_115] : memref<1x1920x256xf32, #tpu.memory_space<vmem>>, vector<1x1920x256xf32>
    %68 = vector.shape_cast %67 : vector<1x1920x256xf32> to vector<1920x256xf32>
    %cst_116 = arith.constant dense<0.000000e+00> : vector<32x256xf32>
    %69 = tpu.matmul %66, %68, %cst_116 {dimension_numbers = #tpu.dot_dimension_numbers<[1], [0], [0], [1], [0, 0, 1, 1], [], []>} : vector<32x1920xf32>, vector<1920x256xf32>, vector<32x256xf32> -> vector<32x256xf32>
    %c0_117 = arith.constant 0 : index
    %c0_118 = arith.constant 0 : index
    %c0_119 = arith.constant 0 : index
    %70 = vector.load %arg8[%c0_117, %c0_118, %c0_119] : memref<1x32x256xf32, #tpu.memory_space<vmem>>, vector<1x32x256xf32>
    %71 = vector.shape_cast %70 : vector<1x32x256xf32> to vector<32x256xf32>
    %72 = vector.shape_cast %69 : vector<32x256xf32> to vector<1x32x256xf32>
    tpu.vector_store %arg8[%c0_117, %c0_118, %c0_119], %72 {strides = array<i32>} : memref<1x32x256xf32, #tpu.memory_space<vmem>>, vector<1x32x256xf32>,
    return
  }
  func.func @transform_0(%arg0: i32) -> (i32, i32, i32, i32) {
    %c0_i32 = arith.constant 0 : i32
    %c0_i32_0 = arith.constant 0 : i32
    %c0_i32_1 = arith.constant 0 : i32
    %c0_i32_2 = arith.constant 0 : i32
    return %arg0, %c0_i32, %c0_i32_0, %c0_i32_1 : i32, i32, i32, i32
  }
  func.func @transform_1(%arg0: i32) -> (i32, i32) {
    %c0_i32 = arith.constant 0 : i32
    %c0_i32_0 = arith.constant 0 : i32
    %c0_i32_1 = arith.constant 0 : i32
    return %c0_i32, %c0_i32_0 : i32, i32
  }
  func.func @transform_2(%arg0: i32) -> (i32, i32) {
    %c0_i32 = arith.constant 0 : i32
    %c0_i32_0 = arith.constant 0 : i32
    %c0_i32_1 = arith.constant 0 : i32
    return %c0_i32, %c0_i32_0 : i32, i32
  }
  func.func @transform_3(%arg0: i32) -> (i32, i32, i32) {
    %c0_i32 = arith.constant 0 : i32
    %c0_i32_0 = arith.constant 0 : i32
    %c0_i32_1 = arith.constant 0 : i32
    return %arg0, %c0_i32, %c0_i32_0 : i32, i32, i32
  }
  func.func @transform_4(%arg0: i32) -> (i32, i32) {
    %c0_i32 = arith.constant 0 : i32
    %c0_i32_0 = arith.constant 0 : i32
    %c0_i32_1 = arith.constant 0 : i32
    return %c0_i32, %c0_i32_0 : i32, i32
  }
  func.func @transform_5(%arg0: i32) -> (i32, i32) {
    %c0_i32 = arith.constant 0 : i32
    %c0_i32_0 = arith.constant 0 : i32
    %c0_i32_1 = arith.constant 0 : i32
    return %c0_i32, %c0_i32_0 : i32, i32
  }
  func.func @transform_6(%arg0: i32) -> (i32, i32, i32) {
    %c0_i32 = arith.constant 0 : i32
    %c0_i32_0 = arith.constant 0 : i32
    %c0_i32_1 = arith.constant 0 : i32
    return %arg0, %c0_i32, %c0_i32_0 : i32, i32, i32
  }
  func.func @transform_7(%arg0: i32) -> (i32, i32, i32) {
    %c0_i32 = arith.constant 0 : i32
    %c0_i32_0 = arith.constant 0 : i32
    %c0_i32_1 = arith.constant 0 : i32
    return %arg0, %c0_i32, %c0_i32_0 : i32, i32, i32
  }
}

</mosaic_0001>

<bundles_post_ra>
// kernel: basic_block_forward.1
= control target key start
LH: loop header
LB: loop body
LE: loop exit
PB: predicated region body
PF: predicated region fallthrough
CT: control target
= control target key end

     0   :  { %s5306_s0 = inlined_call_operand.vmem [shape: f32[2,2,16,128], index: 0, kind: input, shape index: {}]   ;;  %s5307_s1 = inlined_call_operand.hbm [shape: f32[1,128], index: 1, kind: input, shape index: {}]   ;;  %s5308_s2 = inlined_call_operand.hbm [shape: f32[1,128], index: 2, kind: input, shape index: {}]   ;;  %s5309_s3 = inlined_call_operand.hbm [shape: f32[2,896,256], index: 3, kind: input, shape index: {}]   ;;  %s5310_s4 = inlined_call_operand.hbm [shape: f32[1,256], index: 4, kind: input, shape index: {}]   ;;  %s5311_s5 = inlined_call_operand.hbm [shape: f32[1,256], index: 5, kind: input, shape index: {}]   ;;  %s5312_s6 = inlined_call_operand.hbm [shape: f32[2,1920,256], index: 6, kind: input, shape index: {}]   ;;  %s5313_s7 = inlined_call_operand.vmem [shape: f32[2,32,256], index: 7, kind: output, shape index: {}]  }
   0x1   :  { %5319 = sst [smem:[#allocation23_spill]] %s5307_s1 }
   0x2   :  { %5320 = sst [smem:[#allocation24_spill]] %s5308_s2 }
   0x3   :  { %5321 = sst [smem:[#allocation25_spill]] %s5309_s3 }
   0x4   :  { %12 = vsyncpa [#allocation7], 0 }
   0x5   :  { %13 = vsyncpa [#allocation9], 0 }
   0x6   :  { %14 = vsyncpa [#allocation13], 0  ;;  %s3645_s24 = smov 0   ;;  %s3647_s25 = smov 0  }
   0x7   :  { %s3649_s26 = smov 0   ;;  %s3651_s27 = smov 0  }
   0x8 LB: > { %s3664_s28 = sadd.s32 4294967295, %s3596_s27   ;;  %p108_p0 = scmp.ne.s32.totalorder %s3588_s25, %s3584_s24  ;;  %s3596_s27 = sphi %s3651_s27, %s5339_s27   ;;  %s3592_s26 = sphi %s3649_s26, %s5338_s26   ;;  %s3588_s25 = sphi %s3647_s25, %s5337_s25   ;;  %s3584_s24 = sphi %s3645_s24, %s5336_s24  }
   0x9   : > { %p109_p1 = scmp.eq.s32.totalorder %s3664_s28, 0  ;;  %p3237_p2 = scmp.ge.s32.totalorder %s3596_s27, 1 }
   0xa   : > { %p213_p3 = scmp.lt.s32.totalorder %s3596_s27, 3  ;;  %s5323_s1 = sld [smem:[#allocation23_spill]] }
   0xb   : > { %p3672_p4 = por %p109_p1, %p108_p0  ;;  %s3598_s11 = smov [#allocation6]  }
   0xc   : > { %p3679_p5 = pnand %p3237_p2, %p213_p3  ;;  %s227_s12 = sshll.u32 %s3598_s11, 4  ;;  %s228_s12 = int_to_ptr.vmem [resolvable:$true] %s227_s12 }
   0xd   : > { %s5325_s2 = sld [smem:[#allocation24_spill]]  ;;  %s3599_s17 = smov [#allocation8]  }
   0xe   : > { %p3284_p6 = pneg %p3679_p5  ;;  %s239_s18 = sshll.u32 %s3599_s17, 4  ;;  %s240_s18 = int_to_ptr.vmem [resolvable:$true] %s239_s18 }
   0xf   : > { %s3699_s19 = sadd.s32 1, %s3596_s27   ;;  %s95_s20 = sadd.s32 1, %s3592_s26 }
  0x10   : > { %s225_s9 = sshll.u32 %s5323_s1, 4  ;;  %p3690_p7 = pnand %p3284_p6, %p109_p1  ;;  %s226_s9 = int_to_ptr.hbm [resolvable:$true] %s225_s9 }
  0x11   : > { %s92_s21 = ssub.s32 %s3596_s27, %s3699_s19  ;;  %p102_p8 = scmp.ne.s32.totalorder %s3592_s26, %s3588_s25 }
  0x12   : > { %3287 = dma.hbm_to_vmem [thread:$0]  (!%p3690_p7), %s226_s9, 16, %s228_s12, [#allocation7]  }
  0x13   : > { %s237_s15 = sshll.u32 %s5325_s2, 4  ;;  %p93_p9 = scmp.eq.s32.totalorder %s92_s21, 0  ;;  %s238_s15 = int_to_ptr.hbm [resolvable:$true] %s237_s15 }
  0x14   : > { %3290 = dma.hbm_to_vmem [thread:$0]  (!%p3690_p7), %s238_s15, 16, %s240_s18, [#allocation9]  }
  0x15   : > { %p103_p10 = scmp.eq.s32.totalorder %s3596_s27, 0  ;;  %p3308_p11 = scmp.lt.s32.totalorder %s3596_s27, 2 }
  0x16   : > { %s282_s22 = sand.u32 1, %s3596_s27   ;;  %s5314_s24 = sand.u32 1, %s3592_s26  }
  0x17   : > { %s3710_s23 = scalar_select %p93_p9, %s3592_s26, %s95_s20  }
  0x18   : > { %p104_p12 = por %p103_p10, %p102_p8  ;;  %s3259_s30 = smul.u32 1792, %s3596_s27 }
  0x19   : > { %s3258_s8 = smul.u32 1792, %s5314_s24  ;;  %s5328_s3 = sld [smem:[#allocation25_spill]] }
  0x1a   : > { %p3716_p13 = pnand %p3308_p11, %p104_p12  ;;  %s249_s21 = sshll.u32 %s5310_s4, 4  ;;  %s250_s21 = int_to_ptr.hbm [resolvable:$true] %s249_s21 }
  0x1b   : > { %s286_s15 = scalar_lea.vmem [#allocation10], %s3258_s8  ;;  %s3726_s24 = scalar_lea.sflag [#allocation7], %s282_s22 }
  0x1c   : > { %s294_s17 = sshll.u32 %s286_s15, 4  ;;  %p3426_p2 = pneg %p3716_p13  ;;  %s295_s17 = int_to_ptr.vmem [resolvable:$true] %s294_s17 }
  0x1f   : > { %s291_s13 = scalar_lea.hbm %s5328_s3, %s3259_s30  ;;  %s3429_s11 = scalar_lea.hbm %s5328_s3, 3584 }
  0x20   : > { %s292_s14 = sshll.u32 %s291_s13, 4  ;;  %s293_s14 = int_to_ptr.hbm [resolvable:$true] %s292_s14 }
  0x21   : > { %s3422_s1 = sshra.s32 %s293_s14, 4  ;;  %s3423_s1 = int_to_ptr.hbm [resolvable:$true] %s3422_s1 }
  0x22   : > { %s3424_s2 = scalar_lea.hbm %s3423_s1, 1792  ;;  %p3430_p8 = scmp.lt.s32.totalorder %s3423_s1, %s5328_s3 }
  0x23   : > { %p3425_p0 = scmp.ne.s32.totalorder %s3423_s1, %s3424_s2  ;;  %p3431_p9 = scmp.lt.s32.totalorder %s3429_s11, %s3424_s2 }
  0x25   : > { %p3427_p3 = pnand %p3426_p2, %p3425_p0  ;;  %p3432_p10 = por %p3431_p9, %p3430_p8 }
  0x27   : > { %p3428_p6 = pneg %p3427_p3 }
  0x29   : > { %p3433_p11 = pnand %p3432_p10, %p3428_p6 }
  0x2b   : > { %3436 = shalt.err (!%p3433_p11)
}
  0x2c   : > { %s5315_s22 = smov 256   ;;  %s5316_s15 = smov 16  }
  0x2d   : > { %3300 = dma.hbm_to_vmem [thread:$0]  (!%p3716_p13), %s293_s14, 28672, %s295_s17, %s3726_s24, %s5315_s22, %s5315_s22, %s5316_s15  }
  0x2e   : > { %s3602_s18 = smov [#allocation11]   ;;  %s261_s30 = sshll.u32 %s5311_s5, 4  ;;  %s262_s30 = int_to_ptr.hbm [resolvable:$true] %s261_s30 }
  0x2f   : > { %s251_s1 = sshll.u32 %s3602_s18, 4  ;;  %s5329_s8 = sand.u32 1, %s3592_s26   ;;  %s252_s1 = int_to_ptr.vmem [resolvable:$true] %s251_s1 }
  0x30   : > { %3293 = dma.hbm_to_vmem [thread:$0]  (!%p3690_p7), %s250_s21, 32, %s252_s1, [#allocation9]  }
  0x31   : > { %s3260_s11 = smul.u32 3840, %s5329_s8  ;;  %s3603_s12 = smov [#allocation12]  }
  0x32   : > { %s263_s13 = sshll.u32 %s3603_s12, 4  ;;  %s3261_s3 = smul.u32 3840, %s3596_s27  ;;  %s264_s13 = int_to_ptr.vmem [resolvable:$true] %s263_s13 }
  0x33   : > { %3296 = dma.hbm_to_vmem [thread:$0]  (!%p3690_p7), %s262_s30, 32, %s264_s13, [#allocation13]  }
  0x34   : > { %s313_s18 = scalar_lea.hbm %s5312_s6, %s3261_s3  ;;  %s308_s22 = scalar_lea.vmem [#allocation14], %s3260_s11 }
  0x35   : > { %s316_s2 = sshll.u32 %s308_s22, 4  ;;  %s314_s20 = sshll.u32 %s313_s18, 4  ;;  %s317_s2 = int_to_ptr.vmem [resolvable:$true] %s316_s2  ;;  %s315_s20 = int_to_ptr.hbm [resolvable:$true] %s314_s20 }
  0x36   : > { %s3512_s15 = sshra.s32 %s315_s20, 4  ;;  %s3519_s1 = scalar_lea.hbm %s5312_s6, 7680  ;;  %s3513_s15 = int_to_ptr.hbm [resolvable:$true] %s3512_s15 }
  0x37   : > { %s3514_s21 = scalar_lea.hbm %s3513_s15, 3840  ;;  %p3520_p7 = scmp.lt.s32.totalorder %s3513_s15, %s5312_s6 }
  0x38   : > { %p3515_p12 = scmp.ne.s32.totalorder %s3513_s15, %s3514_s21  ;;  %p3521_p6 = scmp.lt.s32.totalorder %s3519_s1, %s3514_s21 }
  0x3a   : > { %p3517_p0 = pnand %p3515_p12, %p3426_p2  ;;  %p3522_p8 = por %p3521_p6, %p3520_p7 }
  0x3c   : > { %p3518_p3 = pneg %p3517_p0 }
  0x3e   : > { %p3523_p9 = pnand %p3522_p8, %p3518_p3 }
  0x40   : > { %3526 = shalt.err (!%p3523_p9)
}
  0x41   : > { %s5330_s3 = smov 16   ;;  %s5331_s22 = smov 256  }
  0x42   : > { %3303 = dma.hbm_to_vmem [thread:$0]  (!%p3716_p13), %s315_s20, 61440, %s317_s2, %s3726_s24, %s5331_s22, %s5331_s22, %s5330_s3  }
  0x43   : > { %328 = sbr.rel (%p3679_p5) target bundleno = 778 (0x30a), region = 48 }
  0x48   : > { %3559 = dma.done.wait (%p109_p1), [#allocation7], 16  }
  0x49   : > { %3561 = vsyncadd (%p109_p1), [#allocation7], 4294967280 }
  0x4a   : > { %3563 = dma.done.wait (%p109_p1), [#allocation9], 16  }
  0x4b   : > { %3565 = vsyncadd (%p109_p1), [#allocation9], 4294967280  ;;  %s340_s9 = sand.u32 1, %s3664_s28   ;;  %s342_s24 = sand.u32 1, %s3588_s25  }
  0x4c   : > { %s3262_s15 = smul.u32 1792, %s342_s24  ;;  %s341_s10 = scalar_lea.sflag [#allocation7], %s340_s9 }
  0x4e   : > { %s3785_s11 = scalar_lea.vmem [#allocation10], %s3262_s15 }
  0x4f   : > { %3567 = dma.done.wait (%p3672_p4), %s341_s10, 28672  }
  0x50   : > { %3569 = vsyncadd (%p3672_p4), %s341_s10, 4294938624 }
  0x51   : > { %3571 = dma.done.wait (%p109_p1), [#allocation9], 32  }
  0x52   : > { %3573 = vsyncadd (%p109_p1), [#allocation9], 4294967264 }
  0x53   : > { %3575 = dma.done.wait (%p109_p1), [#allocation13], 32  }
  0x54   : > { %3577 = vsyncadd (%p109_p1), [#allocation13], 4294967264  ;;  %s3263_s12 = smul.u32 3840, %s342_s24 }
  0x56   : > { %s3799_s13 = scalar_lea.vmem [#allocation14], %s3263_s12 }
  0x57   : > { %3579 = dma.done.wait (%p3672_p4), %s341_s10, 61440  }
  0x58   : > { %3581 = vsyncadd (%p3672_p4), %s341_s10, 4294905856  ;;  %v3604_v0 = vmov 0.0   ;;  %v562_v1 = vld [vmem:[%s3785_s11 + $0xf0] sm:$0xff]  ;;  %v560_v4 = vld [vmem:[%s3785_s11 + $0xe0] sm:$0xff]  ;;  %p406_p1 = scmp.lt.s32.totalorder %s3664_s28, 1  ;;  %vm1214_vm0 = vcmask 1043456  }
  0x59   : > { %440 = vst [vmem:[#allocation2] sm:$0xf] %v3604_v0  ;;  %v594_v2 = vld [vmem:[%s3785_s11 + $0x1f0] sm:$0xff]  ;;  %756 = vmatpush.msra.mxu0 %v562_v1  ;;  %v592_v5 = vld [vmem:[%s3785_s11 + $0x1e0] sm:$0xff]  ;;  %v3866_v50 = vld [vmem:[#allocation6] ss:$0 sm:$0xff] }
  0x5a   : > { %441 = vst [vmem:[#allocation2 + $0x18] sm:$0xf] %v3604_v0  ;;  %v626_v3 = vld [vmem:[%s3785_s11 + $0x2f0] sm:$0xff]  ;;  %785 = vmatpush.msra.mxu1 %v594_v2  ;;  %v624_v6 = vld [vmem:[%s3785_s11 + $0x2e0] sm:$0xff]  ;;  %s5341_s28 = smov (!%p406_p1, %s3664_s28), 1  ;;  %vm1275_vm1 = vcmask 1046528  }
  0x5b   : > { %442 = vst [vmem:[#allocation2 + $0x14] sm:$0xf] %v3604_v0  ;;  %814 = vmatpush.msra.mxu2 %v626_v3  ;;  %v658_v7 = vld [vmem:[%s3785_s11 + $0x3f0] sm:$0xff]  ;;  %757 = vmatpush.msra.mxu0 %v560_v4  ;;  %v656_v11 = vld [vmem:[%s3785_s11 + $0x3e0] sm:$0xff]  ;;  %s3256_s29 = sshll.u32 %s5341_s28, 5  ;;  %vm1336_vm2 = vcmask 1045504  }
  0x5c   : > { %443 = vst [vmem:[#allocation2 + $0x2c] sm:$0xf] %v3604_v0  ;;  %v558_v8 = vld [vmem:[%s3785_s11 + $0xd0] sm:$0xff]  ;;  %786 = vmatpush.msra.mxu1 %v592_v5  ;;  %843 = vmatpush.msra.mxu3 %v658_v7  ;;  %v556_v12 = vld [vmem:[%s3785_s11 + $0xc0] sm:$0xff]  ;;  %s3857_s18 = scalar_lea.vmem %s5306_s0, %s3256_s29  ;;  %v3869_v52 = vld [vmem:[#allocation8] ss:$0 sm:$0xff] }
  0x5d   : > { %1198 = vst [vmem:[#allocation3 + $0x50] sm:$0xf] %v3604_v0  ;;  %v590_v9 = vld [vmem:[%s3785_s11 + $0x1d0] sm:$0xff]  ;;  %815 = vmatpush.msra.mxu2 %v624_v6  ;;  %v588_v13 = vld [vmem:[%s3785_s11 + $0x1c0] sm:$0xff]  ;;  %758 = vmatpush.msra.mxu0 %v558_v8  ;;  %vm1397_vm3 = vcmask 1044480   ;;  %vm1518_vm4 = vcmask 1042432  }
  0x5e   : > { %1199 = vst [vmem:[#allocation3] sm:$0xf] %v3604_v0  ;;  %v622_v10 = vld [vmem:[%s3785_s11 + $0x2d0] sm:$0xff]  ;;  %787 = vmatpush.msra.mxu1 %v590_v9  ;;  %v620_v14 = vld [vmem:[%s3785_s11 + $0x2c0] sm:$0xff]  ;;  %844 = vmatpush.msra.mxu3 %v656_v11  ;;  %vm1579_vm5 = vcmask 1041408   ;;  %vm1640_vm6 = vcmask 1040384  }
  0x5f   : > { %1200 = vst [vmem:[#allocation3 + $0x48] sm:$0xf] %v3604_v0  ;;  %v654_v15 = vld [vmem:[%s3785_s11 + $0x3d0] sm:$0xff]  ;;  %816 = vmatpush.msra.mxu2 %v622_v10  ;;  %759 = vmatpush.msra.mxu0 %v556_v12  ;;  %v652_v19 = vld [vmem:[%s3785_s11 + $0x3c0] sm:$0xff]  ;;  %s3257_s2 = sshll.u32 %s5341_s28, 6 }
  0x60   : > { %1201 = vst [vmem:[#allocation3 + $0x38] sm:$0xf] %v3604_v0  ;;  %v554_v16 = vld [vmem:[%s3785_s11 + $0xb0] sm:$0xff]  ;;  %788 = vmatpush.msra.mxu1 %v588_v13  ;;  %845 = vmatpush.msra.mxu3 %v654_v15  ;;  %v552_v20 = vld [vmem:[%s3785_s11 + $0xa0] sm:$0xff]  ;;  %s5264_s21 = scalar_lea.vmem %s5313_s7, %s3257_s2 }
  0x61   : > { %1202 = vst [vmem:[#allocation3 + $0x40] sm:$0xf0] %v3604_v0  ;;  %v586_v17 = vld [vmem:[%s3785_s11 + $0x1b0] sm:$0xff]  ;;  %817 = vmatpush.msra.mxu2 %v620_v14  ;;  %v584_v21 = vld [vmem:[%s3785_s11 + $0x1a0] sm:$0xff]  ;;  %760 = vmatpush.msra.mxu0 %v554_v16  ;;  %v563_v16 = vld [vmem:[%s3785_s11 + $0xf8] sm:$0xff] }
  0x62   : > { %1203 = vst [vmem:[#allocation3 + $0x20] sm:$0xf0] %v3604_v0  ;;  %v618_v18 = vld [vmem:[%s3785_s11 + $0x2b0] sm:$0xff]  ;;  %789 = vmatpush.msra.mxu1 %v586_v17  ;;  %v616_v22 = vld [vmem:[%s3785_s11 + $0x2a0] sm:$0xff]  ;;  %846 = vmatpush.msra.mxu3 %v652_v19 }
  0x63   : > { %1204 = vst [vmem:[#allocation3 + $0x8] sm:$0xf0] %v3604_v0  ;;  %v650_v23 = vld [vmem:[%s3785_s11 + $0x3b0] sm:$0xff]  ;;  %818 = vmatpush.msra.mxu2 %v618_v18  ;;  %761 = vmatpush.msra.mxu0 %v552_v20  ;;  %v648_v27 = vld [vmem:[%s3785_s11 + $0x3a0] sm:$0xff] }
  0x64   : > { %1205 = vst [vmem:[#allocation3 + $0x58] sm:$0xf0] %v3604_v0  ;;  %v550_v24 = vld [vmem:[%s3785_s11 + $0x90] sm:$0xff]  ;;  %790 = vmatpush.msra.mxu1 %v584_v21  ;;  %847 = vmatpush.msra.mxu3 %v650_v23  ;;  %v548_v28 = vld [vmem:[%s3785_s11 + $0x80] sm:$0xff] }
  0x65   : > { %v582_v25 = vld [vmem:[%s3785_s11 + $0x190] sm:$0xff]  ;;  %819 = vmatpush.msra.mxu2 %v616_v22  ;;  %v580_v29 = vld [vmem:[%s3785_s11 + $0x180] sm:$0xff]  ;;  %762 = vmatpush.msra.mxu0 %v550_v24 }
  0x66   : > { %v614_v26 = vld [vmem:[%s3785_s11 + $0x290] sm:$0xff]  ;;  %791 = vmatpush.msra.mxu1 %v582_v25  ;;  %v612_v30 = vld [vmem:[%s3785_s11 + $0x280] sm:$0xff]  ;;  %848 = vmatpush.msra.mxu3 %v648_v27 }
  0x67   : > { %v646_v31 = vld [vmem:[%s3785_s11 + $0x390] sm:$0xff]  ;;  %820 = vmatpush.msra.mxu2 %v614_v26  ;;  %763 = vmatpush.msra.mxu0 %v548_v28  ;;  %v644_v35 = vld [vmem:[%s3785_s11 + $0x380] sm:$0xff]  ;;  %v561_v26 = vld [vmem:[%s3785_s11 + $0xe8] sm:$0xff] }
  0x68   : > { %v546_v32 = vld [vmem:[%s3785_s11 + $0x70] sm:$0xff]  ;;  %792 = vmatpush.msra.mxu1 %v580_v29  ;;  %849 = vmatpush.msra.mxu3 %v646_v31  ;;  %v544_v36 = vld [vmem:[%s3785_s11 + $0x60] sm:$0xff]  ;;  %v559_v31 = vld [vmem:[%s3785_s11 + $0xd8] sm:$0xff] }
  0x69   : > { %v578_v33 = vld [vmem:[%s3785_s11 + $0x170] sm:$0xff]  ;;  %821 = vmatpush.msra.mxu2 %v612_v30  ;;  %v576_v37 = vld [vmem:[%s3785_s11 + $0x160] sm:$0xff]  ;;  %764 = vmatpush.msra.mxu0 %v546_v32 }
  0x6a   : > { %v610_v34 = vld [vmem:[%s3785_s11 + $0x270] sm:$0xff]  ;;  %793 = vmatpush.msra.mxu1 %v578_v33  ;;  %v608_v38 = vld [vmem:[%s3785_s11 + $0x260] sm:$0xff]  ;;  %850 = vmatpush.msra.mxu3 %v644_v35 }
  0x6b   : > { %v642_v39 = vld [vmem:[%s3785_s11 + $0x370] sm:$0xff]  ;;  %822 = vmatpush.msra.mxu2 %v610_v34  ;;  %765 = vmatpush.msra.mxu0 %v544_v36  ;;  %v640_v43 = vld [vmem:[%s3785_s11 + $0x360] sm:$0xff]  ;;  %v557_v36 = vld [vmem:[%s3785_s11 + $0xc8] sm:$0xff] }
  0x6c   : > { %v542_v40 = vld [vmem:[%s3785_s11 + $0x50] sm:$0xff]  ;;  %794 = vmatpush.msra.mxu1 %v576_v37  ;;  %v540_v44 = vld [vmem:[%s3785_s11 + $0x40] sm:$0xff]  ;;  %851 = vmatpush.msra.mxu3 %v642_v39 }
  0x6d   : > { %v574_v41 = vld [vmem:[%s3785_s11 + $0x150] sm:$0xff]  ;;  %v572_v45 = vld [vmem:[%s3785_s11 + $0x140] sm:$0xff]  ;;  %823 = vmatpush.msra.mxu2 %v608_v38  ;;  %766 = vmatpush.msra.mxu0 %v542_v40 }
  0x6e   : > { %v606_v42 = vld [vmem:[%s3785_s11 + $0x250] sm:$0xff]  ;;  %v604_v46 = vld [vmem:[%s3785_s11 + $0x240] sm:$0xff]  ;;  %795 = vmatpush.msra.mxu1 %v574_v41  ;;  %852 = vmatpush.msra.mxu3 %v640_v43 }
  0x6f   : > { %v638_v47 = vld [vmem:[%s3785_s11 + $0x350] sm:$0xff]  ;;  %824 = vmatpush.msra.mxu2 %v606_v42  ;;  %767 = vmatpush.msra.mxu0 %v540_v44  ;;  %v636_v54 = vld [vmem:[%s3785_s11 + $0x340] sm:$0xff] }
  0x70   : > { %v538_v48 = vld [vmem:[%s3785_s11 + $0x30] sm:$0xff]  ;;  %796 = vmatpush.msra.mxu1 %v572_v45  ;;  %853 = vmatpush.msra.mxu3 %v638_v47  ;;  %v536_v56 = vld [vmem:[%s3785_s11 + $0x20] sm:$0xff]  ;;  %v555_v45 = vld [vmem:[%s3785_s11 + $0xb8] sm:$0xff] }
  0x71   : > { %v416_v49 = vld [vmem:[%s3857_s18] sm:$0xff]  ;;  %825 = vmatpush.msra.mxu2 %v604_v46  ;;  %v568_v57 = vld [vmem:[%s3785_s11 + $0x120] sm:$0xff]  ;;  %768 = vmatpush.msra.mxu0 %v538_v48  ;;  %v417_v2 = vld [vmem:[%s3857_s18 + $0x8] sm:$0xff] }
  0x72   : > { %v570_v51 = vld [vmem:[%s3785_s11 + $0x130] sm:$0xff]  ;;  %v424_v55 = vmul.f32 %v3866_v50, %v416_v49  ;;  %v600_v58 = vld [vmem:[%s3785_s11 + $0x220] sm:$0xff]  ;;  %854 = vmatpush.msra.mxu3 %v636_v54  ;;  %v425_v5 = vmul.f32 %v3866_v50, %v417_v2  ;;  %v551_v54 = vld [vmem:[%s3785_s11 + $0x98] sm:$0xff] }
  0x73   : > { %v602_v53 = vld [vmem:[%s3785_s11 + $0x230] sm:$0xff]  ;;  %797 = vmatpush.msra.mxu1 %v570_v51  ;;  %769 = vmatpush.msra.mxu0 %v536_v56  ;;  %v632_v0 = vld [vmem:[%s3785_s11 + $0x320] sm:$0xff]  ;;  %v547_v2 = vld [vmem:[%s3785_s11 + $0x78] sm:$0xff] }
  0x74   : > { %v634_v59 = vld [vmem:[%s3785_s11 + $0x330] sm:$0xff]  ;;  %v432_v60 = vadd.f32 %v3869_v52, %v424_v55  ;;  %826 = vmatpush.msra.mxu2 %v602_v53  ;;  %v532_v3 = vld [vmem:[%s3785_s11] sm:$0xff]  ;;  %v433_v10 = vadd.f32 %v3869_v52, %v425_v5 }
  0x75   : > { %v534_v61 = vld [vmem:[%s3785_s11 + $0x10] sm:$0xff]  ;;  %798 = vmatpush.msra.mxu1 %v568_v57  ;;  %855 = vmatpush.msra.mxu3 %v634_v59  ;;  %v564_v4 = vld [vmem:[%s3785_s11 + $0x100] sm:$0xff] }
  0x76   : > { %v566_v62 = vld [vmem:[%s3785_s11 + $0x110] sm:$0xff]  ;;  %v3883_v1 = vmax.f32 %v432_v60, 0.0  ;;  %827 = vmatpush.msra.mxu2 %v600_v58  ;;  %770 = vmatpush.msra.mxu0 %v534_v61  ;;  %v596_v6 = vld [vmem:[%s3785_s11 + $0x200] sm:$0xff]  ;;  %v3898_v14 = vmax.f32 %v433_v10, 0.0  ;;  %v549_v61 = vld [vmem:[%s3785_s11 + $0x88] sm:$0xff] }
  0x77   : > { %v598_v63 = vld [vmem:[%s3785_s11 + $0x210] sm:$0xff]  ;;  %799 = vmatpush.msra.mxu1 %v566_v62  ;;  %856 = vmatpush.msra.mxu3 %v632_v0  ;;  %v628_v11 = vld [vmem:[%s3785_s11 + $0x300] sm:$0xff]  ;;  %v543_v10 = vld [vmem:[%s3785_s11 + $0x58] sm:$0xff] }
  0x78   : > { %v630_v7 = vld [vmem:[%s3785_s11 + $0x310] sm:$0xff]  ;;  %444 = vst [vmem:[#allocation2 + $0x4] sm:$0xff] %v3883_v1  ;;  %828 = vmatpush.msra.mxu2 %v598_v63  ;;  %771 = vmatpush.msra.mxu0 %v532_v3  ;;  %v688_v13 = vld [vmem:[%s3785_s11 + $0x4e0] sm:$0xff] }
  0x79   : > { %v690_v8 = vld [vmem:[%s3785_s11 + $0x4f0] sm:$0xff]  ;;  %800 = vmatpush.msra.mxu1 %v564_v4  ;;  %857 = vmatpush.msra.mxu3 %v630_v7  ;;  %v752_v15 = vld [vmem:[%s3785_s11 + $0x6e0] sm:$0xff]  ;;  %445 = vst [vmem:[#allocation2 + $0xc] sm:$0xff] %v3898_v14 }
  0x7a   : > { %v754_v9 = vld [vmem:[%s3785_s11 + $0x6f0] sm:$0xff]  ;;  %829 = vmatpush.msra.mxu2 %v596_v6  ;;  %872 = vmatpush.msrb.mxu0 %v690_v8  ;;  %v418_v17 = vld [vmem:[%s3857_s18 + $0x10] sm:$0xff]  ;;  %v419_v35 = vld [vmem:[%s3857_s18 + $0x18] sm:$0xff] }
  0x7b   : > { %v722_v12 = vld [vmem:[%s3785_s11 + $0x5f0] sm:$0xff]  ;;  %858 = vmatpush.msra.mxu3 %v628_v11  ;;  %v426_v18 = vmul.f32 %v3866_v50, %v418_v17  ;;  %v720_v20 = vld [vmem:[%s3785_s11 + $0x5e0] sm:$0xff]  ;;  %v427_v38 = vmul.f32 %v3866_v50, %v419_v35  ;;  %v553_v50 = vld [vmem:[%s3785_s11 + $0xa8] sm:$0xff] }
  0x7c   : > { %930 = vmatpush.msrb.mxu2 %v754_v9  ;;  %901 = vmatpush.msrb.mxu1 %v722_v12  ;;  %v686_v19 = vld [vmem:[%s3785_s11 + $0x4d0] sm:$0xff]  ;;  %v684_v27 = vld [vmem:[%s3785_s11 + $0x4c0] sm:$0xff]  ;;  %v545_v6 = vld [vmem:[%s3785_s11 + $0x68] sm:$0xff] }
  0x7d   : > { %859 = vmatmul.f32.vlgmr.msra.gmra.mxu3 %v3883_v1  ;;  %873 = vmatpush.msrb.mxu0 %v688_v13  ;;  %v750_v21 = vld [vmem:[%s3785_s11 + $0x6d0] sm:$0xff]  ;;  %v434_v25 = vadd.f32 %v3869_v52, %v426_v18  ;;  %v748_v29 = vld [vmem:[%s3785_s11 + $0x6c0] sm:$0xff]  ;;  %v435_v42 = vadd.f32 %v3869_v52, %v427_v38  ;;  %v541_v18 = vld [vmem:[%s3785_s11 + $0x48] sm:$0xff] }
  0x7e   : > { %931 = vmatpush.msrb.mxu2 %v752_v15  ;;  %959 = vmatpush.msrb.mxu3 %v563_v16  ;;  %v718_v28 = vld [vmem:[%s3785_s11 + $0x5d0] sm:$0xff]  ;;  %v716_v33 = vld [vmem:[%s3785_s11 + $0x5c0] sm:$0xff]  ;;  %v595_v38 = vld [vmem:[%s3785_s11 + $0x1f8] sm:$0xff] }
  0x7f   : > { %v3909_v22 = vld [vmem:[#allocation2 + $0x1] sm:$0xff]  ;;  %874 = vmatpush.msrb.mxu0 %v686_v19  ;;  %v3923_v30 = vmax.f32 %v434_v25, 0.0  ;;  %902 = vmatpush.msrb.mxu1 %v720_v20  ;;  %v680_v37 = vld [vmem:[%s3785_s11 + $0x4a0] sm:$0xff]  ;;  %v3947_v47 = vmax.f32 %v435_v42, 0.0  ;;  %v539_v25 = vld [vmem:[%s3785_s11 + $0x38] sm:$0xff] }
  0x80   : > { %v3911_v23 = vld [vmem:[#allocation2 + $0x2] sm:$0xff]  ;;  %772 = vmatmul.f32.vlgmr.msra.gmra.mxu0 %v3909_v22  ;;  %932 = vmatpush.msrb.mxu2 %v750_v21  ;;  %v3936_v40 = vld [vmem:[#allocation2 + $0xa] sm:$0xff]  ;;  %v744_v44 = vld [vmem:[%s3785_s11 + $0x6a0] sm:$0xff] }
  0x81   : > { %v3913_v24 = vld [vmem:[#allocation2 + $0x3] sm:$0xff]  ;;  %801 = vmatmul.f32.vlgmr.msra.gmra.mxu1 %v3911_v23  ;;  %960 = vmatpush.msrb.mxu3 %v561_v26  ;;  %446 = vst [vmem:[#allocation2 + $0x1c] sm:$0xff] %v3923_v30  ;;  %v3938_v41 = vld [vmem:[#allocation2 + $0xb] sm:$0xff]  ;;  %v712_v48 = vld [vmem:[%s3785_s11 + $0x5a0] sm:$0xff] }
  0x82   : > { %830 = vmatmul.f32.vlgmr.msra.gmra.mxu2 %v3913_v24  ;;  %v682_v32 = vld [vmem:[%s3785_s11 + $0x4b0] sm:$0xff]  ;;  %875 = vmatpush.msrb.mxu0 %v684_v27  ;;  %v676_v51 = vld [vmem:[%s3785_s11 + $0x480] sm:$0xff]  ;;  %447 = vst [vmem:[#allocation2 + $0x24] sm:$0xff] %v3947_v47  ;;  %v533_v42 = vld [vmem:[%s3785_s11 + $0x8] sm:$0xff] }
  0x83   : > { %v746_v34 = vld [vmem:[%s3785_s11 + $0x6b0] sm:$0xff]  ;;  %903 = vmatpush.msrb.mxu1 %v718_v28  ;;  %933 = vmatpush.msrb.mxu2 %v748_v29  ;;  %v740_v53 = vld [vmem:[%s3785_s11 + $0x680] sm:$0xff]  ;;  %v537_v29 = vld [vmem:[%s3785_s11 + $0x28] sm:$0xff] }
  0x84   : > { %961 = vmatpush.msrb.mxu3 %v559_v31  ;;  %v3934_v39 = vld [vmem:[#allocation2 + $0x9] sm:$0xff]  ;;  %876 = vmatpush.msrb.mxu0 %v682_v32  ;;  %v708_v59 = vld [vmem:[%s3785_s11 + $0x580] sm:$0xff] }
  0x85   : > { %904 = vmatpush.msrb.mxu1 %v716_v33  ;;  %934 = vmatpush.msrb.mxu2 %v746_v34  ;;  %v714_v43 = vld [vmem:[%s3785_s11 + $0x5b0] sm:$0xff]  ;;  %v672_v62 = vld [vmem:[%s3785_s11 + $0x460] sm:$0xff]  ;;  %v535_v34 = vld [vmem:[%s3785_s11 + $0x18] sm:$0xff] }
  0x86   : > { %962 = vmatpush.msrb.mxu3 %v557_v36  ;;  %877 = vmatpush.msrb.mxu0 %v680_v37  ;;  %v678_v46 = vld [vmem:[%s3785_s11 + $0x490] sm:$0xff]  ;;  %v736_v0 = vld [vmem:[%s3785_s11 + $0x660] sm:$0xff] }
  0x87   : > { %862 = vmatmul.f32.gmra.mxu3 %v3898_v14  ;;  %v742_v49 = vld [vmem:[%s3785_s11 + $0x690] sm:$0xff]  ;;  %905 = vmatpush.msrb.mxu1 %v714_v43  ;;  %v704_v4 = vld [vmem:[%s3785_s11 + $0x560] sm:$0xff]  ;;  %v659_v43 = vld [vmem:[%s3785_s11 + $0x3f8] sm:$0xff] }
  0x88   : > { %775 = vmatmul.f32.gmra.mxu0 %v3934_v39  ;;  %935 = vmatpush.msrb.mxu2 %v744_v44  ;;  %v710_v52 = vld [vmem:[%s3785_s11 + $0x590] sm:$0xff]  ;;  %v3960_v56 = vld [vmem:[#allocation2 + $0x19] sm:$0xff] }
  0x89   : > { %804 = vmatmul.f32.gmra.mxu1 %v3936_v40  ;;  %963 = vmatpush.msrb.mxu3 %v555_v45  ;;  %v674_v55 = vld [vmem:[%s3785_s11 + $0x470] sm:$0xff]  ;;  %v3962_v57 = vld [vmem:[#allocation2 + $0x1a] sm:$0xff] }
  0x8a   : > { %833 = vmatmul.f32.gmra.mxu2 %v3938_v41  ;;  %878 = vmatpush.msrb.mxu0 %v678_v46  ;;  %v3964_v58 = vld [vmem:[#allocation2 + $0x1b] sm:$0xff]  ;;  %v738_v60 = vld [vmem:[%s3785_s11 + $0x670] sm:$0xff]  ;;  %v627_v46 = vld [vmem:[%s3785_s11 + $0x2f8] sm:$0xff] }
  0x8b   : > { %906 = vmatpush.msrb.mxu1 %v712_v48  ;;  %936 = vmatpush.msrb.mxu2 %v742_v49  ;;  %v706_v63 = vld [vmem:[%s3785_s11 + $0x570] sm:$0xff]  ;;  %v668_v7 = vld [vmem:[%s3785_s11 + $0x440] sm:$0xff]  ;;  %v593_v45 = vld [vmem:[%s3785_s11 + $0x1e8] sm:$0xff] }
  0x8c   : > { %964 = vmatpush.msrb.mxu3 %v553_v50  ;;  %879 = vmatpush.msrb.mxu0 %v676_v51  ;;  %v670_v3 = vld [vmem:[%s3785_s11 + $0x450] sm:$0xff]  ;;  %v732_v9 = vld [vmem:[%s3785_s11 + $0x640] sm:$0xff]  ;;  %v657_v48 = vld [vmem:[%s3785_s11 + $0x3e8] sm:$0xff] }
  0x8d   : > { %907 = vmatpush.msrb.mxu1 %v710_v52  ;;  %937 = vmatpush.msrb.mxu2 %v740_v53  ;;  %v734_v5 = vld [vmem:[%s3785_s11 + $0x650] sm:$0xff]  ;;  %v700_v16 = vld [vmem:[%s3785_s11 + $0x540] sm:$0xff]  ;;  %v691_v49 = vld [vmem:[%s3785_s11 + $0x4f8] sm:$0xff] }
  0x8e   : > { %965 = vmatpush.msrb.mxu3 %v551_v54  ;;  %880 = vmatpush.msrb.mxu0 %v674_v55  ;;  %v702_v8 = vld [vmem:[%s3785_s11 + $0x550] sm:$0xff]  ;;  %v664_v19 = vld [vmem:[%s3785_s11 + $0x420] sm:$0xff]  ;;  %v591_v50 = vld [vmem:[%s3785_s11 + $0x1d8] sm:$0xff] }
  0x8f   : > { %908 = vmatpush.msrb.mxu1 %v708_v59  ;;  %938 = vmatpush.msrb.mxu2 %v738_v60  ;;  %v3985_v11 = vld [vmem:[#allocation2 + $0x21] sm:$0xff]  ;;  %v728_v21 = vld [vmem:[%s3785_s11 + $0x620] sm:$0xff]  ;;  %v655_v52 = vld [vmem:[%s3785_s11 + $0x3d8] sm:$0xff] }
  0x90   : > { %778 = vmatmul.f32.gmra.mxu0 %v3960_v56  ;;  %966 = vmatpush.msrb.mxu3 %v549_v61  ;;  %v3987_v12 = vld [vmem:[#allocation2 + $0x22] sm:$0xff]  ;;  %v696_v27 = vld [vmem:[%s3785_s11 + $0x520] sm:$0xff]  ;;  %v623_v55 = vld [vmem:[%s3785_s11 + $0x2d8] sm:$0xff] }
  0x91   : > { %807 = vmatmul.f32.gmra.mxu1 %v3962_v57  ;;  %865 = vmatmul.f32.gmra.mxu3 %v3923_v30  ;;  %v3989_v13 = vld [vmem:[#allocation2 + $0x23] sm:$0xff]  ;;  %v660_v31 = vld [vmem:[%s3785_s11 + $0x400] sm:$0xff]  ;;  %v687_v60 = vld [vmem:[%s3785_s11 + $0x4d8] sm:$0xff] }
  0x92   : > { %836 = vmatmul.f32.gmra.mxu2 %v3964_v58  ;;  %881 = vmatpush.msrb.mxu0 %v672_v62  ;;  %v666_v15 = vld [vmem:[%s3785_s11 + $0x430] sm:$0xff]  ;;  %v724_v33 = vld [vmem:[%s3785_s11 + $0x600] sm:$0xff]  ;;  %v625_v51 = vld [vmem:[%s3785_s11 + $0x2e8] sm:$0xff] }
  0x93   : > { %909 = vmatpush.msrb.mxu1 %v706_v63  ;;  %939 = vmatpush.msrb.mxu2 %v736_v0  ;;  %v730_v17 = vld [vmem:[%s3785_s11 + $0x630] sm:$0xff]  ;;  %v692_v36 = vld [vmem:[%s3785_s11 + $0x500] sm:$0xff]  ;;  %v689_v53 = vld [vmem:[%s3785_s11 + $0x4e8] sm:$0xff] }
  0x94   : > { %967 = vmatpush.msrb.mxu3 %v547_v2  ;;  %882 = vmatpush.msrb.mxu0 %v670_v3  ;;  %v698_v20 = vld [vmem:[%s3785_s11 + $0x530] sm:$0xff]  ;;  %v589_v54 = vld [vmem:[%s3785_s11 + $0x1c8] sm:$0xff]  ;;  %v4039_v61 = vld [vmem:[#allocation2 + $0xf] sm:$0xff] }
  0x95   : > { %910 = vmatpush.msrb.mxu1 %v704_v4  ;;  %940 = vmatpush.msrb.mxu2 %v734_v5  ;;  %v662_v26 = vld [vmem:[%s3785_s11 + $0x410] sm:$0xff]  ;;  %v653_v59 = vld [vmem:[%s3785_s11 + $0x3c8] sm:$0xff]  ;;  %v587_v62 = vld [vmem:[%s3785_s11 + $0x1b8] sm:$0xff] }
  0x96   : > { %968 = vmatpush.msrb.mxu3 %v545_v6  ;;  %883 = vmatpush.msrb.mxu0 %v668_v7  ;;  %v726_v28 = vld [vmem:[%s3785_s11 + $0x610] sm:$0xff]  ;;  %v621_v63 = vld [vmem:[%s3785_s11 + $0x2c8] sm:$0xff]  ;;  %v651_v0 = vld [vmem:[%s3785_s11 + $0x3b8] sm:$0xff] }
  0x97   : > { %911 = vmatpush.msrb.mxu1 %v702_v8  ;;  %941 = vmatpush.msrb.mxu2 %v732_v9  ;;  %v694_v32 = vld [vmem:[%s3785_s11 + $0x510] sm:$0xff]  ;;  %v685_v2 = vld [vmem:[%s3785_s11 + $0x4c8] sm:$0xff]  ;;  %v4046_v3 = vld [vmem:[#allocation2 + $0xe] sm:$0xff] }
  0x98   : > { %969 = vmatpush.msrb.mxu3 %v543_v10  ;;  %781 = vmatmul.f32.gmra.mxu0 %v3985_v11  ;;  %v4011_v35 = vld [vmem:[#allocation2 + $0x5] sm:$0xff]  ;;  %v585_v4 = vld [vmem:[%s3785_s11 + $0x1a8] sm:$0xff] }
  0x99   : > { %810 = vmatmul.f32.gmra.mxu1 %v3987_v12  ;;  %884 = vmatpush.msrb.mxu0 %v666_v15  ;;  %v4014_v37 = vld [vmem:[#allocation2 + $0x7] sm:$0xff]  ;;  %v649_v6 = vld [vmem:[%s3785_s11 + $0x3a8] sm:$0xff] }
  0x9a   : > { %839 = vmatmul.f32.gmra.mxu2 %v3989_v13  ;;  %912 = vmatpush.msrb.mxu1 %v700_v16  ;;  %v4020_v44 = vld [vmem:[#allocation2 + $0x6] sm:$0xff]  ;;  %v617_v9 = vld [vmem:[%s3785_s11 + $0x2a8] sm:$0xff] }
  0x9b   : > { %942 = vmatpush.msrb.mxu2 %v730_v17  ;;  %970 = vmatpush.msrb.mxu3 %v541_v18  ;;  %v619_v5 = vld [vmem:[%s3785_s11 + $0x2b8] sm:$0xff]  ;;  %v681_v15 = vld [vmem:[%s3785_s11 + $0x4a8] sm:$0xff] }
  0x9c   : > { %868 = vmatmul.f32.gmra.mxu3 %v3947_v47  ;;  %885 = vmatpush.msrb.mxu0 %v664_v19  ;;  %v683_v7 = vld [vmem:[%s3785_s11 + $0x4b8] sm:$0xff]  ;;  %v581_v16 = vld [vmem:[%s3785_s11 + $0x188] sm:$0xff] }
  0x9d   : > { %913 = vmatpush.msrb.mxu1 %v698_v20  ;;  %943 = vmatpush.msrb.mxu2 %v728_v21  ;;  %v583_v8 = vld [vmem:[%s3785_s11 + $0x198] sm:$0xff]  ;;  %v645_v18 = vld [vmem:[%s3785_s11 + $0x388] sm:$0xff] }
  0x9e   : > { %971 = vmatpush.msrb.mxu3 %v539_v25  ;;  %886 = vmatpush.msrb.mxu0 %v662_v26  ;;  %v647_v10 = vld [vmem:[%s3785_s11 + $0x398] sm:$0xff]  ;;  %v4065_v20 = vld [vmem:[#allocation2 + $0x1f] sm:$0xff] }
  0x9f   : > { %914 = vmatpush.msrb.mxu1 %v696_v27  ;;  %944 = vmatpush.msrb.mxu2 %v726_v28  ;;  %v615_v17 = vld [vmem:[%s3785_s11 + $0x298] sm:$0xff]  ;;  %v613_v25 = vld [vmem:[%s3785_s11 + $0x288] sm:$0xff] }
  0xa0   : > { %972 = vmatpush.msrb.mxu3 %v537_v29  ;;  %887 = vmatpush.msrb.mxu0 %v660_v31  ;;  %v679_v19 = vld [vmem:[%s3785_s11 + $0x498] sm:$0xff]  ;;  %v677_v27 = vld [vmem:[%s3785_s11 + $0x488] sm:$0xff] }
  0xa1   : > { %915 = vmatpush.msrb.mxu1 %v694_v32  ;;  %945 = vmatpush.msrb.mxu2 %v724_v33  ;;  %v579_v21 = vld [vmem:[%s3785_s11 + $0x178] sm:$0xff]  ;;  %v4072_v28 = vld [vmem:[#allocation2 + $0x1e] sm:$0xff] }
  0xa2   : > { %973 = vmatpush.msrb.mxu3 %v535_v34  ;;  %888 = vmatmul.f32.vlgmr.msrb.gmra.mxu0 %v4011_v35  ;;  %v643_v26 = vld [vmem:[%s3785_s11 + $0x378] sm:$0xff]  ;;  %v577_v29 = vld [vmem:[%s3785_s11 + $0x168] sm:$0xff] }
  0xa3   : > { %916 = vmatpush.msrb.mxu1 %v692_v36  ;;  %946 = vmatmul.f32.vlgmr.msrb.gmra.mxu2 %v4014_v37  ;;  %v611_v31 = vld [vmem:[%s3785_s11 + $0x278] sm:$0xff]  ;;  %v641_v32 = vld [vmem:[%s3785_s11 + $0x368] sm:$0xff] }
  0xa4   : > { %988 = vmatpush.msra.mxu0 %v595_v38  ;;  %974 = vmatpush.msrb.mxu3 %v533_v42  ;;  %v675_v33 = vld [vmem:[%s3785_s11 + $0x478] sm:$0xff]  ;;  %v609_v36 = vld [vmem:[%s3785_s11 + $0x268] sm:$0xff] }
  0xa5   : > { %1046 = vmatpush.msra.mxu2 %v659_v43  ;;  %917 = vmatmul.f32.vlgmr.msrb.gmra.mxu1 %v4020_v44  ;;  %v575_v34 = vld [vmem:[%s3785_s11 + $0x158] sm:$0xff]  ;;  %v673_v42 = vld [vmem:[%s3785_s11 + $0x468] sm:$0xff] }
  0xa6   : > { %975 = vmatmul.f32.vlgmr.msrb.gmra.mxu3 %v3909_v22  ;;  %989 = vmatpush.msra.mxu0 %v593_v45  ;;  %v4037_v22 = vld [vmem:[#allocation2 + $0xd] sm:$0xff]  ;;  %v573_v43 = vld [vmem:[%s3785_s11 + $0x148] sm:$0xff] }
  0xa7   : > { %1017 = vmatpush.msra.mxu1 %v627_v46  ;;  %1047 = vmatpush.msra.mxu2 %v657_v48  ;;  %v639_v38 = vld [vmem:[%s3785_s11 + $0x358] sm:$0xff]  ;;  %v637_v46 = vld [vmem:[%s3785_s11 + $0x348] sm:$0xff] }
  0xa8   : > { %1075 = vmatpush.msra.mxu3 %v691_v49  ;;  %990 = vmatpush.msra.mxu0 %v591_v50  ;;  %v607_v45 = vld [vmem:[%s3785_s11 + $0x258] sm:$0xff] }
  0xa9   : > { %1018 = vmatpush.msra.mxu1 %v625_v51  ;;  %1048 = vmatpush.msra.mxu2 %v655_v52  ;;  %v671_v48 = vld [vmem:[%s3785_s11 + $0x458] sm:$0xff]  ;;  %v605_v51 = vld [vmem:[%s3785_s11 + $0x248] sm:$0xff] }
  0xaa   : > { %1076 = vmatpush.msra.mxu3 %v689_v53  ;;  %991 = vmatpush.msra.mxu0 %v589_v54  ;;  %v4091_v49 = vld [vmem:[#allocation2 + $0x27] sm:$0xff]  ;;  %v669_v53 = vld [vmem:[%s3785_s11 + $0x448] sm:$0xff] }
  0xab   : > { %1019 = vmatpush.msra.mxu1 %v623_v55  ;;  %1049 = vmatpush.msra.mxu2 %v653_v59  ;;  %v571_v50 = vld [vmem:[%s3785_s11 + $0x138] sm:$0xff]  ;;  %v569_v55 = vld [vmem:[%s3785_s11 + $0x128] sm:$0xff] }
  0xac   : > { %1077 = vmatpush.msra.mxu3 %v687_v60  ;;  %891 = vmatmul.f32.gmra.mxu0 %v4037_v22  ;;  %v635_v52 = vld [vmem:[%s3785_s11 + $0x338] sm:$0xff]  ;;  %v633_v60 = vld [vmem:[%s3785_s11 + $0x328] sm:$0xff] }
  0xad   : > { %949 = vmatmul.f32.gmra.mxu2 %v4039_v61  ;;  %992 = vmatpush.msra.mxu0 %v587_v62  ;;  %v4098_v54 = vld [vmem:[#allocation2 + $0x26] sm:$0xff] }
  0xae   : > { %1020 = vmatpush.msra.mxu1 %v621_v63  ;;  %1050 = vmatpush.msra.mxu2 %v651_v0  ;;  %v603_v59 = vld [vmem:[%s3785_s11 + $0x238] sm:$0xff]  ;;  %v601_v0 = vld [vmem:[%s3785_s11 + $0x228] sm:$0xff] }
  0xaf   : > { %1078 = vmatpush.msra.mxu3 %v685_v2  ;;  %920 = vmatmul.f32.gmra.mxu1 %v4046_v3  ;;  %v667_v62 = vld [vmem:[%s3785_s11 + $0x438] sm:$0xff] }
  0xb0   : > { %978 = vmatmul.f32.gmra.mxu3 %v3934_v39  ;;  %993 = vmatpush.msra.mxu0 %v585_v4  ;;  %v4063_v39 = vld [vmem:[#allocation2 + $0x1d] sm:$0xff]  ;;  %v567_v63 = vld [vmem:[%s3785_s11 + $0x118] sm:$0xff] }
  0xb1   : > { %1021 = vmatpush.msra.mxu1 %v619_v5  ;;  %1051 = vmatpush.msra.mxu2 %v649_v6  ;;  %v631_v2 = vld [vmem:[%s3785_s11 + $0x318] sm:$0xff]  ;;  %v665_v4 = vld [vmem:[%s3785_s11 + $0x428] sm:$0xff] }
  0xb2   : > { %1079 = vmatpush.msra.mxu3 %v683_v7  ;;  %994 = vmatpush.msra.mxu0 %v583_v8  ;;  %v565_v5 = vld [vmem:[%s3785_s11 + $0x108] sm:$0xff]  ;;  %v599_v6 = vld [vmem:[%s3785_s11 + $0x218] sm:$0xff] }
  0xb3   : > { %1022 = vmatpush.msra.mxu1 %v617_v9  ;;  %1052 = vmatpush.msra.mxu2 %v647_v10  ;;  %v629_v7 = vld [vmem:[%s3785_s11 + $0x308] sm:$0xff]  ;;  %v663_v8 = vld [vmem:[%s3785_s11 + $0x418] sm:$0xff] }
  0xb4   : > { %1080 = vmatpush.msra.mxu3 %v681_v15  ;;  %995 = vmatpush.msra.mxu0 %v581_v16  ;;  %v723_v9 = vld [vmem:[%s3785_s11 + $0x5f8] sm:$0xff]  ;;  %v661_v10 = vld [vmem:[%s3785_s11 + $0x408] sm:$0xff] }
  0xb5   : > { %1023 = vmatpush.msra.mxu1 %v615_v17  ;;  %1053 = vmatpush.msra.mxu2 %v645_v18  ;;  %v721_v15 = vld [vmem:[%s3785_s11 + $0x5e8] sm:$0xff]  ;;  %v755_v16 = vld [vmem:[%s3785_s11 + $0x6f8] sm:$0xff] }
  0xb6   : > { %1081 = vmatpush.msra.mxu3 %v679_v19  ;;  %894 = vmatmul.f32.gmra.mxu0 %v4063_v39  ;;  %v719_v17 = vld [vmem:[%s3785_s11 + $0x5d8] sm:$0xff]  ;;  %v753_v18 = vld [vmem:[%s3785_s11 + $0x6e8] sm:$0xff] }
  0xb7   : > { %952 = vmatmul.f32.gmra.mxu2 %v4065_v20  ;;  %996 = vmatpush.msra.mxu0 %v579_v21  ;;  %v751_v19 = vld [vmem:[%s3785_s11 + $0x6d8] sm:$0xff]  ;;  %v749_v21 = vld [vmem:[%s3785_s11 + $0x6c8] sm:$0xff] }
  0xb8   : > { %1024 = vmatpush.msra.mxu1 %v613_v25  ;;  %1054 = vmatpush.msra.mxu2 %v643_v26  ;;  %v711_v25 = vld [vmem:[%s3785_s11 + $0x598] sm:$0xff]  ;;  %v745_v26 = vld [vmem:[%s3785_s11 + $0x6a8] sm:$0xff] }
  0xb9   : > { %1082 = vmatpush.msra.mxu3 %v677_v27  ;;  %923 = vmatmul.f32.gmra.mxu1 %v4072_v28  ;;  %v709_v27 = vld [vmem:[%s3785_s11 + $0x588] sm:$0xff] }
  0xba   : > { %981 = vmatmul.f32.gmra.mxu3 %v3960_v56  ;;  %997 = vmatpush.msra.mxu0 %v577_v29  ;;  %v4089_v56 = vld [vmem:[#allocation2 + $0x25] sm:$0xff]  ;;  %v741_v29 = vld [vmem:[%s3785_s11 + $0x688] sm:$0xff] }
  0xbb   : > { %1025 = vmatpush.msra.mxu1 %v611_v31  ;;  %1055 = vmatpush.msra.mxu2 %v641_v32  ;;  %v703_v31 = vld [vmem:[%s3785_s11 + $0x558] sm:$0xff]  ;;  %v737_v32 = vld [vmem:[%s3785_s11 + $0x668] sm:$0xff] }
  0xbc   : > { %1083 = vmatpush.msra.mxu3 %v675_v33  ;;  %998 = vmatpush.msra.mxu0 %v575_v34  ;;  %v701_v33 = vld [vmem:[%s3785_s11 + $0x548] sm:$0xff] }
  0xbd   : > { %1026 = vmatpush.msra.mxu1 %v609_v36  ;;  %1056 = vmatpush.msra.mxu2 %v639_v38  ;;  %v733_v34 = vld [vmem:[%s3785_s11 + $0x648] sm:$0xff]  ;;  %v695_v36 = vld [vmem:[%s3785_s11 + $0x518] sm:$0xff] }
  0xbe   : > { %1084 = vmatpush.msra.mxu3 %v673_v42  ;;  %999 = vmatpush.msra.mxu0 %v573_v43  ;;  %v729_v38 = vld [vmem:[%s3785_s11 + $0x628] sm:$0xff]  ;;  %v727_v43 = vld [vmem:[%s3785_s11 + $0x618] sm:$0xff] }
  0xbf   : > { %1027 = vmatpush.msra.mxu1 %v607_v45  ;;  %1057 = vmatpush.msra.mxu2 %v637_v46  ;;  %v693_v42 = vld [vmem:[%s3785_s11 + $0x508] sm:$0xff] }
  0xc0   : > { %1085 = vmatpush.msra.mxu3 %v671_v48  ;;  %897 = vmatmul.f32.gmra.mxu0 %v4089_v56  ;;  %v1833_v46 = vld [vmem:[%s3799_s13 + $0x2e0] sm:$0xff]  ;;  %v1831_v48 = vld [vmem:[%s3799_s13 + $0x2d0] sm:$0xff] }
  0xc1   : > { %955 = vmatmul.f32.gmra.mxu2 %v4091_v49  ;;  %1000 = vmatpush.msra.mxu0 %v571_v50  ;;  %v1829_v50 = vld [vmem:[%s3799_s13 + $0x2c0] sm:$0xff] }
  0xc2   : > { %1028 = vmatpush.msra.mxu1 %v605_v51  ;;  %1058 = vmatpush.msra.mxu2 %v635_v52  ;;  %v1763_v52 = vld [vmem:[%s3799_s13 + $0xb0] sm:$0xff] }
  0xc3   : > { %1086 = vmatpush.msra.mxu3 %v669_v53  ;;  %926 = vmatmul.f32.gmra.mxu1 %v4098_v54  ;;  %v1827_v53 = vld [vmem:[%s3799_s13 + $0x2b0] sm:$0xff] }
  0xc4   : > { %984 = vmatmul.f32.gmra.mxu3 %v3985_v11  ;;  %1001 = vmatpush.msra.mxu0 %v569_v55  ;;  %v597_v11 = vld [vmem:[%s3785_s11 + $0x208] sm:$0xff] }
  0xc5   : > { %1029 = vmatpush.msra.mxu1 %v603_v59  ;;  %1059 = vmatpush.msra.mxu2 %v633_v60  ;;  %v1761_v55 = vld [vmem:[%s3799_s13 + $0xa0] sm:$0xff] }
  0xc6   : > { %1087 = vmatpush.msra.mxu3 %v667_v62  ;;  %1002 = vmatpush.msra.mxu0 %v567_v63  ;;  %v1825_v59 = vld [vmem:[%s3799_s13 + $0x2a0] sm:$0xff]  ;;  %v1759_v62 = vld [vmem:[%s3799_s13 + $0x90] sm:$0xff] }
  0xc7   : > { %1030 = vmatpush.msra.mxu1 %v601_v0  ;;  %1060 = vmatpush.msra.mxu2 %v631_v2  ;;  %v1823_v63 = vld [vmem:[%s3799_s13 + $0x290] sm:$0xff]  ;;  %v1757_v2 = vld [vmem:[%s3799_s13 + $0x80] sm:$0xff] }
  0xc8   : > { %1088 = vmatpush.msra.mxu3 %v665_v4  ;;  %1003 = vmatpush.msra.mxu0 %v565_v5  ;;  %v1821_v4 = vld [vmem:[%s3799_s13 + $0x280] sm:$0xff] }
  0xc9   : > { %1031 = vmatpush.msra.mxu1 %v599_v6  ;;  %1061 = vmatpush.msra.mxu2 %v629_v7  ;;  %v1755_v6 = vld [vmem:[%s3799_s13 + $0x70] sm:$0xff] }
  0xca   : > { %1089 = vmatpush.msra.mxu3 %v663_v8  ;;  %1004 = vmatmul.f32.vlgmr.msra.gmra.mxu0 %v3911_v23  ;;  %v717_v23 = vld [vmem:[%s3785_s11 + $0x5c8] sm:$0xff]  ;;  %v1819_v7 = vld [vmem:[%s3799_s13 + $0x270] sm:$0xff] }
  0xcb   : > { %1032 = vmatpush.msra.mxu1 %v597_v11  ;;  %1062 = vmatmul.f32.vlgmr.msra.gmra.mxu2 %v3883_v1  ;;  %v715_v1 = vld [vmem:[%s3785_s11 + $0x5b8] sm:$0xff]  ;;  %v1753_v8 = vld [vmem:[%s3799_s13 + $0x60] sm:$0xff] }
  0xcc   : > { %1104 = vmatpush.msrb.mxu0 %v723_v9  ;;  %1090 = vmatpush.msra.mxu3 %v661_v10  ;;  %v1817_v11 = vld [vmem:[%s3799_s13 + $0x260] sm:$0xff] }
  0xcd   : > { %1033 = vmatmul.f32.vlgmr.msra.gmra.mxu1 %v3913_v24  ;;  %1091 = vmatmul.f32.vlgmr.msra.gmra.mxu3 %v4011_v35  ;;  %v713_v24 = vld [vmem:[%s3785_s11 + $0x5a8] sm:$0xff]  ;;  %v747_v35 = vld [vmem:[%s3785_s11 + $0x6b8] sm:$0xff] }
  0xce   : > { %1105 = vmatpush.msrb.mxu0 %v721_v15  ;;  %1133 = vmatpush.msrb.mxu1 %v755_v16  ;;  %v1751_v15 = vld [vmem:[%s3799_s13 + $0x50] sm:$0xff] }
  0xcf   : > { %v1815_v16 = vld [vmem:[%s3799_s13 + $0x250] sm:$0xff] }
  0xd0   : > { %1106 = vmatpush.msrb.mxu0 %v719_v17  ;;  %1134 = vmatpush.msrb.mxu1 %v753_v18 }
  0xd2   : > { %1107 = vmatpush.msrb.mxu0 %v717_v23  ;;  %1135 = vmatpush.msrb.mxu1 %v751_v19  ;;  %v1749_v23 = vld [vmem:[%s3799_s13 + $0x40] sm:$0xff] }
  0xd3   : > { %1007 = vmatmul.f32.gmra.mxu0 %v3936_v40  ;;  %1065 = vmatmul.f32.gmra.mxu2 %v3898_v14  ;;  %v743_v40 = vld [vmem:[%s3785_s11 + $0x698] sm:$0xff]  ;;  %v1813_v19 = vld [vmem:[%s3799_s13 + $0x240] sm:$0xff] }
  0xd4   : > { %1108 = vmatpush.msrb.mxu0 %v715_v1  ;;  %1136 = vmatpush.msrb.mxu1 %v749_v21  ;;  %v707_v14 = vld [vmem:[%s3785_s11 + $0x578] sm:$0xff] }
  0xd5   : > { %1036 = vmatmul.f32.gmra.mxu1 %v3938_v41  ;;  %1094 = vmatmul.f32.gmra.mxu3 %v4037_v22  ;;  %v705_v41 = vld [vmem:[%s3785_s11 + $0x568] sm:$0xff]  ;;  %v739_v22 = vld [vmem:[%s3785_s11 + $0x678] sm:$0xff] }
  0xd6   : > { %1109 = vmatpush.msrb.mxu0 %v713_v24  ;;  %1137 = vmatpush.msrb.mxu1 %v747_v35  ;;  %v1747_v21 = vld [vmem:[%s3799_s13 + $0x30] sm:$0xff] }
  0xd7   : > { %v1811_v24 = vld [vmem:[%s3799_s13 + $0x230] sm:$0xff] }
  0xd8   : > { %1110 = vmatpush.msrb.mxu0 %v711_v25  ;;  %1138 = vmatpush.msrb.mxu1 %v745_v26  ;;  %v1745_v26 = vld [vmem:[%s3799_s13 + $0x20] sm:$0xff] }
  0xda   : > { %1111 = vmatpush.msrb.mxu0 %v709_v27  ;;  %1139 = vmatpush.msrb.mxu1 %v743_v40  ;;  %v1809_v27 = vld [vmem:[%s3799_s13 + $0x220] sm:$0xff] }
  0xdb   : > { %1010 = vmatmul.f32.gmra.mxu0 %v3962_v57  ;;  %1068 = vmatmul.f32.gmra.mxu2 %v3923_v30  ;;  %v735_v57 = vld [vmem:[%s3785_s11 + $0x658] sm:$0xff] }
  0xdc   : > { %1112 = vmatpush.msrb.mxu0 %v707_v14  ;;  %1140 = vmatpush.msrb.mxu1 %v741_v29  ;;  %v699_v30 = vld [vmem:[%s3785_s11 + $0x538] sm:$0xff] }
  0xdd   : > { %1039 = vmatmul.f32.gmra.mxu1 %v3964_v58  ;;  %1097 = vmatmul.f32.gmra.mxu3 %v4063_v39  ;;  %v697_v58 = vld [vmem:[%s3785_s11 + $0x528] sm:$0xff]  ;;  %v731_v39 = vld [vmem:[%s3785_s11 + $0x638] sm:$0xff] }
  0xde   : > { %1113 = vmatpush.msrb.mxu0 %v705_v41  ;;  %1141 = vmatpush.msrb.mxu1 %v739_v22  ;;  %v1743_v14 = vld [vmem:[%s3799_s13 + $0x10] sm:$0xff] }
  0xdf   : > { %v1807_v29 = vld [vmem:[%s3799_s13 + $0x210] sm:$0xff] }
  0xe0   : > { %1114 = vmatpush.msrb.mxu0 %v703_v31  ;;  %1142 = vmatpush.msrb.mxu1 %v737_v32  ;;  %v4221_v31 = vld [vmem:[#allocation11] sm:$0x3] }
  0xe2   : > { %1115 = vmatpush.msrb.mxu0 %v701_v33  ;;  %1143 = vmatpush.msrb.mxu1 %v735_v57  ;;  %v1741_v33 = vld [vmem:[%s3799_s13] sm:$0xff] }
  0xe3   : > { %1013 = vmatmul.f32.gmra.mxu0 %v3987_v12  ;;  %1071 = vmatmul.f32.gmra.mxu2 %v3947_v47  ;;  %v725_v12 = vld [vmem:[%s3785_s11 + $0x608] sm:$0xff] }
  0xe4   : > { %1116 = vmatpush.msrb.mxu0 %v699_v30  ;;  %1144 = vmatpush.msrb.mxu1 %v733_v34  ;;  %v1805_v57 = vld [vmem:[%s3799_s13 + $0x200] sm:$0xff]  ;;  %v4227_v30 = vld [vmem:[#allocation12] sm:$0x3] }
  0xe5   : > { %1042 = vmatmul.f32.gmra.mxu1 %v3989_v13  ;;  %1100 = vmatmul.f32.gmra.mxu3 %v4089_v56 }
  0xe6   : > { %1117 = vmatpush.msrb.mxu0 %v697_v58  ;;  %1145 = vmatpush.msrb.mxu1 %v731_v39  ;;  %v4231_v39 = vperm.slane %v4221_v31, 0 }
  0xe8   : > { %1118 = vmatpush.msrb.mxu0 %v695_v36  ;;  %1146 = vmatpush.msrb.mxu1 %v729_v38  ;;  %v1899_v36 = vld [vmem:[%s3799_s13 + $0x4f0] sm:$0xff] }
  0xe9   : > { %v1963_v38 = vld [vmem:[%s3799_s13 + $0x6f0] sm:$0xff] }
  0xea   : > { %1119 = vmatpush.msrb.mxu0 %v693_v42  ;;  %1147 = vmatpush.msrb.mxu1 %v727_v43 }
  0xeb   : > { %1120 = vmatmul.f32.vlgmr.msrb.gmra.mxu0 %v4020_v44 }
  0xec   : > { %1148 = vmatpush.msrb.mxu1 %v725_v12  ;;  %v4236_v12 = vperm.slane %v4227_v30, 0 }
  0xed   : > { %1149 = vmatmul.f32.vlgmr.msrb.gmra.mxu1 %v4014_v37  ;;  %v1771_v37 = vld [vmem:[%s3799_s13 + $0xf0] sm:$0xff] }
  0xee   : > { %2221 = vmatpush.msrb.mxu2 %v1771_v37 }
  0xf3   : > { %1123 = vmatmul.f32.gmra.mxu0 %v4046_v3  ;;  %v1835_v3 = vld [vmem:[%s3799_s13 + $0x2f0] sm:$0xff] }
  0xf4   : > { %2279 = vmatpush.msra.mxu0 %v1835_v3  ;;  %v1895_v3 = vld [vmem:[%s3799_s13 + $0x4d0] sm:$0xff] }
  0xf5   : > { %1152 = vmatmul.f32.gmra.mxu1 %v4039_v61 }
  0xf6   : > { %2280 = vmatpush.msra.mxu0 %v1833_v46 }
  0xf8   : > { %2281 = vmatpush.msra.mxu0 %v1831_v48  ;;  %v1957_v48 = vld [vmem:[%s3799_s13 + $0x6c0] sm:$0xff] }
  0xfa   : > { %2282 = vmatpush.msra.mxu0 %v1829_v50 }
  0xfb   : > { %1126 = vmatmul.f32.gmra.mxu0 %v4072_v28  ;;  %v1769_v28 = vld [vmem:[%s3799_s13 + $0xe0] sm:$0xff] }
  0xfc   : > { %2222 = vmatpush.msrb.mxu2 %v1769_v28  ;;  %2283 = vmatpush.msra.mxu0 %v1827_v53  ;;  %v1891_v53 = vld [vmem:[%s3799_s13 + $0x4b0] sm:$0xff] }
  0xfd   : > { %v773_v47 = vpop.f32.mrf.mxu0  ;;  %1155 = vmatmul.f32.gmra.mxu1 %v4065_v20  ;;  %v1767_v20 = vld [vmem:[%s3799_s13 + $0xd0] sm:$0xff] }
  0xfe   : > { %v802_v13 = vpop.f32.mrf.mxu1  ;;  %2223 = vmatpush.msrb.mxu2 %v1767_v20  ;;  %2284 = vmatpush.msra.mxu0 %v1825_v59  ;;  %v1893_v20 = vld [vmem:[%s3799_s13 + $0x4c0] sm:$0xff] }
  0xff   : > { %v803_v10 = vadd.f32 %v802_v13, %v773_v47  ;;  %v1897_v47 = vld [vmem:[%s3799_s13 + $0x4e0] sm:$0xff] }
 0x100   : > { %2285 = vmatpush.msra.mxu0 %v1823_v63  ;;  %v1961_v13 = vld [vmem:[%s3799_s13 + $0x6e0] sm:$0xff] }
 0x101   : > { %v1889_v63 = vld [vmem:[%s3799_s13 + $0x4a0] sm:$0xff] }
 0x102   : > { %2286 = vmatpush.msra.mxu0 %v1821_v4 }
 0x103   : > { %1129 = vmatmul.f32.gmra.mxu0 %v4098_v54  ;;  %v860_v54 = vpop.f32.mrf.mxu3 }
 0x104   : > { %2287 = vmatpush.msra.mxu0 %v1819_v7 }
 0x105   : > { %v831_v44 = vpop.f32.mrf.mxu2  ;;  %v4172_v45 = vpop.f32.mrf.mxu0  ;;  %1158 = vmatmul.f32.gmra.mxu1 %v4091_v49  ;;  %v1765_v49 = vld [vmem:[%s3799_s13 + $0xc0] sm:$0xff] }
 0x106   : > { %v4177_v61 = vpop.f32.mrf.mxu1  ;;  %2224 = vmatpush.msrb.mxu2 %v1765_v49  ;;  %2288 = vmatpush.msra.mxu0 %v1817_v11  ;;  %v832_v18 = vadd.f32 %v831_v44, %v803_v10  ;;  %v1885_v11 = vld [vmem:[%s3799_s13 + $0x480] sm:$0xff] }
 0x107   : > { %v806_v32 = vadd.f32 %v4177_v61, %v4172_v45  ;;  %v1959_v61 = vld [vmem:[%s3799_s13 + $0x6d0] sm:$0xff] }
 0x108   : > { %2225 = vmatpush.msrb.mxu2 %v1763_v52  ;;  %2289 = vmatpush.msra.mxu0 %v1815_v16  ;;  %v861_v35 = vadd.f32 %v860_v54, %v832_v18  ;;  %v1955_v54 = vld [vmem:[%s3799_s13 + $0x6b0] sm:$0xff] }
 0x109   : > { %v1883_v16 = vld [vmem:[%s3799_s13 + $0x470] sm:$0xff] }
 0x10a   : > { %2226 = vmatpush.msrb.mxu2 %v1761_v55  ;;  %2290 = vmatpush.msra.mxu0 %v1813_v19  ;;  %v1947_v18 = vld [vmem:[%s3799_s13 + $0x670] sm:$0xff] }
 0x10b   : > { %v863_v9 = vpop.f32.mrf.mxu3 }
 0x10c   : > { %2227 = vmatpush.msrb.mxu2 %v1759_v62  ;;  %2291 = vmatpush.msra.mxu0 %v1811_v24 }
 0x10d   : > { %v4183_v56 = vpop.f32.mrf.mxu2  ;;  %v4187_v51 = vpop.f32.mrf.mxu0 }
 0x10e   : > { %v4193_v60 = vpop.f32.mrf.mxu1  ;;  %2228 = vmatpush.msrb.mxu2 %v1757_v2  ;;  %2292 = vmatpush.msra.mxu0 %v1809_v27  ;;  %v835_v34 = vadd.f32 %v4183_v56, %v806_v32  ;;  %v1953_v2 = vld [vmem:[%s3799_s13 + $0x6a0] sm:$0xff] }
 0x10f   : > { %v809_v50 = vadd.f32 %v4193_v60, %v4187_v51  ;;  %v1887_v60 = vld [vmem:[%s3799_s13 + $0x490] sm:$0xff] }
 0x110   : > { %2229 = vmatpush.msrb.mxu2 %v1755_v6  ;;  %2293 = vmatpush.msra.mxu0 %v1807_v29  ;;  %v864_v44 = vadd.f32 %v863_v9, %v835_v34  ;;  %v1951_v6 = vld [vmem:[%s3799_s13 + $0x690] sm:$0xff]  ;;  %v1949_v9 = vld [vmem:[%s3799_s13 + $0x680] sm:$0xff] }
 0x111   : > { %v1941_v34 = vld [vmem:[%s3799_s13 + $0x640] sm:$0xff] }
 0x112   : > { %2230 = vmatpush.msrb.mxu2 %v1753_v8  ;;  %2294 = vmatpush.msra.mxu0 %v1805_v57 }
 0x114   : > { %2231 = vmatpush.msrb.mxu2 %v1751_v15  ;;  %v866_v41 = vpop.f32.mrf.mxu3  ;;  %2395 = vmatpush.msrb.mxu0 %v1963_v38 }
 0x115   : > { %v4197_v0 = vpop.f32.mrf.mxu2  ;;  %v4201_v5 = vpop.f32.mrf.mxu0 }
 0x116   : > { %v4209_v17 = vpop.f32.mrf.mxu1  ;;  %2232 = vmatpush.msrb.mxu2 %v1749_v23  ;;  %2396 = vmatpush.msrb.mxu0 %v1961_v13  ;;  %v838_v55 = vadd.f32 %v4197_v0, %v809_v50  ;;  %v1939_v13 = vld [vmem:[%s3799_s13 + $0x630] sm:$0xff] }
 0x117   : > { %v1871_v50 = vld [vmem:[%s3799_s13 + $0x410] sm:$0xff] }
 0x118   : > { %2233 = vmatpush.msrb.mxu2 %v1747_v21  ;;  %2397 = vmatpush.msrb.mxu0 %v1959_v61  ;;  %v867_v7 = vadd.f32 %v866_v41, %v838_v55  ;;  %v812_v21 = vadd.f32 %v4209_v17, %v4201_v5  ;;  %v1879_v41 = vld [vmem:[%s3799_s13 + $0x450] sm:$0xff]  ;;  %v1873_v61 = vld [vmem:[%s3799_s13 + $0x420] sm:$0xff] }
 0x11a   : > { %2234 = vmatpush.msrb.mxu2 %v1745_v26  ;;  %2398 = vmatpush.msrb.mxu0 %v1957_v48 }
 0x11c   : > { %2235 = vmatpush.msrb.mxu2 %v1743_v14  ;;  %2399 = vmatpush.msrb.mxu0 %v1955_v54  ;;  %v1935_v54 = vld [vmem:[%s3799_s13 + $0x610] sm:$0xff] }
 0x11d   : > { %v4213_v1 = vpop.f32.mrf.mxu2 }
 0x11e   : > { %2236 = vmatpush.msrb.mxu2 %v1741_v33  ;;  %2400 = vmatpush.msrb.mxu0 %v1953_v2  ;;  %v1801_v2 = vld [vmem:[%s3799_s13 + $0x1e0] sm:$0xff] }
 0x11f   : > { %v889_v25 = vpop.f32.mrf.mxu0  ;;  %v4246_v56 = vpop.f32.mrf.mxu3 }
 0x120   : > { %v890_v40 = vadd.f32 %v889_v25, %v861_v35  ;;  %2337 = vmatpush.msra.mxu2 %v1899_v36  ;;  %2401 = vmatpush.msrb.mxu0 %v1951_v6  ;;  %v1881_v35 = vld [vmem:[%s3799_s13 + $0x460] sm:$0xff] }
 0x121   : > { %v1945_v25 = vld [vmem:[%s3799_s13 + $0x660] sm:$0xff] }
 0x122   : > { %v918_v22 = vpop.f32.mrf.mxu1  ;;  %2338 = vmatpush.msra.mxu2 %v1897_v47  ;;  %2402 = vmatpush.msrb.mxu0 %v1949_v9  ;;  %v1875_v47 = vld [vmem:[%s3799_s13 + $0x430] sm:$0xff]  ;;  %v1933_v6 = vld [vmem:[%s3799_s13 + $0x600] sm:$0xff] }
 0x123   : > { %v919_v58 = vadd.f32 %v918_v22, %v890_v40  ;;  %v841_v40 = vadd.f32 %v4213_v1, %v812_v21  ;;  %v1943_v22 = vld [vmem:[%s3799_s13 + $0x650] sm:$0xff]  ;;  %v1877_v1 = vld [vmem:[%s3799_s13 + $0x440] sm:$0xff] }
 0x124   : > { %2339 = vmatpush.msra.mxu2 %v1895_v3  ;;  %2403 = vmatpush.msrb.mxu0 %v1947_v18  ;;  %v1863_v9 = vld [vmem:[%s3799_s13 + $0x3d0] sm:$0xff]  ;;  %v1861_v21 = vld [vmem:[%s3799_s13 + $0x3c0] sm:$0xff] }
 0x125   : > { %v870_v38 = vadd.f32 %v4246_v56, %v841_v40  ;;  %v1803_v56 = vld [vmem:[%s3799_s13 + $0x1f0] sm:$0xff] }
 0x126   : > { %v947_v42 = vpop.f32.mrf.mxu2  ;;  %2340 = vmatpush.msra.mxu2 %v1893_v20  ;;  %2404 = vmatpush.msrb.mxu0 %v1945_v25 }
 0x127   : > { %v948_v43 = vadd.f32 %v947_v42, %v919_v58  ;;  %2250 = vmatpush.msrb.mxu3 %v1803_v56  ;;  %v1787_v56 = vld [vmem:[%s3799_s13 + $0x170] sm:$0xff] }
 0x128   : > { %2341 = vmatpush.msra.mxu2 %v1891_v53  ;;  %2405 = vmatpush.msrb.mxu0 %v1943_v22  ;;  %v1857_v22 = vld [vmem:[%s3799_s13 + $0x3a0] sm:$0xff] }
 0x129   : > { %v1168_v45 = vmul.f32 %v4231_v39, %v948_v43  ;;  %v892_v37 = vpop.f32.mrf.mxu0  ;;  %v4263_v23 = vpop.f32.mrf.mxu3  ;;  %2251 = vmatpush.msrb.mxu3 %v1801_v2  ;;  %v2013_v2 = vld [vmem:[%s3799_s13 + $0x880] sm:$0xff] }
 0x12a   : > { %v893_v46 = vadd.f32 %v892_v37, %v864_v44  ;;  %2342 = vmatpush.msra.mxu2 %v1889_v63  ;;  %2406 = vmatpush.msrb.mxu0 %v1941_v34  ;;  %v1791_v34 = vld [vmem:[%s3799_s13 + $0x190] sm:$0xff] }
 0x12b   : > { %v1182_v28 = vadd.f32 %v4236_v12, %v1168_v45 }
 0x12c   : > { %v921_v49 = vpop.f32.mrf.mxu1  ;;  %2343 = vmatpush.msra.mxu2 %v1887_v60  ;;  %2407 = vmatpush.msrb.mxu0 %v1939_v13  ;;  %v1789_v13 = vld [vmem:[%s3799_s13 + $0x180] sm:$0xff] }
 0x12d   : > { %v1190_v52 = vmax.f32 %v1182_v28, 0.0  ;;  %v922_v62 = vadd.f32 %v921_v49, %v893_v46  ;;  %v1937_v28 = vld [vmem:[%s3799_s13 + $0x620] sm:$0xff]  ;;  %v1867_v49 = vld [vmem:[%s3799_s13 + $0x3f0] sm:$0xff] }
 0x12e   : > { %2344 = vmatpush.msra.mxu2 %v1885_v11  ;;  %2408 = vmatpush.msrb.mxu0 %v1937_v28  ;;  %v1799_v11 = vld [vmem:[%s3799_s13 + $0x1d0] sm:$0xff] }
 0x12f   : > { %v1215_v59 = vrot.slane %v1190_v52, 4  ;;  %2308 = vmatpush.msra.mxu1 %v1867_v49  ;;  %2252 = vmatpush.msrb.mxu3 %v1799_v11  ;;  %v1851_v49 = vld [vmem:[%s3799_s13 + $0x370] sm:$0xff] }
 0x130   : > { %v950_v4 = vpop.f32.mrf.mxu2  ;;  %2345 = vmatpush.msra.mxu2 %v1883_v16  ;;  %2409 = vmatpush.msrb.mxu0 %v1935_v54  ;;  %v2015_v54 = vld [vmem:[%s3799_s13 + $0x890] sm:$0xff] }
 0x131   : > { %1239 = vst [vmem:[#allocation3 + $0x50] sm:$0xf0] %v1215_v59  ;;  %v951_v51 = vadd.f32 %v950_v4, %v922_v62  ;;  %v1865_v4 = vld [vmem:[%s3799_s13 + $0x3e0] sm:$0xff] }
 0x132   : > { %2346 = vmatpush.msra.mxu2 %v1881_v35  ;;  %2309 = vmatpush.msra.mxu1 %v1865_v4  ;;  %v2089_v35 = vld [vmem:[%s3799_s13 + $0xae0] sm:$0xff] }
 0x133   : > { %v1170_v0 = vmul.f32 %v4231_v39, %v951_v51  ;;  %v895_v8 = vpop.f32.mrf.mxu0  ;;  %v4295_v46 = vpop.f32.mrf.mxu3  ;;  %v1869_v51 = vld [vmem:[%s3799_s13 + $0x400] sm:$0xff]  ;;  %2410 = vmatpush.msrb.mxu0 %v1933_v6 }
 0x134   : > { %v896_v15 = vadd.f32 %v895_v8, %v867_v7  ;;  %2347 = vmatpush.msra.mxu2 %v1879_v41  ;;  %2310 = vmatpush.msra.mxu1 %v1863_v9  ;;  %v2077_v4 = vld [vmem:[%s3799_s13 + $0xa80] sm:$0xff]  ;;  %v1847_v9 = vld [vmem:[%s3799_s13 + $0x350] sm:$0xff] }
 0x135   : > { %v1184_v10 = vadd.f32 %v4236_v12, %v1170_v0 }
 0x136   : > { %v924_v19 = vpop.f32.mrf.mxu1  ;;  %2348 = vmatpush.msra.mxu2 %v1877_v1  ;;  %2311 = vmatpush.msra.mxu1 %v1861_v21 }
 0x137   : > { %v1192_v24 = vmax.f32 %v1184_v10, 0.0  ;;  %v925_v29 = vadd.f32 %v924_v19, %v896_v15  ;;  %v2027_v10 = vld [vmem:[%s3799_s13 + $0x8f0] sm:$0xff]  ;;  %v1797_v19 = vld [vmem:[%s3799_s13 + $0x1c0] sm:$0xff] }
 0x138   : > { %v1251_v26 = vld [vmem:[#allocation3 + $0x50] sm:$0xfe]  ;;  %2349 = vmatpush.msra.mxu2 %v1875_v47  ;;  %v2091_v15 = vld [vmem:[%s3799_s13 + $0xaf0] sm:$0xff]  ;;  %2253 = vmatpush.msrb.mxu3 %v1797_v19 }
 0x139   : > { %v1312_v27 = vld [vmem:[#allocation3 + $0x50] sm:$0xfc]  ;;  %v1217_v14 = vrot.slane %v1192_v24, 4  ;;  %v1276_v33 = vrot.slane %v1251_v26, 1  ;;  %v2025_v24 = vld [vmem:[%s3799_s13 + $0x8e0] sm:$0xff]  ;;  %v1859_v26 = vld [vmem:[%s3799_s13 + $0x3b0] sm:$0xff] }
 0x13a   : > { %v953_v32 = vpop.f32.mrf.mxu2  ;;  %v1337_v57 = vrot.slane %v1312_v27, 2  ;;  %2350 = vmatpush.msra.mxu2 %v1873_v61  ;;  %v2023_v27 = vld [vmem:[%s3799_s13 + $0x8d0] sm:$0xff]  ;;  %2312 = vmatpush.msra.mxu1 %v1859_v26 }
 0x13b   : > { %v4273_v5 = vsel %vm1214_vm0, %v1215_v59, %v1217_v14  ;;  %1243 = vst [vmem:[#allocation3 + $0x40] sm:$0xf] %v1217_v14  ;;  %v954_v17 = vadd.f32 %v953_v32, %v925_v29  ;;  %v2087_v29 = vld [vmem:[%s3799_s13 + $0xad0] sm:$0xff]  ;;  %v2021_v32 = vld [vmem:[%s3799_s13 + $0x8c0] sm:$0xff] }
 0x13c   : > { %1241 = vst [vmem:[#allocation3 + $0x28] sm:$0xff] %v4273_v5  ;;  %v1277_v58 = vrot.slane %v4273_v5, 1  ;;  %v1338_v36 = vrot.slane %v4273_v5, 2  ;;  %2351 = vmatpush.msra.mxu2 %v1871_v50  ;;  %2313 = vmatpush.msra.mxu1 %v1857_v22  ;;  %v1843_v22 = vld [vmem:[%s3799_s13 + $0x330] sm:$0xff] }
 0x13d   : > { %v1172_v42 = vmul.f32 %v4231_v39, %v954_v17  ;;  %v898_v43 = vpop.f32.mrf.mxu0  ;;  %v4331_v40 = vpop.f32.mrf.mxu3  ;;  %v2085_v17 = vld [vmem:[%s3799_s13 + $0xac0] sm:$0xff] }
 0x13e   : > { %v4285_v44 = vsel %vm1275_vm1, %v1276_v33, %v1277_v58  ;;  %v4288_v45 = vsel %vm1336_vm2, %v1337_v57, %v1338_v36  ;;  %v899_v3 = vadd.f32 %v898_v43, %v870_v38  ;;  %2352 = vmatpush.msra.mxu2 %v1869_v51  ;;  %v2083_v43 = vld [vmem:[%s3799_s13 + $0xab0] sm:$0xff] }
 0x13f   : > { %v1186_v37 = vadd.f32 %v4236_v12, %v1172_v42  ;;  %2237 = vmatmul.f32.vlgmr.msrb.gmra.mxu2 %v4285_v44  ;;  %2295 = vmatmul.f32.vlgmr.msra.gmra.mxu0 %v4288_v45  ;;  %v2019_v42 = vld [vmem:[%s3799_s13 + $0x8b0] sm:$0xff] }
 0x140   : > { %v927_v20 = vpop.f32.mrf.mxu1  ;;  %2453 = vmatpush.msrb.mxu2 %v2027_v10  ;;  %2511 = vmatpush.msra.mxu0 %v2091_v15  ;;  %v1783_v51 = vld [vmem:[%s3799_s13 + $0x150] sm:$0xff] }
 0x141   : > { %v1194_v48 = vmax.f32 %v1186_v37, 0.0  ;;  %v928_v59 = vadd.f32 %v927_v20, %v899_v3  ;;  %v1853_v37 = vld [vmem:[%s3799_s13 + $0x380] sm:$0xff]  ;;  %v2011_v10 = vld [vmem:[%s3799_s13 + $0x870] sm:$0xff] }
 0x142   : > { %v1255_v52 = vld [vmem:[#allocation3 + $0x40] sm:$0x1]  ;;  %2454 = vmatpush.msrb.mxu2 %v2025_v24  ;;  %2512 = vmatpush.msra.mxu0 %v2089_v35  ;;  %v2017_v3 = vld [vmem:[%s3799_s13 + $0x8a0] sm:$0xff]  ;;  %v2075_v15 = vld [vmem:[%s3799_s13 + $0xa70] sm:$0xff] }
 0x143   : > { %v1316_v53 = vld [vmem:[#allocation3 + $0x40] sm:$0x3]  ;;  %v4301_v55 = vrot.slane %v1194_v48, 4  ;;  %v1282_v62 = vrot.slane %v1255_v52, 1  ;;  %v2081_v48 = vld [vmem:[%s3799_s13 + $0xaa0] sm:$0xff] }
 0x144   : > { %v1343_v63 = vrot.slane %v1316_v53, 2  ;;  %v956_v60 = vpop.f32.mrf.mxu2  ;;  %2455 = vmatpush.msrb.mxu2 %v2023_v27  ;;  %2513 = vmatpush.msra.mxu0 %v2087_v29  ;;  %v1781_v24 = vld [vmem:[%s3799_s13 + $0x140] sm:$0xff]  ;;  %v1373_v27 = vld [vmem:[#allocation3 + $0x50] sm:$0xf8] }
 0x145   : > { %1245 = vst [vmem:[#allocation3 + $0x48] sm:$0xf0] %v4301_v55  ;;  %v957_v7 = vadd.f32 %v956_v60, %v928_v59  ;;  %v4309_v0 = vsel %vm1275_vm1, %v1277_v58, %v1282_v62  ;;  %v1855_v58 = vld [vmem:[%s3799_s13 + $0x390] sm:$0xff]  ;;  %v1785_v59 = vld [vmem:[%s3799_s13 + $0x160] sm:$0xff]  ;;  %v1434_v29 = vld [vmem:[#allocation3 + $0x50] sm:$0xf0] }
 0x146   : > { %v4312_v8 = vsel %vm1336_vm2, %v1338_v36, %v1343_v63  ;;  %2456 = vmatpush.msrb.mxu2 %v2021_v32  ;;  %2514 = vmatpush.msra.mxu0 %v2085_v17  ;;  %v1849_v62 = vld [vmem:[%s3799_s13 + $0x360] sm:$0xff]  ;;  %v2007_v32 = vld [vmem:[%s3799_s13 + $0x850] sm:$0xff] }
 0x147   : > { %v1174_v16 = vmul.f32 %v4231_v39, %v957_v7  ;;  %v4319_v18 = vpop.f32.mrf.mxu0  ;;  %2240 = vmatmul.f32.gmra.mxu2 %v4309_v0  ;;  %2298 = vmatmul.f32.gmra.mxu0 %v4312_v8  ;;  %v1795_v39 = vld [vmem:[%s3799_s13 + $0x1b0] sm:$0xff]  ;;  %v4373_v63 = vpop.f32.mrf.mxu3  ;;  %v1845_v35 = vld [vmem:[%s3799_s13 + $0x340] sm:$0xff] }
 0x148   : > { %2254 = vmatpush.msrb.mxu3 %v1795_v39  ;;  %2314 = vmatpush.msra.mxu1 %v1855_v58  ;;  %v1777_v17 = vld [vmem:[%s3799_s13 + $0x120] sm:$0xff] }
 0x149   : > { %v1188_v25 = vadd.f32 %v4236_v12, %v1174_v16  ;;  %v1793_v12 = vld [vmem:[%s3799_s13 + $0x1a0] sm:$0xff]  ;;  %2457 = vmatpush.msrb.mxu2 %v2019_v42  ;;  %2515 = vmatpush.msra.mxu0 %v2083_v43  ;;  %v1458_v42 = vrot.slane %v1434_v29, 4  ;;  %v1459_v43 = vrot.slane %v4273_v5, 4  ;;  %v1927_v29 = vld [vmem:[%s3799_s13 + $0x5d0] sm:$0xff] }
 0x14a   : > { %v4333_v14 = vpop.f32.mrf.mxu1  ;;  %2255 = vmatpush.msrb.mxu3 %v1793_v12  ;;  %2315 = vmatpush.msra.mxu1 %v1853_v37  ;;  %v1779_v12 = vld [vmem:[%s3799_s13 + $0x130] sm:$0xff] }
 0x14b   : > { %v1196_v41 = vmax.f32 %v1188_v25, 0.0  ;;  %2458 = vmatpush.msrb.mxu2 %v2017_v3  ;;  %2516 = vmatpush.msra.mxu0 %v2081_v48  ;;  %v2009_v25 = vld [vmem:[%s3799_s13 + $0x860] sm:$0xff]  ;;  %v2003_v37 = vld [vmem:[%s3799_s13 + $0x830] sm:$0xff] }
 0x14c   : > { %v1257_v33 = vld [vmem:[#allocation3 + $0x48] sm:$0xfe]  ;;  %2256 = vmatpush.msrb.mxu3 %v1791_v34  ;;  %2316 = vmatpush.msra.mxu1 %v1851_v49 }
 0x14d   : > { %v1318_v57 = vld [vmem:[#allocation3 + $0x48] sm:$0xfc]  ;;  %v1223_v1 = vrot.slane %v1196_v41, 4  ;;  %v1286_v36 = vrot.slane %v1257_v33, 1  ;;  %2459 = vmatpush.msrb.mxu2 %v2015_v54  ;;  %v2071_v33 = vld [vmem:[%s3799_s13 + $0xa50] sm:$0xff]  ;;  %v4427_v54 = vsel %vm1214_vm0, %v1458_v42, %v1459_v43  ;;  %v4464_v42 = vperm.slane %v4227_v30, 1 }
 0x14e   : > { %v1347_v38 = vrot.slane %v1318_v57, 2  ;;  %2257 = vmatpush.msrb.mxu3 %v1789_v13  ;;  %2317 = vmatpush.msra.mxu1 %v1849_v62  ;;  %v1063_v39 = vpop.f32.mrf.mxu2  ;;  %v2073_v41 = vld [vmem:[%s3799_s13 + $0xa60] sm:$0xff]  ;;  %v1006_v57 = vadd.f32 %v4319_v18, %v4263_v23  ;;  %v1775_v18 = vld [vmem:[%s3799_s13 + $0x110] sm:$0xff] }
 0x14f   : > { %v4346_v47 = vsel %vm1214_vm0, %v4301_v55, %v1223_v1  ;;  %1249 = vst [vmem:[#allocation3 + $0x8] sm:$0xf] %v1223_v1  ;;  %v2079_v55 = vld [vmem:[%s3799_s13 + $0xa90] sm:$0xff]  ;;  %2460 = vmatpush.msrb.mxu2 %v2013_v2  ;;  %v1841_v1 = vld [vmem:[%s3799_s13 + $0x320] sm:$0xff]  ;;  %v1438_v2 = vld [vmem:[#allocation3 + $0x40] sm:$0xf] }
 0x150   : > { %1247 = vst [vmem:[#allocation3 + $0x30] sm:$0xff] %v4346_v47  ;;  %v4352_v61 = vpop.f32.mrf.mxu0  ;;  %v1287_v28 = vrot.slane %v4346_v47, 1  ;;  %v1348_v20 = vrot.slane %v4346_v47, 2  ;;  %2258 = vmatpush.msrb.mxu3 %v1787_v56  ;;  %2517 = vmatpush.msra.mxu0 %v2079_v55  ;;  %v2005_v34 = vld [vmem:[%s3799_s13 + $0x840] sm:$0xff]  ;;  %v1092_v58 = vpop.f32.mrf.mxu3  ;;  %v1839_v13 = vld [vmem:[%s3799_s13 + $0x310] sm:$0xff] }
 0x151   : > { %2318 = vmatpush.msra.mxu1 %v1847_v9  ;;  %2461 = vmatpush.msrb.mxu2 %v2011_v10  ;;  %v2069_v23 = vld [vmem:[%s3799_s13 + $0xa40] sm:$0xff]  ;;  %v2063_v9 = vld [vmem:[%s3799_s13 + $0xa10] sm:$0xff] }
 0x152   : > { %v4359_v50 = vpop.f32.mrf.mxu1  ;;  %v4362_v52 = vsel %vm1275_vm1, %v1286_v36, %v1287_v28  ;;  %v4365_v53 = vsel %vm1336_vm2, %v1347_v38, %v1348_v20  ;;  %2259 = vmatpush.msrb.mxu3 %v1785_v59  ;;  %2518 = vmatpush.msra.mxu0 %v2077_v4  ;;  %v1398_v36 = vrot.slane %v1373_v27, 3  ;;  %v1399_v38 = vrot.slane %v4273_v5, 3  ;;  %v1773_v48 = vld [vmem:[%s3799_s13 + $0x100] sm:$0xff]  ;;  %v1987_v30 = vld [vmem:[%s3799_s13 + $0x7b0] sm:$0xff] }
 0x153   : > { %2243 = vmatmul.f32.gmra.mxu2 %v4362_v52  ;;  %2301 = vmatmul.f32.gmra.mxu0 %v4365_v53  ;;  %v1837_v55 = vld [vmem:[%s3799_s13 + $0x300] sm:$0xff] }
 0x154   : > { %2260 = vmatpush.msrb.mxu3 %v1783_v51  ;;  %2519 = vmatpush.msra.mxu0 %v2075_v15  ;;  %v4422_v49 = vsel %vm1397_vm3, %v1398_v36, %v1399_v38  ;;  %v2001_v59 = vld [vmem:[%s3799_s13 + $0x820] sm:$0xff]  ;;  %v1931_v51 = vld [vmem:[%s3799_s13 + $0x5f0] sm:$0xff] }
 0x155   : > { %2319 = vmatpush.msra.mxu1 %v1845_v35  ;;  %2462 = vmatpush.msrb.mxu2 %v2009_v25  ;;  %v2065_v4 = vld [vmem:[%s3799_s13 + $0xa20] sm:$0xff] }
 0x156   : > { %v1261_v60 = vld [vmem:[#allocation3 + $0x8] sm:$0x1]  ;;  %2261 = vmatpush.msrb.mxu3 %v1781_v24  ;;  %2520 = vmatpush.msra.mxu0 %v2073_v41  ;;  %v1464_v24 = vrot.slane %v1438_v2, 4  ;;  %v2215_v2 = vld [vmem:[%s3799_s13 + $0xed0] sm:$0xff] }
 0x157   : > { %v1322_v6 = vld [vmem:[#allocation3 + $0x8] sm:$0x3]  ;;  %v1292_v7 = vrot.slane %v1261_v60, 1  ;;  %2320 = vmatpush.msra.mxu1 %v1843_v22  ;;  %2463 = vmatpush.msrb.mxu2 %v2007_v32  ;;  %v1066_v60 = vpop.f32.mrf.mxu2  ;;  %v4447_v22 = vperm.slane %v4221_v31, 1  ;;  %v1991_v32 = vld [vmem:[%s3799_s13 + $0x7d0] sm:$0xff] }
 0x158   : > { %v1353_v11 = vrot.slane %v1322_v6, 2  ;;  %v4381_v16 = vpop.f32.mrf.mxu0  ;;  %2262 = vmatpush.msrb.mxu3 %v1779_v12  ;;  %2521 = vmatpush.msra.mxu0 %v2071_v33  ;;  %v1995_v6 = vld [vmem:[%s3799_s13 + $0x7f0] sm:$0xff]  ;;  %v1929_v10 = vld [vmem:[%s3799_s13 + $0x5e0] sm:$0xff]  ;;  %v1095_v41 = vpop.f32.mrf.mxu3 }
 0x159   : > { %v4384_v19 = vsel %vm1275_vm1, %v1287_v28, %v1292_v7  ;;  %2321 = vmatpush.msra.mxu1 %v1841_v1  ;;  %2464 = vmatpush.msrb.mxu2 %v2005_v34  ;;  %v1035_v28 = vadd.f32 %v4333_v14, %v1006_v57  ;;  %v1377_v14 = vld [vmem:[#allocation3 + $0x40] sm:$0x7]  ;;  %v1999_v7 = vld [vmem:[%s3799_s13 + $0x810] sm:$0xff]  ;;  %v1993_v35 = vld [vmem:[%s3799_s13 + $0x7e0] sm:$0xff] }
 0x15a   : > { %v4387_v21 = vsel %vm1336_vm2, %v1348_v20, %v1353_v11  ;;  %v4392_v26 = vpop.f32.mrf.mxu1  ;;  %2263 = vmatpush.msrb.mxu3 %v1777_v17  ;;  %2522 = vmatpush.msra.mxu0 %v2069_v23  ;;  %v2067_v20 = vld [vmem:[%s3799_s13 + $0xa30] sm:$0xff]  ;;  %v1009_v11 = vadd.f32 %v4352_v61, %v4295_v46  ;;  %v1404_v15 = vrot.slane %v1377_v14, 3  ;;  %v1997_v25 = vld [vmem:[%s3799_s13 + $0x800] sm:$0xff] }
 0x15b   : > { %2246 = vmatmul.f32.gmra.mxu2 %v4384_v19  ;;  %2304 = vmatmul.f32.gmra.mxu0 %v4387_v21  ;;  %v1064_v62 = vadd.f32 %v1063_v39, %v1035_v28  ;;  %v2061_v27 = vld [vmem:[%s3799_s13 + $0xa00] sm:$0xff]  ;;  %v2155_v33 = vld [vmem:[%s3799_s13 + $0xcf0] sm:$0xff] }
 0x15c   : > { %2264 = vmatpush.msrb.mxu3 %v1775_v18  ;;  %2322 = vmatpush.msra.mxu1 %v1839_v13  ;;  %v1038_v46 = vadd.f32 %v4359_v50, %v1009_v11  ;;  %v4454_v17 = vsel %vm1397_vm3, %v1399_v38, %v1404_v15  ;;  %v4459_v50 = vsel %vm1214_vm0, %v1459_v43, %v1464_v24  ;;  %v1379_v31 = vld [vmem:[#allocation3 + $0x48] sm:$0xf8]  ;;  %v2219_v1 = vld [vmem:[%s3799_s13 + $0xef0] sm:$0xff] }
 0x15d   : > { %2465 = vmatpush.msrb.mxu2 %v2003_v37  ;;  %2523 = vmatpush.msra.mxu0 %v2067_v20  ;;  %v1093_v39 = vadd.f32 %v1092_v58, %v1064_v62  ;;  %v1925_v34 = vld [vmem:[%s3799_s13 + $0x5c0] sm:$0xff]  ;;  %v1923_v13 = vld [vmem:[%s3799_s13 + $0x5b0] sm:$0xff]  ;;  %v1012_v37 = vadd.f32 %v4381_v16, %v4331_v40  ;;  %v1408_v14 = vrot.slane %v1379_v31, 3  ;;  %v1469_v62 = vrot.slane %v4346_v47, 4 }
 0x15e   : > { %2265 = vmatpush.msrb.mxu3 %v1773_v48  ;;  %2323 = vmatpush.msra.mxu1 %v1837_v55  ;;  %v1067_v58 = vadd.f32 %v1066_v60, %v1038_v46  ;;  %v1440_v38 = vld [vmem:[#allocation3 + $0x48] sm:$0xf0]  ;;  %v2151_v20 = vld [vmem:[%s3799_s13 + $0xcd0] sm:$0xff]  ;;  %v1409_v55 = vrot.slane %v4346_v47, 3 }
 0x15f   : > { %2466 = vmatpush.msrb.mxu2 %v2001_v59  ;;  %2524 = vmatpush.msra.mxu0 %v2065_v4  ;;  %v1989_v43 = vld [vmem:[%s3799_s13 + $0x7c0] sm:$0xff]  ;;  %v1069_v48 = vpop.f32.mrf.mxu2  ;;  %v1468_v59 = vrot.slane %v1440_v38, 4  ;;  %v1919_v15 = vld [vmem:[%s3799_s13 + $0x590] sm:$0xff] }
 0x160   : > { %v4412_v3 = vpop.f32.mrf.mxu0  ;;  %2366 = vmatpush.msra.mxu3 %v1931_v51  ;;  %2424 = vmatpush.msrb.mxu1 %v1995_v6  ;;  %v2153_v23 = vld [vmem:[%s3799_s13 + $0xce0] sm:$0xff]  ;;  %v1096_v16 = vadd.f32 %v1095_v41, %v1067_v58  ;;  %v1098_v24 = vpop.f32.mrf.mxu3 }
 0x161   : > { %2467 = vmatpush.msrb.mxu2 %v1999_v7  ;;  %2525 = vmatpush.msra.mxu0 %v2063_v9  ;;  %v2217_v18 = vld [vmem:[%s3799_s13 + $0xee0] sm:$0xff]  ;;  %v1041_v7 = vadd.f32 %v4392_v26, %v1012_v37 }
 0x162   : > { %v4417_v56 = vpop.f32.mrf.mxu1  ;;  %2367 = vmatpush.msra.mxu3 %v1929_v10  ;;  %2425 = vmatpush.msrb.mxu1 %v1993_v35  ;;  %v1921_v40 = vld [vmem:[%s3799_s13 + $0x5a0] sm:$0xff] }
 0x163   : > { %2353 = vmatmul.f32.vlgmr.msra.gmra.mxu2 %v4422_v49  ;;  %2411 = vmatmul.f32.vlgmr.msrb.gmra.mxu0 %v4427_v54  ;;  %v1985_v51 = vld [vmem:[%s3799_s13 + $0x7a0] sm:$0xff]  ;;  %v1070_v41 = vadd.f32 %v1069_v48, %v1041_v7 }
 0x164   : > { %2468 = vmatpush.msrb.mxu2 %v1997_v25  ;;  %2526 = vmatpush.msra.mxu0 %v2061_v27  ;;  %v2149_v60 = vld [vmem:[%s3799_s13 + $0xcc0] sm:$0xff]  ;;  %v4490_v25 = vsel %vm1397_vm3, %v1408_v14, %v1409_v55  ;;  %v1983_v27 = vld [vmem:[%s3799_s13 + $0x790] sm:$0xff] }
 0x165   : > { %2368 = vmatpush.msra.mxu3 %v1927_v29  ;;  %2426 = vmatpush.msrb.mxu1 %v1991_v32  ;;  %v2213_v10 = vld [vmem:[%s3799_s13 + $0xec0] sm:$0xff]  ;;  %v2147_v29 = vld [vmem:[%s3799_s13 + $0xcb0] sm:$0xff] }
 0x166   : > { %2569 = vmatpush.msra.mxu2 %v2155_v33  ;;  %2627 = vmatpush.msrb.mxu0 %v2219_v1  ;;  %v1383_v26 = vld [vmem:[#allocation3 + $0x8] sm:$0x7]  ;;  %v2211_v32 = vld [vmem:[%s3799_s13 + $0xeb0] sm:$0xff]  ;;  %v1015_v1 = vadd.f32 %v4412_v3, %v4373_v63 }
 0x167   : > { %2369 = vmatpush.msra.mxu3 %v1925_v34  ;;  %2427 = vmatpush.msrb.mxu1 %v1989_v43  ;;  %v1917_v33 = vld [vmem:[%s3799_s13 + $0x580] sm:$0xff]  ;;  %v1414_v38 = vrot.slane %v1383_v26, 3  ;;  %v2207_v3 = vld [vmem:[%s3799_s13 + $0xe90] sm:$0xff] }
 0x168   : > { %v1121_v12 = vpop.f32.mrf.mxu0  ;;  %2570 = vmatpush.msra.mxu2 %v2153_v23  ;;  %2628 = vmatpush.msrb.mxu0 %v2217_v18  ;;  %v2145_v31 = vld [vmem:[%s3799_s13 + $0xca0] sm:$0xff]  ;;  %v1979_v23 = vld [vmem:[%s3799_s13 + $0x770] sm:$0xff]  ;;  %v1044_v48 = vadd.f32 %v4417_v56, %v1015_v1  ;;  %v1555_v56 = vld [vmem:[#allocation3 + $0x50] sm:$0xc0] }
 0x169   : > { %v1122_v61 = vadd.f32 %v1121_v12, %v1093_v39  ;;  %2370 = vmatpush.msra.mxu3 %v1923_v13  ;;  %2428 = vmatpush.msrb.mxu1 %v1987_v30  ;;  %v4495_v39 = vsel %vm1214_vm0, %v1468_v59, %v1469_v62  ;;  %v2209_v58 = vld [vmem:[%s3799_s13 + $0xea0] sm:$0xff]  ;;  %v2143_v18 = vld [vmem:[%s3799_s13 + $0xc90] sm:$0xff]  ;;  %v1099_v13 = vadd.f32 %v1098_v24, %v1070_v41  ;;  %v1101_v24 = vpop.f32.mrf.mxu3 }
 0x16a   : > { %v1150_v57 = vpop.f32.mrf.mxu1  ;;  %2571 = vmatpush.msra.mxu2 %v2151_v20  ;;  %2629 = vmatpush.msrb.mxu0 %v2215_v2  ;;  %v1913_v37 = vld [vmem:[%s3799_s13 + $0x560] sm:$0xff]  ;;  %v4518_v20 = vld [vmem:[#allocation3 + $0x50] sm:$0xe0] }
 0x16b   : > { %v1151_v36 = vadd.f32 %v1150_v57, %v1122_v61  ;;  %2356 = vmatmul.f32.gmra.mxu2 %v4454_v17  ;;  %2414 = vmatmul.f32.gmra.mxu0 %v4459_v50  ;;  %v1444_v61 = vld [vmem:[#allocation3 + $0x8] sm:$0xf] }
 0x16c   : > { %2371 = vmatpush.msra.mxu3 %v1921_v40  ;;  %2429 = vmatpush.msrb.mxu1 %v1985_v51  ;;  %v1981_v57 = vld [vmem:[%s3799_s13 + $0x780] sm:$0xff]  ;;  %v1474_v43 = vrot.slane %v1444_v61, 4 }
 0x16d   : > { %v1169_v28 = vmul.f32 %v4447_v22, %v1151_v36  ;;  %2572 = vmatpush.msra.mxu2 %v2149_v60  ;;  %2630 = vmatpush.msrb.mxu0 %v2213_v10  ;;  %v1915_v36 = vld [vmem:[%s3799_s13 + $0x570] sm:$0xff]  ;;  %v1977_v2 = vld [vmem:[%s3799_s13 + $0x760] sm:$0xff] }
 0x16e   : > { %2372 = vmatpush.msra.mxu3 %v1919_v15  ;;  %2430 = vmatpush.msrb.mxu1 %v1983_v27  ;;  %v2141_v40 = vld [vmem:[%s3799_s13 + $0xc80] sm:$0xff]  ;;  %v4531_v51 = vsel %vm1214_vm0, %v1469_v62, %v1474_v43  ;;  %v1975_v10 = vld [vmem:[%s3799_s13 + $0x750] sm:$0xff]  ;;  %v1520_v27 = vrot.slane %v4273_v5, 5 }
 0x16f   : > { %v1183_v4 = vadd.f32 %v4464_v42, %v1169_v28  ;;  %2573 = vmatpush.msra.mxu2 %v2147_v29  ;;  %2631 = vmatpush.msrb.mxu0 %v2211_v32  ;;  %v1072_v28 = vpop.f32.mrf.mxu2  ;;  %v2205_v60 = vld [vmem:[%s3799_s13 + $0xe80] sm:$0xff]  ;;  %v2139_v15 = vld [vmem:[%s3799_s13 + $0xc70] sm:$0xff] }
 0x170   : > { %v1124_v6 = vpop.f32.mrf.mxu0  ;;  %2373 = vmatpush.msra.mxu3 %v1917_v33  ;;  %2431 = vmatpush.msrb.mxu1 %v1981_v57  ;;  %v1073_v7 = vadd.f32 %v1072_v28, %v1044_v48  ;;  %v2203_v62 = vld [vmem:[%s3799_s13 + $0xe70] sm:$0xff]  ;;  %v1909_v29 = vld [vmem:[%s3799_s13 + $0x540] sm:$0xff] }
 0x171   : > { %v1191_v11 = vmax.f32 %v1183_v4, 0.0  ;;  %v1125_v9 = vadd.f32 %v1124_v6, %v1096_v16  ;;  %2574 = vmatpush.msra.mxu2 %v2145_v31  ;;  %2632 = vmatpush.msrb.mxu0 %v2209_v58  ;;  %v4526_v4 = vsel %vm1397_vm3, %v1409_v55, %v1414_v38  ;;  %v1911_v6 = vld [vmem:[%s3799_s13 + $0x550] sm:$0xff]  ;;  %v1519_v55 = vrot.slane %v4518_v20, 5  ;;  %v1973_v33 = vld [vmem:[%s3799_s13 + $0x740] sm:$0xff] }
 0x172   : > { %v1153_v35 = vpop.f32.mrf.mxu1  ;;  %2374 = vmatpush.msra.mxu3 %v1915_v36  ;;  %2432 = vmatpush.msrb.mxu1 %v1979_v23  ;;  %v2137_v57 = vld [vmem:[%s3799_s13 + $0xc60] sm:$0xff]  ;;  %v1102_v58 = vadd.f32 %v1101_v24, %v1073_v7  ;;  %v1907_v43 = vld [vmem:[%s3799_s13 + $0x530] sm:$0xff] }
 0x173   : > { %v4499_v12 = vrot.slane %v1191_v11, 4  ;;  %v1154_v46 = vadd.f32 %v1153_v35, %v1125_v9  ;;  %2359 = vmatmul.f32.gmra.mxu2 %v4490_v25  ;;  %2417 = vmatmul.f32.gmra.mxu0 %v4495_v39  ;;  %v2201_v38 = vld [vmem:[%s3799_s13 + $0xe60] sm:$0xff]  ;;  %v1971_v28 = vld [vmem:[%s3799_s13 + $0x730] sm:$0xff]  ;;  %v4570_v48 = vsel %vm1518_vm4, %v1519_v55, %v1520_v27 }
 0x174   : > { %2575 = vmatpush.msra.mxu2 %v2143_v18  ;;  %2633 = vmatpush.msrb.mxu0 %v2207_v3  ;;  %v2197_v7 = vld [vmem:[%s3799_s13 + $0xe40] sm:$0xff]  ;;  %v1903_v55 = vld [vmem:[%s3799_s13 + $0x510] sm:$0xff] }
 0x175   : > { %1240 = vst [vmem:[#allocation3] sm:$0xf0] %v4499_v12  ;;  %v1171_v34 = vmul.f32 %v4447_v22, %v1154_v46  ;;  %2375 = vmatpush.msra.mxu3 %v1913_v37  ;;  %2433 = vmatpush.msrb.mxu1 %v1977_v2  ;;  %v1498_v37 = vld [vmem:[#allocation3 + $0x40] sm:$0x1f]  ;;  %v2199_v2 = vld [vmem:[%s3799_s13 + $0xe50] sm:$0xff] }
 0x176   : > { %2576 = vmatpush.msra.mxu2 %v2141_v40  ;;  %2634 = vmatpush.msrb.mxu0 %v2205_v60  ;;  %v1905_v40 = vld [vmem:[%s3799_s13 + $0x520] sm:$0xff]  ;;  %v1967_v24 = vld [vmem:[%s3799_s13 + $0x710] sm:$0xff] }
 0x177   : > { %v1185_v63 = vadd.f32 %v4464_v42, %v1171_v34  ;;  %2376 = vmatpush.msra.mxu3 %v1911_v6  ;;  %v1580_v34 = vrot.slane %v1555_v56, 6  ;;  %2434 = vmatpush.msrb.mxu1 %v1975_v10  ;;  %v1969_v60 = vld [vmem:[%s3799_s13 + $0x720] sm:$0xff] }
 0x178   : > { %v1127_v30 = vpop.f32.mrf.mxu0  ;;  %2577 = vmatpush.msra.mxu2 %v2139_v15  ;;  %2635 = vmatpush.msrb.mxu0 %v2203_v62  ;;  %v2133_v6 = vld [vmem:[%s3799_s13 + $0xc40] sm:$0xff] }
 0x179   : > { %v1193_v14 = vmax.f32 %v1185_v63, 0.0  ;;  %v1128_v59 = vadd.f32 %v1127_v30, %v1099_v13  ;;  %2377 = vmatpush.msra.mxu3 %v1909_v29  ;;  %2435 = vmatpush.msrb.mxu1 %v1973_v33  ;;  %v2135_v30 = vld [vmem:[%s3799_s13 + $0xc50] sm:$0xff]  ;;  %v1901_v33 = vld [vmem:[%s3799_s13 + $0x500] sm:$0xff] }
 0x17a   : > { %v1156_v16 = vpop.f32.mrf.mxu1  ;;  %2578 = vmatpush.msra.mxu2 %v2137_v57  ;;  %2636 = vmatpush.msrb.mxu0 %v2201_v38  ;;  %v2193_v38 = vld [vmem:[%s3799_s13 + $0xe20] sm:$0xff] }
 0x17b   : > { %v1219_v11 = vrot.slane %v1193_v14, 4  ;;  %v1157_v9 = vadd.f32 %v1156_v16, %v1128_v59  ;;  %2362 = vmatmul.f32.gmra.mxu2 %v4526_v4  ;;  %2420 = vmatmul.f32.gmra.mxu0 %v4531_v51  ;;  %v1559_v59 = vld [vmem:[#allocation3 + $0x40] sm:$0x3f] }
 0x17c   : > { %v1252_v35 = vld [vmem:[#allocation3] sm:$0xfe]  ;;  %2378 = vmatpush.msra.mxu3 %v1907_v43  ;;  %2436 = vmatpush.msrb.mxu1 %v1971_v28  ;;  %v1586_v29 = vrot.slane %v1559_v59, 6  ;;  %v2059_v43 = vld [vmem:[%s3799_s13 + $0x9f0] sm:$0xff]  ;;  %v1591_v28 = vrot.slane %v4346_v47, 6 }
 0x17d   : > { %v1313_v26 = vld [vmem:[#allocation3] sm:$0xfc]  ;;  %v4545_v41 = vsel %vm1214_vm0, %v4499_v12, %v1219_v11  ;;  %1244 = vst [vmem:[#allocation3 + $0x20] sm:$0xf] %v1219_v11  ;;  %v1173_v46 = vmul.f32 %v4447_v22, %v1157_v9  ;;  %v1279_v61 = vrot.slane %v1252_v35, 1  ;;  %v1581_v12 = vrot.slane %v4273_v5, 6  ;;  %2579 = vmatpush.msra.mxu2 %v2135_v30  ;;  %2637 = vmatpush.msrb.mxu0 %v2199_v2 }
 0x17e   : > { %v1340_v32 = vrot.slane %v1313_v26, 2  ;;  %1242 = vst [vmem:[#allocation3 + $0x18] sm:$0xff] %v4545_v41  ;;  %v1280_v31 = vrot.slane %v4545_v41, 1  ;;  %v1341_v1 = vrot.slane %v4545_v41, 2  ;;  %2379 = vmatpush.msra.mxu3 %v1905_v40  ;;  %v2131_v35 = vld [vmem:[%s3799_s13 + $0xc30] sm:$0xff]  ;;  %v1525_v26 = vrot.slane %v1498_v37, 5  ;;  %2437 = vmatpush.msrb.mxu1 %v1969_v60 }
 0x17f   : > { %v1187_v36 = vadd.f32 %v4464_v42, %v1173_v46  ;;  %v4575_v14 = vsel %vm1579_vm5, %v1580_v34, %v1581_v12  ;;  %2580 = vmatpush.msra.mxu2 %v2133_v6  ;;  %2638 = vmatpush.msrb.mxu0 %v2197_v7  ;;  %v2127_v5 = vld [vmem:[%s3799_s13 + $0xc10] sm:$0xff]  ;;  %v2057_v30 = vld [vmem:[%s3799_s13 + $0x9e0] sm:$0xff] }
 0x180   : > { %v1130_v23 = vpop.f32.mrf.mxu0  ;;  %v4558_v18 = vsel %vm1275_vm1, %v1279_v61, %v1280_v31  ;;  %v4561_v13 = vsel %vm1336_vm2, %v1340_v32, %v1341_v1  ;;  %2380 = vmatpush.msra.mxu3 %v1903_v55  ;;  %v2195_v32 = vld [vmem:[%s3799_s13 + $0xe30] sm:$0xff]  ;;  %2438 = vmatpush.msrb.mxu1 %v1967_v24  ;;  %v4604_v34 = vsel %vm1518_vm4, %v1520_v27, %v1525_v26  ;;  %v2121_v40 = vld [vmem:[%s3799_s13 + $0xbe0] sm:$0xff]  ;;  %v1804_v24 = vld [vmem:[%s3799_s13 + $0x1f8] sm:$0xff] }
 0x181   : > { %v1195_v63 = vmax.f32 %v1187_v36, 0.0  ;;  %v1131_v3 = vadd.f32 %v1130_v23, %v1102_v58  ;;  %2266 = vmatmul.f32.vlgmr.msrb.gmra.mxu3 %v4558_v18  ;;  %2324 = vmatmul.f32.vlgmr.msra.gmra.mxu1 %v4561_v13  ;;  %v4609_v58 = vsel %vm1579_vm5, %v1581_v12, %v1586_v29  ;;  %v1561_v36 = vld [vmem:[#allocation3 + $0x48] sm:$0xc0]  ;;  %v2123_v27 = vld [vmem:[%s3799_s13 + $0xbf0] sm:$0xff]  ;;  %v1565_v29 = vld [vmem:[#allocation3 + $0x8] sm:$0x3f] }
 0x182   : > { %v1159_v20 = vpop.f32.mrf.mxu1  ;;  %2581 = vmatpush.msra.mxu2 %v2131_v35  ;;  %2639 = vmatpush.msrb.mxu0 %v2195_v32  ;;  %v2053_v32 = vld [vmem:[%s3799_s13 + $0x9c0] sm:$0xff] }
 0x183   : > { %v1222_v16 = vrot.slane %v1195_v63, 4  ;;  %v1160_v56 = vadd.f32 %v1159_v20, %v1131_v3  ;;  %2469 = vmatmul.f32.vlgmr.msrb.gmra.mxu2 %v4570_v48  ;;  %2527 = vmatmul.f32.vlgmr.msra.gmra.mxu0 %v4575_v14  ;;  %v1530_v63 = vrot.slane %v4346_v47, 5  ;;  %v2191_v3 = vld [vmem:[%s3799_s13 + $0xe10] sm:$0xff] }
 0x184   : > { %v1256_v11 = vld [vmem:[#allocation3 + $0x20] sm:$0x1]  ;;  %2381 = vmatpush.msra.mxu3 %v1901_v33  ;;  %2640 = vmatpush.msrb.mxu0 %v2193_v38  ;;  %v2117_v33 = vld [vmem:[%s3799_s13 + $0xbc0] sm:$0xff] }
 0x185   : > { %v1317_v9 = vld [vmem:[#allocation3 + $0x20] sm:$0x3]  ;;  %1246 = vst [vmem:[#allocation3 + $0x38] sm:$0xf0] %v1222_v16  ;;  %v1175_v10 = vmul.f32 %v4447_v22, %v1160_v56  ;;  %v1284_v15 = vrot.slane %v1256_v11, 1  ;;  %v2125_v56 = vld [vmem:[%s3799_s13 + $0xc00] sm:$0xff] }
 0x186   : > { %v1345_v62 = vrot.slane %v1317_v9, 2  ;;  %2482 = vmatpush.msrb.mxu3 %v2059_v43  ;;  %2641 = vmatpush.msrb.mxu0 %v2191_v3  ;;  %v2189_v11 = vld [vmem:[%s3799_s13 + $0xe00] sm:$0xff]  ;;  %v2055_v9 = vld [vmem:[%s3799_s13 + $0x9d0] sm:$0xff]  ;;  %v1596_v3 = vrot.slane %v1565_v29, 6  ;;  %v1860_v29 = vld [vmem:[%s3799_s13 + $0x3b8] sm:$0xff] }
 0x187   : > { %v1189_v46 = vadd.f32 %v4464_v42, %v1175_v10  ;;  %v4590_v61 = vsel %vm1275_vm1, %v1280_v31, %v1284_v15  ;;  %v1500_v42 = vld [vmem:[#allocation3 + $0x48] sm:$0xe0]  ;;  %v1504_v15 = vld [vmem:[#allocation3 + $0x8] sm:$0x1f] }
 0x188   : > { %v4593_v22 = vsel %vm1336_vm2, %v1341_v1, %v1345_v62  ;;  %v1965_v31 = vld [vmem:[%s3799_s13 + $0x700] sm:$0xff]  ;;  %v1529_v7 = vrot.slane %v1500_v42, 5  ;;  %2483 = vmatpush.msrb.mxu3 %v2057_v30  ;;  %v2119_v62 = vld [vmem:[%s3799_s13 + $0xbd0] sm:$0xff]  ;;  %2642 = vmatpush.msrb.mxu0 %v2189_v11  ;;  %v1866_v42 = vld [vmem:[%s3799_s13 + $0x3e8] sm:$0xff] }
 0x189   : > { %v1197_v57 = vmax.f32 %v1189_v46, 0.0  ;;  %2269 = vmatmul.f32.gmra.mxu3 %v4590_v61  ;;  %2327 = vmatmul.f32.gmra.mxu1 %v4593_v22  ;;  %v2129_v1 = vld [vmem:[%s3799_s13 + $0xc20] sm:$0xff]  ;;  %v1868_v46 = vld [vmem:[%s3799_s13 + $0x3f8] sm:$0xff]  ;;  %v2047_v11 = vld [vmem:[%s3799_s13 + $0x990] sm:$0xff] }
 0x18a   : > { %2439 = vmatpush.msrb.mxu1 %v1965_v31  ;;  %2582 = vmatpush.msra.mxu2 %v2129_v1  ;;  %v4644_v35 = vsel %vm1518_vm4, %v1529_v7, %v1530_v63  ;;  %v1864_v30 = vld [vmem:[%s3799_s13 + $0x3d8] sm:$0xff]  ;;  %v4681_v7 = vsel %vm1579_vm5, %v1591_v28, %v1596_v3 }
 0x18b   : > { %v1225_v23 = vrot.slane %v1197_v57, 4  ;;  %2472 = vmatmul.f32.gmra.mxu2 %v4604_v34  ;;  %2530 = vmatmul.f32.gmra.mxu0 %v4609_v58  ;;  %v1802_v57 = vld [vmem:[%s3799_s13 + $0x1e8] sm:$0xff]  ;;  %5332 = vst [vmem:[#allocation21_spill] sm:$0xff] %v4681_v7 }
 0x18c   : > { %v1258_v12 = vld [vmem:[#allocation3 + $0x38] sm:$0xfe]  ;;  %2540 = vmatpush.msra.mxu1 %v2123_v27  ;;  %2583 = vmatpush.msra.mxu2 %v2127_v5  ;;  %v1800_v27 = vld [vmem:[%s3799_s13 + $0x1d8] sm:$0xff]  ;;  %v1535_v5 = vrot.slane %v1504_v15, 5 }
 0x18d   : > { %v1319_v37 = vld [vmem:[#allocation3 + $0x38] sm:$0xfc]  ;;  %v4622_v20 = vsel %vm1214_vm0, %v1222_v16, %v1225_v23  ;;  %1250 = vst [vmem:[#allocation3 + $0x58] sm:$0xf] %v1225_v23  ;;  %v1289_v59 = vrot.slane %v1258_v12, 1  ;;  %v1590_v16 = vrot.slane %v1561_v36, 6  ;;  %2484 = vmatpush.msrb.mxu3 %v2055_v9  ;;  %2743 = vmatpush.msra.mxu0 %v1868_v46 }
 0x18e   : > { %v1350_v2 = vrot.slane %v1319_v37, 2  ;;  %1248 = vst [vmem:[#allocation3 + $0x10] sm:$0xff] %v4622_v20  ;;  %v1290_v60 = vrot.slane %v4622_v20, 1  ;;  %v1351_v6 = vrot.slane %v4622_v20, 2  ;;  %2541 = vmatpush.msra.mxu1 %v2121_v40  ;;  %2584 = vmatpush.msra.mxu2 %v2125_v56  ;;  %v2051_v36 = vld [vmem:[%s3799_s13 + $0x9b0] sm:$0xff]  ;;  %v2113_v56 = vld [vmem:[%s3799_s13 + $0xba0] sm:$0xff] }
 0x18f   : > { %v4649_v26 = vsel %vm1579_vm5, %v1590_v16, %v1591_v28  ;;  %2485 = vmatpush.msrb.mxu3 %v2053_v32  ;;  %v2115_v23 = vld [vmem:[%s3799_s13 + $0xbb0] sm:$0xff]  ;;  %2744 = vmatpush.msra.mxu0 %v1866_v42  ;;  %v1435_v40 = vld [vmem:[#allocation3] sm:$0xf0]  ;;  %v1862_v16 = vld [vmem:[%s3799_s13 + $0x3c8] sm:$0xff]  ;;  %v1402_v28 = vrot.slane %v4545_v41, 3 }
 0x190   : > { %v4632_v55 = vsel %vm1275_vm1, %v1289_v59, %v1290_v60  ;;  %v4635_v10 = vsel %vm1336_vm2, %v1350_v2, %v1351_v6  ;;  %2542 = vmatpush.msra.mxu1 %v2119_v62  ;;  %2685 = vmatpush.msrb.mxu2 %v1804_v24  ;;  %v2049_v59 = vld [vmem:[%s3799_s13 + $0x9a0] sm:$0xff]  ;;  %v1374_v2 = vld [vmem:[#allocation3] sm:$0xf8]  ;;  %v1461_v62 = vrot.slane %v1435_v40, 4  ;;  %v1462_v24 = vrot.slane %v4545_v41, 4  ;;  %v1858_v41 = vld [vmem:[%s3799_s13 + $0x3a8] sm:$0xff] }
 0x191   : > { %2272 = vmatmul.f32.gmra.mxu3 %v4632_v55  ;;  %2330 = vmatmul.f32.gmra.mxu1 %v4635_v10  ;;  %v4687_v9 = vld [vmem:[#allocation3 + $0x28] sm:$0xff]  ;;  %v1796_v15 = vld [vmem:[%s3799_s13 + $0x1b8] sm:$0xff]  ;;  %v1401_v47 = vrot.slane %v1374_v2, 3  ;;  %v1616_v32 = vld [vmem:[#allocation3 + $0x50] sm:$0x80] }
 0x192   : > { %2543 = vmatpush.msra.mxu1 %v2117_v33  ;;  %2686 = vmatpush.msrb.mxu2 %v1802_v57  ;;  %v2045_v46 = vld [vmem:[%s3799_s13 + $0x980] sm:$0xff]  ;;  %v1794_v57 = vld [vmem:[%s3799_s13 + $0x1a8] sm:$0xff]  ;;  %v1642_v42 = vrot.slane %v4687_v9, 7  ;;  %v1620_v40 = vld [vmem:[#allocation3 + $0x40] sm:$0x7f] }
 0x193   : > { %2475 = vmatmul.f32.gmra.mxu2 %v4644_v35  ;;  %2533 = vmatmul.f32.gmra.mxu0 %v4649_v26  ;;  %v2109_v33 = vld [vmem:[%s3799_s13 + $0xb80] sm:$0xff]  ;;  %v3354_v2 = vld [vmem:[#allocation2 + $0x4] sm:$0xff] }
 0x194   : > { %v1262_v31 = vld [vmem:[#allocation3 + $0x58] sm:$0x1]  ;;  %2486 = vmatpush.msrb.mxu3 %v2051_v36  ;;  %2544 = vmatpush.msra.mxu1 %v2115_v23  ;;  %v4704_v36 = vsel %vm1214_vm0, %v1461_v62, %v1462_v24  ;;  %v1439_v23 = vld [vmem:[#allocation3 + $0x20] sm:$0xf]  ;;  %v1854_v9 = vld [vmem:[%s3799_s13 + $0x388] sm:$0xff]  ;;  %v1647_v62 = vrot.slane %v1620_v40, 7 }
 0x195   : > { %v1323_v1 = vld [vmem:[#allocation3 + $0x58] sm:$0x3]  ;;  %v1294_v38 = vrot.slane %v1262_v31, 1  ;;  %2687 = vmatpush.msrb.mxu2 %v1800_v27  ;;  %2745 = vmatpush.msra.mxu0 %v1864_v30  ;;  %v1856_v30 = vld [vmem:[%s3799_s13 + $0x398] sm:$0xff]  ;;  %v1472_v40 = vrot.slane %v4622_v20, 4 }
 0x196   : > { %v1355_v43 = vrot.slane %v1323_v1, 2  ;;  %2487 = vmatpush.msrb.mxu3 %v2049_v59  ;;  %2545 = vmatpush.msra.mxu1 %v2113_v56  ;;  %v2043_v31 = vld [vmem:[%s3799_s13 + $0x970] sm:$0xff]  ;;  %v4701_v1 = vsel %vm1397_vm3, %v1401_v47, %v1402_v28  ;;  %v2041_v59 = vld [vmem:[%s3799_s13 + $0x960] sm:$0xff]  ;;  %v1788_v47 = vld [vmem:[%s3799_s13 + $0x178] sm:$0xff] }
 0x197   : > { %v4662_v12 = vsel %vm1275_vm1, %v1290_v60, %v1294_v38  ;;  %v1798_v60 = vld [vmem:[%s3799_s13 + $0x1c8] sm:$0xff]  ;;  %2746 = vmatpush.msra.mxu0 %v1862_v16  ;;  %v1641_v38 = vrot.slane %v1616_v32, 7  ;;  %v2107_v27 = vld [vmem:[%s3799_s13 + $0xb70] sm:$0xff]  ;;  %v2105_v56 = vld [vmem:[%s3799_s13 + $0xb60] sm:$0xff] }
 0x198   : > { %v4665_v37 = vsel %vm1336_vm2, %v1351_v6, %v1355_v43  ;;  %v4676_v6 = vsel %vm1518_vm4, %v1530_v63, %v1535_v5  ;;  %v2111_v63 = vld [vmem:[%s3799_s13 + $0xb90] sm:$0xff]  ;;  %2688 = vmatpush.msrb.mxu2 %v1798_v60  ;;  %2488 = vmatpush.msrb.mxu3 %v2047_v11  ;;  %v1378_v43 = vld [vmem:[#allocation3 + $0x20] sm:$0x7]  ;;  %v1790_v60 = vld [vmem:[%s3799_s13 + $0x188] sm:$0xff]  ;;  %v1466_v11 = vrot.slane %v1439_v23, 4 }
 0x199   : > { %2275 = vmatmul.f32.gmra.mxu3 %v4662_v12  ;;  %2333 = vmatmul.f32.gmra.mxu1 %v4665_v37  ;;  %v1792_v5 = vld [vmem:[%s3799_s13 + $0x198] sm:$0xff]  ;;  %v4711_v3 = vsel %vm1640_vm6, %v1641_v38, %v1642_v42  ;;  %v1406_v16 = vrot.slane %v1378_v43, 3  ;;  %v1786_v38 = vld [vmem:[%s3799_s13 + $0x168] sm:$0xff]  ;;  %v4735_v43 = vsel %vm1640_vm6, %v1642_v42, %v1647_v62  ;;  %v1412_v42 = vrot.slane %v4622_v20, 3  ;;  %v2031_v20 = vld [vmem:[%s3799_s13 + $0x910] sm:$0xff] }
 0x19a   : > { %2546 = vmatpush.msra.mxu1 %v2111_v63  ;;  %2689 = vmatpush.msrb.mxu2 %v1796_v15  ;;  %v2039_v63 = vld [vmem:[%s3799_s13 + $0x950] sm:$0xff] }
 0x19b   : > { %2478 = vmatmul.f32.gmra.mxu2 %v4676_v6  ;;  %2536 = vmatmul.f32.gmra.mxu0 %v4681_v7  ;;  %v2103_v15 = vld [vmem:[%s3799_s13 + $0xb50] sm:$0xff]  ;;  %v4725_v32 = vsel %vm1397_vm3, %v1402_v28, %v1406_v16  ;;  %v1850_v28 = vld [vmem:[%s3799_s13 + $0x368] sm:$0xff]  ;;  %v1622_v16 = vld [vmem:[#allocation3 + $0x48] sm:$0x80] }
 0x19c   : > { %2747 = vmatpush.msra.mxu0 %v1860_v29  ;;  %2489 = vmatpush.msrb.mxu3 %v2045_v46  ;;  %v1852_v29 = vld [vmem:[%s3799_s13 + $0x378] sm:$0xff]  ;;  %v2037_v46 = vld [vmem:[%s3799_s13 + $0x940] sm:$0xff]  ;;  %v2163_v7 = vld [vmem:[%s3799_s13 + $0xd30] sm:$0xff] }
 0x19d   : > { %2547 = vmatpush.msra.mxu1 %v2109_v33  ;;  %2690 = vmatpush.msrb.mxu2 %v1794_v57  ;;  %v4728_v33 = vsel %vm1214_vm0, %v1462_v24, %v1466_v11  ;;  %v1380_v57 = vld [vmem:[#allocation3 + $0x38] sm:$0xf8]  ;;  %v2097_v11 = vld [vmem:[%s3799_s13 + $0xb20] sm:$0xff] }
 0x19e   : > { %2748 = vmatpush.msra.mxu0 %v1858_v41  ;;  %2490 = vmatpush.msrb.mxu3 %v2043_v31  ;;  %v1441_v41 = vld [vmem:[#allocation3 + $0x38] sm:$0xf0]  ;;  %v2101_v31 = vld [vmem:[%s3799_s13 + $0xb40] sm:$0xff] }
 0x19f   : > { %2548 = vmatpush.msra.mxu1 %v2107_v27  ;;  %2691 = vmatpush.msrb.mxu2 %v1792_v5  ;;  %v2035_v24 = vld [vmem:[%s3799_s13 + $0x930] sm:$0xff]  ;;  %v4740_v27 = vld [vmem:[#allocation3 + $0x30] sm:$0xff] }
 0x1a0   : > { %2749 = vmatpush.msra.mxu0 %v1856_v30  ;;  %2491 = vmatpush.msrb.mxu3 %v2041_v59  ;;  %v3355_v23 = vld [vmem:[#allocation2 + $0xc] sm:$0xff]  ;;  %v1411_v59 = vrot.slane %v1380_v57, 3  ;;  %v1445_v57 = vld [vmem:[#allocation3 + $0x58] sm:$0xf] }
 0x1a1   : > { %2382 = vmatmul.f32.vlgmr.msra.gmra.mxu3 %v4701_v1  ;;  %2440 = vmatmul.f32.vlgmr.msrb.gmra.mxu1 %v4704_v36  ;;  %v2099_v5 = vld [vmem:[%s3799_s13 + $0xb30] sm:$0xff]  ;;  %v1784_v30 = vld [vmem:[%s3799_s13 + $0x158] sm:$0xff] }
 0x1a2   : > { %2549 = vmatpush.msra.mxu1 %v2105_v56  ;;  %2692 = vmatpush.msrb.mxu2 %v1790_v60  ;;  %v1848_v56 = vld [vmem:[%s3799_s13 + $0x358] sm:$0xff]  ;;  %v2033_v60 = vld [vmem:[%s3799_s13 + $0x920] sm:$0xff] }
 0x1a3   : > { %2585 = vmatmul.f32.vlgmr.msra.gmra.mxu2 %v4711_v3  ;;  %2643 = vmatmul.f32.vlgmr.msrb.gmra.mxu0 %v3354_v2  ;;  %v1471_v2 = vrot.slane %v1441_v41, 4  ;;  %v2095_v41 = vld [vmem:[%s3799_s13 + $0xb10] sm:$0xff] }
 0x1a4   : > { %2750 = vmatpush.msra.mxu0 %v1854_v9  ;;  %2492 = vmatpush.msrb.mxu3 %v2039_v63  ;;  %v1782_v9 = vld [vmem:[%s3799_s13 + $0x148] sm:$0xff]  ;;  %v1652_v63 = vrot.slane %v4740_v27, 7  ;;  %v1626_v27 = vld [vmem:[#allocation3 + $0x8] sm:$0x7f] }
 0x1a5   : > { %2550 = vmatpush.msra.mxu1 %v2103_v15  ;;  %2693 = vmatpush.msrb.mxu2 %v1788_v47  ;;  %v1846_v15 = vld [vmem:[%s3799_s13 + $0x348] sm:$0xff]  ;;  %v4754_v47 = vsel %vm1397_vm3, %v1411_v59, %v1412_v42  ;;  %v4757_v62 = vsel %vm1214_vm0, %v1471_v2, %v1472_v40  ;;  %v1476_v2 = vrot.slane %v1445_v57, 4  ;;  %v4785_v57 = vld [vmem:[#allocation3 + $0x18] sm:$0xff] }
 0x1a6   : > { %2751 = vmatpush.msra.mxu0 %v1852_v29  ;;  %2493 = vmatpush.msrb.mxu3 %v2037_v46  ;;  %v1651_v29 = vrot.slane %v1622_v16, 7  ;;  %v1384_v46 = vld [vmem:[#allocation3 + $0x58] sm:$0x7]  ;;  %v1772_v16 = vld [vmem:[%s3799_s13 + $0xf8] sm:$0xff] }
 0x1a7   : > { %2551 = vmatpush.msra.mxu1 %v2101_v31  ;;  %2694 = vmatpush.msrb.mxu2 %v1786_v38  ;;  %v1780_v31 = vld [vmem:[%s3799_s13 + $0x138] sm:$0xff]  ;;  %v1416_v59 = vrot.slane %v1384_v46, 3  ;;  %v4781_v46 = vsel %vm1214_vm0, %v1472_v40, %v1476_v2  ;;  %v1838_v40 = vld [vmem:[%s3799_s13 + $0x308] sm:$0xff] }
 0x1a8   : > { %2752 = vmatpush.msra.mxu0 %v1850_v28  ;;  %2494 = vmatpush.msrb.mxu3 %v2035_v24  ;;  %v4764_v38 = vsel %vm1640_vm6, %v1651_v29, %v1652_v63  ;;  %v1844_v28 = vld [vmem:[%s3799_s13 + $0x338] sm:$0xff]  ;;  %v2029_v24 = vld [vmem:[%s3799_s13 + $0x900] sm:$0xff] }
 0x1a9   : > { %2385 = vmatmul.f32.gmra.mxu3 %v4725_v32  ;;  %2443 = vmatmul.f32.gmra.mxu1 %v4728_v33  ;;  %v4778_v29 = vsel %vm1397_vm3, %v1412_v42, %v1416_v59  ;;  %v1495_v42 = vld [vmem:[#allocation3] sm:$0xe0]  ;;  %v1523_v59 = vrot.slane %v4785_v57, 5 }
 0x1aa   : > { %2552 = vmatpush.msra.mxu1 %v2099_v5  ;;  %2695 = vmatpush.msrb.mxu2 %v1784_v30  ;;  %v2093_v5 = vld [vmem:[%s3799_s13 + $0xb00] sm:$0xff]  ;;  %v1778_v30 = vld [vmem:[%s3799_s13 + $0x128] sm:$0xff]  ;;  %v1996_v2 = vld [vmem:[%s3799_s13 + $0x7f8] sm:$0xff] }
 0x1ab   : > { %2588 = vmatmul.f32.gmra.mxu2 %v4735_v43  ;;  %2646 = vmatmul.f32.gmra.mxu0 %v3355_v23  ;;  %v3356_v23 = vld [vmem:[#allocation2 + $0x1c] sm:$0xff] }
 0x1ac   : > { %2753 = vmatpush.msra.mxu0 %v1848_v56  ;;  %2495 = vmatpush.msrb.mxu3 %v2033_v60  ;;  %v1842_v56 = vld [vmem:[%s3799_s13 + $0x328] sm:$0xff]  ;;  %v2187_v60 = vld [vmem:[%s3799_s13 + $0xdf0] sm:$0xff] }
 0x1ad   : > { %2553 = vmatpush.msra.mxu1 %v2097_v11  ;;  %2696 = vmatpush.msrb.mxu2 %v1782_v9  ;;  %v1776_v11 = vld [vmem:[%s3799_s13 + $0x118] sm:$0xff]  ;;  %v1657_v9 = vrot.slane %v1626_v27, 7 }
 0x1ae   : > { %2754 = vmatpush.msra.mxu0 %v1846_v15  ;;  %2496 = vmatpush.msrb.mxu3 %v2031_v20  ;;  %v1840_v15 = vld [vmem:[%s3799_s13 + $0x318] sm:$0xff]  ;;  %v2185_v20 = vld [vmem:[%s3799_s13 + $0xde0] sm:$0xff] }
 0x1af   : > { %2554 = vmatpush.msra.mxu1 %v2095_v41  ;;  %2697 = vmatpush.msrb.mxu2 %v1780_v31  ;;  %v1770_v41 = vld [vmem:[%s3799_s13 + $0xe8] sm:$0xff]  ;;  %v1556_v27 = vld [vmem:[#allocation3] sm:$0xc0] }
 0x1b0   : > { %2755 = vmatpush.msra.mxu0 %v1844_v28  ;;  %2497 = vmatpush.msrb.mxu3 %v2029_v24  ;;  %v1774_v31 = vld [vmem:[%s3799_s13 + $0x108] sm:$0xff]  ;;  %v4790_v28 = vsel %vm1640_vm6, %v1652_v63, %v1657_v9  ;;  %v2183_v24 = vld [vmem:[%s3799_s13 + $0xdd0] sm:$0xff]  ;;  %v1584_v63 = vrot.slane %v4785_v57, 6  ;;  %v1583_v9 = vrot.slane %v1556_v27, 6 }
 0x1b1   : > { %2388 = vmatmul.f32.gmra.mxu3 %v4754_v47  ;;  %2446 = vmatmul.f32.gmra.mxu1 %v4757_v62  ;;  %5333 = vst [vmem:[#allocation22_spill] sm:$0xff] %v4790_v28 }
 0x1b2   : > { %2555 = vmatpush.msra.mxu1 %v2093_v5  ;;  %2698 = vmatpush.msrb.mxu2 %v1778_v30  ;;  %v1768_v5 = vld [vmem:[%s3799_s13 + $0xd8] sm:$0xff] }
 0x1b3   : > { %2591 = vmatmul.f32.gmra.mxu2 %v4764_v38  ;;  %2649 = vmatmul.f32.gmra.mxu0 %v3356_v23  ;;  %v3357_v23 = vld [vmem:[#allocation2 + $0x24] sm:$0xff]  ;;  %v1932_v30 = vld [vmem:[%s3799_s13 + $0x5f8] sm:$0xff] }
 0x1b4   : > { %2756 = vmatpush.msra.mxu0 %v1842_v56  ;;  %2598 = vmatpush.msra.mxu3 %v2187_v60  ;;  %v2181_v56 = vld [vmem:[%s3799_s13 + $0xdc0] sm:$0xff]  ;;  %v1766_v60 = vld [vmem:[%s3799_s13 + $0xc8] sm:$0xff] }
 0x1b5   : > { %2656 = vmatpush.msrb.mxu1 %v1772_v16  ;;  %2699 = vmatpush.msrb.mxu2 %v1776_v11  ;;  %v1930_v16 = vld [vmem:[%s3799_s13 + $0x5e8] sm:$0xff]  ;;  %v1522_v11 = vrot.slane %v1495_v42, 5  ;;  %v1499_v42 = vld [vmem:[#allocation3 + $0x20] sm:$0x1f] }
 0x1b6   : > { %2757 = vmatpush.msra.mxu0 %v1840_v15  ;;  %2599 = vmatpush.msra.mxu3 %v2185_v20  ;;  %v1994_v15 = vld [vmem:[%s3799_s13 + $0x7e8] sm:$0xff]  ;;  %v2179_v20 = vld [vmem:[%s3799_s13 + $0xdb0] sm:$0xff] }
 0x1b7   : > { %2657 = vmatpush.msrb.mxu1 %v1770_v41  ;;  %2700 = vmatpush.msrb.mxu2 %v1774_v31  ;;  %v4806_v41 = vsel %vm1518_vm4, %v1522_v11, %v1523_v59  ;;  %v4809_v31 = vsel %vm1579_vm5, %v1583_v9, %v1584_v63  ;;  %v1990_v11 = vld [vmem:[%s3799_s13 + $0x7c8] sm:$0xff]  ;;  %v2175_v9 = vld [vmem:[%s3799_s13 + $0xd90] sm:$0xff] }
 0x1b8   : > { %2758 = vmatpush.msra.mxu0 %v1838_v40  ;;  %2600 = vmatpush.msra.mxu3 %v2183_v24  ;;  %v1560_v40 = vld [vmem:[#allocation3 + $0x20] sm:$0x3f] }
 0x1b9   : > { %2391 = vmatmul.f32.gmra.mxu3 %v4778_v29  ;;  %2449 = vmatmul.f32.gmra.mxu1 %v4781_v46  ;;  %v1764_v24 = vld [vmem:[%s3799_s13 + $0xb8] sm:$0xff] }
 0x1ba   : > { %2658 = vmatpush.msrb.mxu1 %v1768_v5  ;;  %2801 = vmatpush.msra.mxu2 %v1932_v30  ;;  %v1992_v5 = vld [vmem:[%s3799_s13 + $0x7d8] sm:$0xff]  ;;  %v2177_v30 = vld [vmem:[%s3799_s13 + $0xda0] sm:$0xff] }
 0x1bb   : > { %2594 = vmatmul.f32.gmra.mxu2 %v4790_v28  ;;  %2652 = vmatmul.f32.gmra.mxu0 %v3357_v23  ;;  %v1928_v23 = vld [vmem:[%s3799_s13 + $0x5d8] sm:$0xff] }
 0x1bc   : > { %2859 = vmatpush.msrb.mxu0 %v1996_v2  ;;  %2601 = vmatpush.msra.mxu3 %v2181_v56  ;;  %v1762_v2 = vld [vmem:[%s3799_s13 + $0xa8] sm:$0xff] }
 0x1bd   : > { %2659 = vmatpush.msrb.mxu1 %v1766_v60  ;;  %2802 = vmatpush.msra.mxu2 %v1930_v16  ;;  %v1926_v56 = vld [vmem:[%s3799_s13 + $0x5c8] sm:$0xff]  ;;  %v1527_v60 = vrot.slane %v1499_v42, 5  ;;  %v1588_v16 = vrot.slane %v1560_v40, 6 }
 0x1be   : > { %2860 = vmatpush.msrb.mxu0 %v1994_v15  ;;  %2602 = vmatpush.msra.mxu3 %v2179_v20  ;;  %v1760_v15 = vld [vmem:[%s3799_s13 + $0x98] sm:$0xff] }
 0x1bf   : > { %2660 = vmatpush.msrb.mxu1 %v1764_v24  ;;  %2803 = vmatpush.msra.mxu2 %v1928_v23  ;;  %v1924_v20 = vld [vmem:[%s3799_s13 + $0x5b8] sm:$0xff]  ;;  %v4830_v42 = vsel %vm1518_vm4, %v1523_v59, %v1527_v60  ;;  %v4833_v40 = vsel %vm1579_vm5, %v1584_v63, %v1588_v16  ;;  %v1758_v24 = vld [vmem:[%s3799_s13 + $0x88] sm:$0xff]  ;;  %v2171_v63 = vld [vmem:[%s3799_s13 + $0xd70] sm:$0xff] }
 0x1c0   : > { %2861 = vmatpush.msrb.mxu0 %v1992_v5  ;;  %2603 = vmatpush.msra.mxu3 %v2177_v30  ;;  %v1922_v23 = vld [vmem:[%s3799_s13 + $0x5a8] sm:$0xff]  ;;  %v1501_v30 = vld [vmem:[#allocation3 + $0x38] sm:$0xe0]  ;;  %v1920_v60 = vld [vmem:[%s3799_s13 + $0x598] sm:$0xff] }
 0x1c1   : > { %2498 = vmatmul.f32.vlgmr.msrb.gmra.mxu3 %v4806_v41  ;;  %2556 = vmatmul.f32.vlgmr.msra.gmra.mxu1 %v4809_v31  ;;  %v4839_v5 = vld [vmem:[#allocation3 + $0x10] sm:$0xff] }
 0x1c2   : > { %v4815_v27 = vpop.f32.mrf.mxu2  ;;  %2661 = vmatpush.msrb.mxu1 %v1762_v2  ;;  %2804 = vmatpush.msra.mxu2 %v1926_v56  ;;  %v1986_v59 = vld [vmem:[%s3799_s13 + $0x7a8] sm:$0xff]  ;;  %v1562_v2 = vld [vmem:[#allocation3 + $0x38] sm:$0xc0]  ;;  %v1756_v56 = vld [vmem:[%s3799_s13 + $0x78] sm:$0xff] }
 0x1c3   : > { %2701 = vmatmul.f32.vlgmr.msrb.gmra.mxu2 %v4558_v18  ;;  %2759 = vmatmul.f32.vlgmr.msra.gmra.mxu0 %v4561_v13  ;;  %v1988_v18 = vld [vmem:[%s3799_s13 + $0x7b8] sm:$0xff]  ;;  %v2173_v13 = vld [vmem:[%s3799_s13 + $0xd80] sm:$0xff] }
 0x1c4   : > { %2862 = vmatpush.msrb.mxu0 %v1990_v11  ;;  %2604 = vmatpush.msra.mxu3 %v2175_v9  ;;  %v1533_v11 = vrot.slane %v4839_v5, 5  ;;  %v1594_v9 = vrot.slane %v4839_v5, 6 }
 0x1c5   : > { %2662 = vmatpush.msrb.mxu1 %v1760_v15  ;;  %2805 = vmatpush.msra.mxu2 %v1924_v20  ;;  %v1984_v15 = vld [vmem:[%s3799_s13 + $0x798] sm:$0xff]  ;;  %v2169_v20 = vld [vmem:[%s3799_s13 + $0xd60] sm:$0xff] }
 0x1c6   : > { %2863 = vmatpush.msrb.mxu0 %v1988_v18  ;;  %2605 = vmatpush.msra.mxu3 %v2173_v13  ;;  %v1918_v18 = vld [vmem:[%s3799_s13 + $0x588] sm:$0xff]  ;;  %v1593_v13 = vrot.slane %v1562_v2, 6  ;;  %v1916_v2 = vld [vmem:[%s3799_s13 + $0x578] sm:$0xff] }
 0x1c7   : > { %2663 = vmatpush.msrb.mxu1 %v1758_v24  ;;  %2806 = vmatpush.msra.mxu2 %v1922_v23  ;;  %v1982_v24 = vld [vmem:[%s3799_s13 + $0x788] sm:$0xff]  ;;  %v2167_v23 = vld [vmem:[%s3799_s13 + $0xd50] sm:$0xff] }
 0x1c8   : > { %2864 = vmatpush.msrb.mxu0 %v1986_v59  ;;  %2606 = vmatpush.msra.mxu3 %v2171_v63  ;;  %v4861_v59 = vsel %vm1579_vm5, %v1593_v13, %v1594_v9  ;;  %v1752_v63 = vld [vmem:[%s3799_s13 + $0x58] sm:$0xff] }
 0x1c9   : > { %2501 = vmatmul.f32.gmra.mxu3 %v4830_v42  ;;  %2559 = vmatmul.f32.gmra.mxu1 %v4833_v40 }
 0x1ca   : > { %v4847_v16 = vpop.f32.mrf.mxu2  ;;  %2664 = vmatpush.msrb.mxu1 %v1756_v56  ;;  %2807 = vmatpush.msra.mxu2 %v1920_v60  ;;  %v1566_v56 = vld [vmem:[#allocation3 + $0x58] sm:$0x3f]  ;;  %v1980_v60 = vld [vmem:[%s3799_s13 + $0x778] sm:$0xff] }
 0x1cb   : > { %2704 = vmatmul.f32.gmra.mxu2 %v4590_v61  ;;  %2762 = vmatmul.f32.gmra.mxu0 %v4593_v22  ;;  %v1754_v61 = vld [vmem:[%s3799_s13 + $0x68] sm:$0xff]  ;;  %v1532_v22 = vrot.slane %v1501_v30, 5  ;;  %v1505_v30 = vld [vmem:[#allocation3 + $0x58] sm:$0x1f]  ;;  %v1598_v13 = vrot.slane %v1566_v56, 6 }
 0x1cc   : > { %2865 = vmatpush.msrb.mxu0 %v1984_v15  ;;  %2607 = vmatpush.msra.mxu3 %v2169_v20  ;;  %v2165_v15 = vld [vmem:[%s3799_s13 + $0xd40] sm:$0xff]  ;;  %v1750_v20 = vld [vmem:[%s3799_s13 + $0x48] sm:$0xff] }
 0x1cd   : > { %v4858_v28 = vsel %vm1518_vm4, %v1532_v22, %v1533_v11  ;;  %2665 = vmatpush.msrb.mxu1 %v1754_v61  ;;  %2808 = vmatpush.msra.mxu2 %v1918_v18  ;;  %v1914_v61 = vld [vmem:[%s3799_s13 + $0x568] sm:$0xff]  ;;  %v1537_v22 = vrot.slane %v1505_v30, 5 }
 0x1ce   : > { %2866 = vmatpush.msrb.mxu0 %v1982_v24  ;;  %2608 = vmatpush.msra.mxu3 %v2167_v23  ;;  %v1978_v18 = vld [vmem:[%s3799_s13 + $0x768] sm:$0xff]  ;;  %v1748_v24 = vld [vmem:[%s3799_s13 + $0x38] sm:$0xff] }
 0x1cf   : > { %2666 = vmatpush.msrb.mxu1 %v1752_v63  ;;  %2809 = vmatpush.msra.mxu2 %v1916_v2  ;;  %v1912_v23 = vld [vmem:[%s3799_s13 + $0x558] sm:$0xff]  ;;  %v2161_v63 = vld [vmem:[%s3799_s13 + $0xd20] sm:$0xff]  ;;  %v4882_v30 = vsel %vm1518_vm4, %v1533_v11, %v1537_v22  ;;  %v4885_v2 = vsel %vm1579_vm5, %v1594_v9, %v1598_v13  ;;  %v1746_v56 = vld [vmem:[%s3799_s13 + $0x28] sm:$0xff]  ;;  %v1645_v22 = vrot.slane %v4785_v57, 7 }
 0x1d0   : > { %2867 = vmatpush.msrb.mxu0 %v1980_v60  ;;  %2609 = vmatpush.msra.mxu3 %v2165_v15  ;;  %v1910_v60 = vld [vmem:[%s3799_s13 + $0x548] sm:$0xff]  ;;  %v2159_v15 = vld [vmem:[%s3799_s13 + $0xd10] sm:$0xff]  ;;  %v1744_v11 = vld [vmem:[%s3799_s13 + $0x18] sm:$0xff] }
 0x1d1   : > { %2504 = vmatmul.f32.gmra.mxu3 %v4858_v28  ;;  %2562 = vmatmul.f32.gmra.mxu1 %v4861_v59  ;;  %v1908_v9 = vld [vmem:[%s3799_s13 + $0x538] sm:$0xff]  ;;  %v1742_v13 = vld [vmem:[%s3799_s13 + $0x8] sm:$0xff] }
 0x1d2   : > { %2667 = vmatpush.msrb.mxu1 %v1750_v20  ;;  %2810 = vmatpush.msra.mxu2 %v1914_v61  ;;  %v1617_v20 = vld [vmem:[#allocation3] sm:$0x80] }
 0x1d3   : > { %2707 = vmatmul.f32.gmra.mxu2 %v4632_v55  ;;  %2765 = vmatmul.f32.gmra.mxu0 %v4635_v10  ;;  %v1976_v10 = vld [vmem:[%s3799_s13 + $0x758] sm:$0xff] }
 0x1d4   : > { %2868 = vmatpush.msrb.mxu0 %v1978_v18  ;;  %2610 = vmatpush.msra.mxu3 %v2163_v7  ;;  %v1974_v7 = vld [vmem:[%s3799_s13 + $0x748] sm:$0xff]  ;;  %v1972_v61 = vld [vmem:[%s3799_s13 + $0x738] sm:$0xff]  ;;  %v2157_v18 = vld [vmem:[%s3799_s13 + $0xd00] sm:$0xff] }
 0x1d5   : > { %2668 = vmatpush.msrb.mxu1 %v1748_v24  ;;  %2811 = vmatpush.msra.mxu2 %v1912_v23  ;;  %v1906_v24 = vld [vmem:[%s3799_s13 + $0x528] sm:$0xff]  ;;  %v1836_v57 = vld [vmem:[%s3799_s13 + $0x2f8] sm:$0xff] }
 0x1d6   : > { %v4877_v55 = vpop.f32.mrf.mxu2  ;;  %2869 = vmatpush.msrb.mxu0 %v1976_v10  ;;  %2611 = vmatpush.msra.mxu3 %v2161_v63  ;;  %v1970_v10 = vld [vmem:[%s3799_s13 + $0x728] sm:$0xff]  ;;  %v1644_v63 = vrot.slane %v1617_v20, 7  ;;  %v1832_v20 = vld [vmem:[%s3799_s13 + $0x2d8] sm:$0xff] }
 0x1d7   : > { %2669 = vmatpush.msrb.mxu1 %v1746_v56  ;;  %2812 = vmatpush.msra.mxu2 %v1910_v60  ;;  %v1904_v56 = vld [vmem:[%s3799_s13 + $0x518] sm:$0xff] }
 0x1d8   : > { %2870 = vmatpush.msrb.mxu0 %v1974_v7  ;;  %2612 = vmatpush.msra.mxu3 %v2159_v15  ;;  %v1968_v60 = vld [vmem:[%s3799_s13 + $0x718] sm:$0xff]  ;;  %v1834_v7 = vld [vmem:[%s3799_s13 + $0x2e8] sm:$0xff] }
 0x1d9   : > { %2507 = vmatmul.f32.gmra.mxu3 %v4882_v30  ;;  %2565 = vmatmul.f32.gmra.mxu1 %v4885_v2  ;;  %v1898_v15 = vld [vmem:[%s3799_s13 + $0x4e8] sm:$0xff] }
 0x1da   : > { %2670 = vmatpush.msrb.mxu1 %v1744_v11  ;;  %2813 = vmatpush.msra.mxu2 %v1908_v9  ;;  %v1902_v11 = vld [vmem:[%s3799_s13 + $0x508] sm:$0xff] }
 0x1db   : > { %2710 = vmatmul.f32.gmra.mxu2 %v4662_v12  ;;  %2768 = vmatmul.f32.gmra.mxu0 %v4665_v37  ;;  %v4907_v12 = vsel %vm1640_vm6, %v1644_v63, %v1645_v22  ;;  %v1900_v37 = vld [vmem:[%s3799_s13 + $0x4f8] sm:$0xff]  ;;  %v1966_v9 = vld [vmem:[%s3799_s13 + $0x708] sm:$0xff] }
 0x1dc   : > { %2871 = vmatpush.msrb.mxu0 %v1972_v61  ;;  %2613 = vmatpush.msra.mxu3 %v2157_v18  ;;  %v1621_v61 = vld [vmem:[#allocation3 + $0x20] sm:$0x7f] }
 0x1dd   : > { %2671 = vmatpush.msrb.mxu1 %v1742_v13  ;;  %2814 = vmatpush.msra.mxu2 %v1906_v24  ;;  %v1896_v18 = vld [vmem:[%s3799_s13 + $0x4d8] sm:$0xff]  ;;  %v1830_v24 = vld [vmem:[%s3799_s13 + $0x2c8] sm:$0xff] }
 0x1de   : > { %v4902_v23 = vpop.f32.mrf.mxu2  ;;  %2872 = vmatpush.msrb.mxu0 %v1970_v10  ;;  %2714 = vmatpush.msrb.mxu3 %v1836_v57  ;;  %v2060_v13 = vld [vmem:[%s3799_s13 + $0x9f8] sm:$0xff]  ;;  %v1649_v10 = vrot.slane %v1621_v61, 7  ;;  %v1894_v57 = vld [vmem:[%s3799_s13 + $0x4c8] sm:$0xff] }
 0x1df   : > { %2772 = vmatpush.msra.mxu1 %v1900_v37  ;;  %2815 = vmatpush.msra.mxu2 %v1904_v56  ;;  %v2058_v37 = vld [vmem:[%s3799_s13 + $0x9e8] sm:$0xff]  ;;  %v1824_v61 = vld [vmem:[%s3799_s13 + $0x298] sm:$0xff] }
 0x1e0   : > { %2873 = vmatpush.msrb.mxu0 %v1968_v60  ;;  %2715 = vmatpush.msrb.mxu3 %v1834_v7  ;;  %v2122_v56 = vld [vmem:[%s3799_s13 + $0xbe8] sm:$0xff]  ;;  %v1828_v60 = vld [vmem:[%s3799_s13 + $0x2b8] sm:$0xff] }
 0x1e1   : > { %2614 = vmatmul.f32.vlgmr.msra.gmra.mxu3 %v4907_v12  ;;  %2672 = vmatmul.f32.vlgmr.msrb.gmra.mxu1 %v4285_v44  ;;  %v2124_v44 = vld [vmem:[%s3799_s13 + $0xbf8] sm:$0xff] }
 0x1e2   : > { %2773 = vmatpush.msra.mxu1 %v1898_v15  ;;  %2816 = vmatpush.msra.mxu2 %v1902_v11  ;;  %v2056_v7 = vld [vmem:[%s3799_s13 + $0x9d8] sm:$0xff]  ;;  %v1826_v11 = vld [vmem:[%s3799_s13 + $0x2a8] sm:$0xff] }
 0x1e3   : > { %2874 = vmatpush.msrb.mxu0 %v1966_v9  ;;  %2716 = vmatpush.msrb.mxu3 %v1832_v20  ;;  %v2120_v15 = vld [vmem:[%s3799_s13 + $0xbd8] sm:$0xff]  ;;  %v1890_v9 = vld [vmem:[%s3799_s13 + $0x4a8] sm:$0xff] }
 0x1e4   : > { %2817 = vmatmul.f32.vlgmr.msra.gmra.mxu2 %v4701_v1  ;;  %2875 = vmatmul.f32.vlgmr.msrb.gmra.mxu0 %v4704_v36  ;;  %v4932_v1 = vsel %vm1640_vm6, %v1645_v22, %v1649_v10  ;;  %v1892_v36 = vld [vmem:[%s3799_s13 + $0x4b8] sm:$0xff]  ;;  %v2054_v20 = vld [vmem:[%s3799_s13 + $0x9c8] sm:$0xff] }
 0x1e5   : > { %2774 = vmatpush.msra.mxu1 %v1896_v18  ;;  %2917 = vmatpush.msrb.mxu2 %v2060_v13  ;;  %v2118_v22 = vld [vmem:[%s3799_s13 + $0xbc8] sm:$0xff]  ;;  %v4944_v18 = vpop.f32.mrf.mxu0  ;;  %v1888_v13 = vld [vmem:[%s3799_s13 + $0x498] sm:$0xff] }
 0x1e6   : > { %v4925_v63 = vpop.f32.mrf.mxu2  ;;  %2975 = vmatpush.msra.mxu0 %v2124_v44  ;;  %2717 = vmatpush.msrb.mxu3 %v1830_v24  ;;  %v1623_v44 = vld [vmem:[#allocation3 + $0x38] sm:$0x80]  ;;  %v2116_v24 = vld [vmem:[%s3799_s13 + $0xbb8] sm:$0xff]  ;;  %v1822_v10 = vld [vmem:[%s3799_s13 + $0x288] sm:$0xff] }
 0x1e7   : > { %2775 = vmatpush.msra.mxu1 %v1894_v57  ;;  %2918 = vmatpush.msrb.mxu2 %v2058_v37  ;;  %v1655_v57 = vrot.slane %v4839_v5, 7  ;;  %v1820_v5 = vld [vmem:[%s3799_s13 + $0x278] sm:$0xff] }
 0x1e8   : > { %2976 = vmatpush.msra.mxu0 %v2122_v56  ;;  %2718 = vmatpush.msrb.mxu3 %v1828_v60  ;;  %v1886_v56 = vld [vmem:[%s3799_s13 + $0x488] sm:$0xff] }
 0x1e9   : > { %2617 = vmatmul.f32.gmra.mxu3 %v4932_v1  ;;  %2675 = vmatmul.f32.gmra.mxu1 %v4309_v0  ;;  %v2052_v0 = vld [vmem:[%s3799_s13 + $0x9b8] sm:$0xff]  ;;  %v2050_v60 = vld [vmem:[%s3799_s13 + $0x9a8] sm:$0xff] }
 0x1ea   : > { %2776 = vmatpush.msra.mxu1 %v1892_v36  ;;  %2919 = vmatpush.msrb.mxu2 %v2056_v7  ;;  %v2114_v36 = vld [vmem:[%s3799_s13 + $0xba8] sm:$0xff]  ;;  %v1654_v7 = vrot.slane %v1623_v44, 7 }
 0x1eb   : > { %2977 = vmatpush.msra.mxu0 %v2120_v15  ;;  %2719 = vmatpush.msrb.mxu3 %v1826_v11  ;;  %v2048_v15 = vld [vmem:[%s3799_s13 + $0x998] sm:$0xff] }
 0x1ec   : > { %2777 = vmatpush.msra.mxu1 %v1890_v9  ;;  %2920 = vmatpush.msrb.mxu2 %v2054_v20  ;;  %v2112_v11 = vld [vmem:[%s3799_s13 + $0xb98] sm:$0xff]  ;;  %v1818_v9 = vld [vmem:[%s3799_s13 + $0x268] sm:$0xff] }
 0x1ed   : > { %2978 = vmatpush.msra.mxu0 %v2118_v22  ;;  %2720 = vmatpush.msrb.mxu3 %v1824_v61  ;;  %v1882_v20 = vld [vmem:[%s3799_s13 + $0x468] sm:$0xff]  ;;  %v4972_v44 = vpop.f32.mrf.mxu0 }
 0x1ee   : > { %2820 = vmatmul.f32.gmra.mxu2 %v4725_v32  ;;  %2878 = vmatmul.f32.gmra.mxu0 %v4728_v33  ;;  %v4953_v37 = vpop.f32.mrf.mxu2  ;;  %v4960_v32 = vsel %vm1640_vm6, %v1654_v7, %v1655_v57  ;;  %v1884_v33 = vld [vmem:[%s3799_s13 + $0x478] sm:$0xff]  ;;  %v2046_v22 = vld [vmem:[%s3799_s13 + $0x988] sm:$0xff] }
 0x1ef   : > { %2778 = vmatpush.msra.mxu1 %v1888_v13  ;;  %2921 = vmatpush.msrb.mxu2 %v2052_v0  ;;  %v2110_v61 = vld [vmem:[%s3799_s13 + $0xb88] sm:$0xff]  ;;  %v1816_v13 = vld [vmem:[%s3799_s13 + $0x258] sm:$0xff]  ;;  %v1627_v0 = vld [vmem:[#allocation3 + $0x58] sm:$0x7f] }
 0x1f0   : > { %2979 = vmatpush.msra.mxu0 %v2116_v24  ;;  %2721 = vmatpush.msrb.mxu3 %v1822_v10  ;;  %v2044_v24 = vld [vmem:[%s3799_s13 + $0x978] sm:$0xff]  ;;  %v1878_v7 = vld [vmem:[%s3799_s13 + $0x448] sm:$0xff] }
 0x1f1   : > { %2779 = vmatpush.msra.mxu1 %v1886_v56  ;;  %2922 = vmatpush.msrb.mxu2 %v2050_v60  ;;  %v2108_v10 = vld [vmem:[%s3799_s13 + $0xb78] sm:$0xff]  ;;  %v1814_v56 = vld [vmem:[%s3799_s13 + $0x248] sm:$0xff]  ;;  %v1659_v60 = vrot.slane %v1627_v0, 7 }
 0x1f2   : > { %2980 = vmatpush.msra.mxu0 %v2114_v36  ;;  %2620 = vmatmul.f32.gmra.mxu3 %v4960_v32  ;;  %v1808_v0 = vld [vmem:[%s3799_s13 + $0x218] sm:$0xff] }
 0x1f3   : > { %2678 = vmatmul.f32.gmra.mxu1 %v4362_v52  ;;  %2722 = vmatpush.msrb.mxu3 %v1820_v5  ;;  %v1880_v52 = vld [vmem:[%s3799_s13 + $0x458] sm:$0xff]  ;;  %v2042_v5 = vld [vmem:[%s3799_s13 + $0x968] sm:$0xff] }
 0x1f4   : > { %2780 = vmatpush.msra.mxu1 %v1884_v33  ;;  %2923 = vmatpush.msrb.mxu2 %v2048_v15  ;;  %v2106_v33 = vld [vmem:[%s3799_s13 + $0xb68] sm:$0xff]  ;;  %v1812_v15 = vld [vmem:[%s3799_s13 + $0x238] sm:$0xff] }
 0x1f5   : > { %2981 = vmatpush.msra.mxu0 %v2112_v11  ;;  %2723 = vmatpush.msrb.mxu3 %v1818_v9  ;;  %v2040_v11 = vld [vmem:[%s3799_s13 + $0x958] sm:$0xff] }
 0x1f6   : > { %2781 = vmatpush.msra.mxu1 %v1882_v20  ;;  %2924 = vmatpush.msrb.mxu2 %v2046_v22  ;;  %v4980_v36 = vpop.f32.mrf.mxu2  ;;  %v2104_v20 = vld [vmem:[%s3799_s13 + $0xb58] sm:$0xff]  ;;  %v1810_v22 = vld [vmem:[%s3799_s13 + $0x228] sm:$0xff] }
 0x1f7   : > { %2982 = vmatpush.msra.mxu0 %v2110_v61  ;;  %2724 = vmatpush.msrb.mxu3 %v1816_v13  ;;  %v1874_v61 = vld [vmem:[%s3799_s13 + $0x428] sm:$0xff] }
 0x1f8   : > { %2823 = vmatmul.f32.gmra.mxu2 %v4754_v47  ;;  %2881 = vmatmul.f32.gmra.mxu0 %v4757_v62  ;;  %v4987_v47 = vsel %vm1640_vm6, %v1655_v57, %v1659_v60  ;;  %v1876_v62 = vld [vmem:[%s3799_s13 + $0x438] sm:$0xff]  ;;  %v2038_v13 = vld [vmem:[%s3799_s13 + $0x948] sm:$0xff] }
 0x1f9   : > { %2782 = vmatpush.msra.mxu1 %v1880_v52  ;;  %2925 = vmatpush.msrb.mxu2 %v2044_v24  ;;  %v2102_v57 = vld [vmem:[%s3799_s13 + $0xb48] sm:$0xff]  ;;  %v5001_v52 = vpop.f32.mrf.mxu0  ;;  %v1872_v24 = vld [vmem:[%s3799_s13 + $0x418] sm:$0xff] }
 0x1fa   : > { %2983 = vmatpush.msra.mxu0 %v2108_v10  ;;  %2725 = vmatpush.msrb.mxu3 %v1814_v56  ;;  %v2100_v10 = vld [vmem:[%s3799_s13 + $0xb38] sm:$0xff]  ;;  %v1806_v56 = vld [vmem:[%s3799_s13 + $0x208] sm:$0xff] }
 0x1fb   : > { %2783 = vmatpush.msra.mxu1 %v1878_v7  ;;  %2926 = vmatpush.msrb.mxu2 %v2042_v5  ;;  %v1870_v5 = vld [vmem:[%s3799_s13 + $0x408] sm:$0xff] }
 0x1fc   : > { %2984 = vmatpush.msra.mxu0 %v2106_v33  ;;  %2623 = vmatmul.f32.gmra.mxu3 %v4987_v47  ;;  %v2034_v33 = vld [vmem:[%s3799_s13 + $0x928] sm:$0xff] }
 0x1fd   : > { %2681 = vmatmul.f32.gmra.mxu1 %v4384_v19  ;;  %2726 = vmatpush.msrb.mxu3 %v1812_v15  ;;  %v2036_v19 = vld [vmem:[%s3799_s13 + $0x938] sm:$0xff]  ;;  %v2098_v15 = vld [vmem:[%s3799_s13 + $0xb28] sm:$0xff] }
 0x1fe   : > { %v4991_v9 = vpop.f32.mrf.mxu1  ;;  %2784 = vmatpush.msra.mxu1 %v1876_v62  ;;  %2927 = vmatpush.msrb.mxu2 %v2040_v11  ;;  %v5011_v7 = vpop.f32.mrf.mxu2  ;;  %v1964_v11 = vld [vmem:[%s3799_s13 + $0x6f8] sm:$0xff] }
 0x1ff   : > { %2985 = vmatpush.msra.mxu0 %v2104_v20  ;;  %2727 = vmatpush.msrb.mxu3 %v1810_v22  ;;  %v2096_v20 = vld [vmem:[%s3799_s13 + $0xb18] sm:$0xff]  ;;  %v1962_v22 = vld [vmem:[%s3799_s13 + $0x6e8] sm:$0xff] }
 0x200   : > { %2785 = vmatpush.msra.mxu1 %v1874_v61  ;;  %2928 = vmatpush.msrb.mxu2 %v2038_v13  ;;  %v2026_v61 = vld [vmem:[%s3799_s13 + $0x8e8] sm:$0xff] }
 0x201   : > { %2986 = vmatpush.msra.mxu0 %v2102_v57  ;;  %2728 = vmatpush.msrb.mxu3 %v1808_v0  ;;  %v2030_v13 = vld [vmem:[%s3799_s13 + $0x908] sm:$0xff]  ;;  %v1960_v0 = vld [vmem:[%s3799_s13 + $0x6d8] sm:$0xff] }
 0x202   : > { %2826 = vmatmul.f32.gmra.mxu2 %v4778_v29  ;;  %2884 = vmatmul.f32.gmra.mxu0 %v4781_v46  ;;  %v2028_v29 = vld [vmem:[%s3799_s13 + $0x8f8] sm:$0xff]  ;;  %v2094_v57 = vld [vmem:[%s3799_s13 + $0xb08] sm:$0xff] }
 0x203   : > { %2786 = vmatpush.msra.mxu1 %v1872_v24  ;;  %2929 = vmatpush.msrb.mxu2 %v2036_v19  ;;  %v2032_v46 = vld [vmem:[%s3799_s13 + $0x918] sm:$0xff]  ;;  %v5029_v24 = vpop.f32.mrf.mxu0 }
 0x204   : > { %v5007_v60 = vpop.f32.mrf.mxu3  ;;  %2987 = vmatpush.msra.mxu0 %v2100_v10  ;;  %2729 = vmatpush.msrb.mxu3 %v1806_v56  ;;  %v2188_v19 = vld [vmem:[%s3799_s13 + $0xdf8] sm:$0xff]  ;;  %v1958_v10 = vld [vmem:[%s3799_s13 + $0x6c8] sm:$0xff] }
 0x205   : > { %2787 = vmatpush.msra.mxu1 %v1870_v5  ;;  %2930 = vmatpush.msrb.mxu2 %v2034_v33  ;;  %v2022_v33 = vld [vmem:[%s3799_s13 + $0x8c8] sm:$0xff] }
 0x206   : > { %v5016_v62 = vpop.f32.mrf.mxu1  ;;  %2988 = vmatpush.msra.mxu0 %v2098_v15  ;;  %2730 = vmatmul.f32.vlgmr.msrb.gmra.mxu3 %v4288_v45  ;;  %v5040_v5 = vpop.f32.mrf.mxu2  ;;  %v2186_v15 = vld [vmem:[%s3799_s13 + $0xde8] sm:$0xff] }
 0x207   : > { %2788 = vmatmul.f32.vlgmr.msra.gmra.mxu1 %v4422_v49  ;;  %2830 = vmatpush.msra.mxu3 %v1964_v11  ;;  %v2024_v49 = vld [vmem:[%s3799_s13 + $0x8d8] sm:$0xff] }
 0x208   : > { %2888 = vmatpush.msrb.mxu1 %v2028_v29  ;;  %2931 = vmatpush.msrb.mxu2 %v2032_v46  ;;  %v1956_v11 = vld [vmem:[%s3799_s13 + $0x6b8] sm:$0xff] }
 0x209   : > { %2989 = vmatpush.msra.mxu0 %v2096_v20  ;;  %2831 = vmatpush.msra.mxu3 %v1962_v22  ;;  %v2020_v29 = vld [vmem:[%s3799_s13 + $0x8b8] sm:$0xff]  ;;  %v2182_v20 = vld [vmem:[%s3799_s13 + $0xdc8] sm:$0xff] }
 0x20a   : > { %2889 = vmatpush.msrb.mxu1 %v2026_v61  ;;  %2932 = vmatpush.msrb.mxu2 %v2030_v13  ;;  %v2184_v46 = vld [vmem:[%s3799_s13 + $0xdd8] sm:$0xff] }
 0x20b   : > { %2990 = vmatpush.msra.mxu0 %v2094_v57  ;;  %2832 = vmatpush.msra.mxu3 %v1960_v0  ;;  %v1952_v61 = vld [vmem:[%s3799_s13 + $0x698] sm:$0xff]  ;;  %v5055_v13 = vpop.f32.mrf.mxu0  ;;  %v1950_v0 = vld [vmem:[%s3799_s13 + $0x688] sm:$0xff] }
 0x20c   : > { %v5031_v45 = vpop.f32.mrf.mxu3  ;;  %2933 = vmatmul.f32.vlgmr.msrb.gmra.mxu2 %v4806_v41  ;;  %2991 = vmatmul.f32.vlgmr.msra.gmra.mxu0 %v4809_v31  ;;  %v1954_v41 = vld [vmem:[%s3799_s13 + $0x6a8] sm:$0xff] }
 0x20d   : > { %2890 = vmatpush.msrb.mxu1 %v2024_v49  ;;  %3033 = vmatpush.msra.mxu2 %v2188_v19  ;;  %v2018_v31 = vld [vmem:[%s3799_s13 + $0x8a8] sm:$0xff] }
 0x20e   : > { %v5036_v56 = vpop.f32.mrf.mxu1  ;;  %2833 = vmatpush.msra.mxu3 %v1958_v10  ;;  %v2014_v49 = vld [vmem:[%s3799_s13 + $0x888] sm:$0xff]  ;;  %v5066_v10 = vpop.f32.mrf.mxu2 }
 0x20f   : > { %2891 = vmatpush.msrb.mxu1 %v2022_v33  ;;  %3034 = vmatpush.msra.mxu2 %v2186_v15  ;;  %v2178_v19 = vld [vmem:[%s3799_s13 + $0xda8] sm:$0xff]  ;;  %v1948_v33 = vld [vmem:[%s3799_s13 + $0x678] sm:$0xff] }
 0x210   : > { %2733 = vmatmul.f32.gmra.mxu3 %v4312_v8  ;;  %2791 = vmatmul.f32.gmra.mxu1 %v4454_v17  ;;  %v2016_v8 = vld [vmem:[%s3799_s13 + $0x898] sm:$0xff] }
 0x211   : > { %2834 = vmatpush.msra.mxu3 %v1956_v11  ;;  %2892 = vmatpush.msrb.mxu1 %v2020_v29  ;;  %v2180_v17 = vld [vmem:[%s3799_s13 + $0xdb8] sm:$0xff]  ;;  %v2010_v11 = vld [vmem:[%s3799_s13 + $0x868] sm:$0xff] }
 0x212   : > { %3035 = vmatpush.msra.mxu2 %v2184_v46  ;;  %v2012_v15 = vld [vmem:[%s3799_s13 + $0x878] sm:$0xff]  ;;  %v2174_v46 = vld [vmem:[%s3799_s13 + $0xd88] sm:$0xff] }
 0x213   : > { %2835 = vmatpush.msra.mxu3 %v1954_v41  ;;  %2893 = vmatpush.msrb.mxu1 %v2018_v31  ;;  %v1944_v41 = vld [vmem:[%s3799_s13 + $0x658] sm:$0xff] }
 0x214   : > { %v5052_v22 = vpop.f32.mrf.mxu3  ;;  %3036 = vmatpush.msra.mxu2 %v2182_v20  ;;  %2994 = vmatmul.f32.gmra.mxu0 %v4833_v40  ;;  %v2176_v40 = vld [vmem:[%s3799_s13 + $0xd98] sm:$0xff]  ;;  %v5083_v20 = vpop.f32.mrf.mxu0 }
 0x215   : > { %2836 = vmatpush.msra.mxu3 %v1952_v61  ;;  %2936 = vmatmul.f32.gmra.mxu2 %v4830_v42  ;;  %v1946_v42 = vld [vmem:[%s3799_s13 + $0x668] sm:$0xff] }
 0x216   : > { %v5059_v57 = vpop.f32.mrf.mxu1  ;;  %2894 = vmatpush.msrb.mxu1 %v2016_v8  ;;  %3037 = vmatpush.msra.mxu2 %v2180_v17  ;;  %v1942_v61 = vld [vmem:[%s3799_s13 + $0x648] sm:$0xff] }
 0x217   : > { %2837 = vmatpush.msra.mxu3 %v1950_v0  ;;  %v2006_v8 = vld [vmem:[%s3799_s13 + $0x848] sm:$0xff]  ;;  %v5090_v0 = vpop.f32.mrf.mxu2 }
 0x218   : > { %2895 = vmatpush.msrb.mxu1 %v2014_v49  ;;  %3038 = vmatpush.msra.mxu2 %v2178_v19  ;;  %v2170_v17 = vld [vmem:[%s3799_s13 + $0xd68] sm:$0xff]  ;;  %v1940_v49 = vld [vmem:[%s3799_s13 + $0x638] sm:$0xff] }
 0x219   : > { %2736 = vmatmul.f32.gmra.mxu3 %v4365_v53  ;;  %2794 = vmatmul.f32.gmra.mxu1 %v4490_v25  ;;  %v2008_v53 = vld [vmem:[%s3799_s13 + $0x858] sm:$0xff] }
 0x21a   : > { %2838 = vmatpush.msra.mxu3 %v1948_v33  ;;  %2896 = vmatpush.msrb.mxu1 %v2012_v15  ;;  %v2172_v25 = vld [vmem:[%s3799_s13 + $0xd78] sm:$0xff]  ;;  %v2002_v15 = vld [vmem:[%s3799_s13 + $0x828] sm:$0xff] }
 0x21b   : > { %3039 = vmatpush.msra.mxu2 %v2176_v40  ;;  %v2004_v19 = vld [vmem:[%s3799_s13 + $0x838] sm:$0xff]  ;;  %v2166_v40 = vld [vmem:[%s3799_s13 + $0xd48] sm:$0xff] }
 0x21c   : > { %v5075_v29 = vpop.f32.mrf.mxu3  ;;  %2839 = vmatpush.msra.mxu3 %v1946_v42  ;;  %2897 = vmatpush.msrb.mxu1 %v2010_v11  ;;  %v1936_v11 = vld [vmem:[%s3799_s13 + $0x618] sm:$0xff] }
 0x21d   : > { %3040 = vmatpush.msra.mxu2 %v2174_v46  ;;  %2997 = vmatmul.f32.gmra.mxu0 %v4861_v59  ;;  %v2168_v59 = vld [vmem:[%s3799_s13 + $0xd58] sm:$0xff] }
 0x21e   : > { %v5079_v31 = vpop.f32.mrf.mxu1  ;;  %2840 = vmatpush.msra.mxu3 %v1944_v41  ;;  %2939 = vmatmul.f32.gmra.mxu2 %v4858_v28  ;;  %v1938_v28 = vld [vmem:[%s3799_s13 + $0x628] sm:$0xff]  ;;  %v2000_v46 = vld [vmem:[%s3799_s13 + $0x818] sm:$0xff]  ;;  %v5109_v41 = vpop.f32.mrf.mxu0 }
 0x21f   : > { %2898 = vmatpush.msrb.mxu1 %v2008_v53  ;;  %3041 = vmatpush.msra.mxu2 %v2172_v25  ;;  %v1998_v53 = vld [vmem:[%s3799_s13 + $0x808] sm:$0xff] }
 0x220   : > { %2841 = vmatpush.msra.mxu3 %v1942_v61  ;;  %v2162_v25 = vld [vmem:[%s3799_s13 + $0xd28] sm:$0xff]  ;;  %v2092_v61 = vld [vmem:[%s3799_s13 + $0xaf8] sm:$0xff] }
 0x221   : > { %2899 = vmatpush.msrb.mxu1 %v2006_v8  ;;  %3042 = vmatpush.msra.mxu2 %v2170_v17  ;;  %v2156_v8 = vld [vmem:[%s3799_s13 + $0xcf8] sm:$0xff] }
 0x222   : > { %2739 = vmatmul.f32.gmra.mxu3 %v4387_v21  ;;  %2797 = vmatmul.f32.gmra.mxu1 %v4526_v4  ;;  %v2164_v21 = vld [vmem:[%s3799_s13 + $0xd38] sm:$0xff]  ;;  %v1934_v4 = vld [vmem:[%s3799_s13 + $0x608] sm:$0xff] }
 0x223   : > { %2842 = vmatpush.msra.mxu3 %v1940_v49  ;;  %2900 = vmatpush.msrb.mxu1 %v2004_v19  ;;  %v2160_v49 = vld [vmem:[%s3799_s13 + $0xd18] sm:$0xff]  ;;  %v2154_v19 = vld [vmem:[%s3799_s13 + $0xce8] sm:$0xff] }
 0x224   : > { %v5095_v33 = vpop.f32.mrf.mxu3  ;;  %3043 = vmatpush.msra.mxu2 %v2168_v59 }
 0x225   : > { %2843 = vmatpush.msra.mxu3 %v1938_v28  ;;  %2901 = vmatpush.msrb.mxu1 %v2002_v15  ;;  %v2158_v28 = vld [vmem:[%s3799_s13 + $0xd08] sm:$0xff]  ;;  %v2088_v15 = vld [vmem:[%s3799_s13 + $0xad8] sm:$0xff] }
 0x226   : > { %v5102_v42 = vpop.f32.mrf.mxu1  ;;  %3044 = vmatpush.msra.mxu2 %v2166_v40  ;;  %3000 = vmatmul.f32.gmra.mxu0 %v4885_v2  ;;  %v5118_v2 = vpop.f32.mrf.mxu2  ;;  %v2152_v40 = vld [vmem:[%s3799_s13 + $0xcd8] sm:$0xff] }
 0x227   : > { %2844 = vmatpush.msra.mxu3 %v1936_v11  ;;  %2942 = vmatmul.f32.gmra.mxu2 %v4882_v30  ;;  %v2090_v30 = vld [vmem:[%s3799_s13 + $0xae8] sm:$0xff]  ;;  %v5133_v11 = vpop.f32.mrf.mxu0 }
 0x228   : > { %2902 = vmatpush.msrb.mxu1 %v2000_v46  ;;  %3045 = vmatpush.msra.mxu2 %v2164_v21  ;;  %v2084_v46 = vld [vmem:[%s3799_s13 + $0xab8] sm:$0xff] }
 0x229   : > { %2845 = vmatpush.msra.mxu3 %v1934_v4  ;;  %v2148_v4 = vld [vmem:[%s3799_s13 + $0xcb8] sm:$0xff] }
 0x22a   : > { %2903 = vmatpush.msrb.mxu1 %v1998_v53  ;;  %3046 = vmatpush.msra.mxu2 %v2162_v25  ;;  %v2082_v53 = vld [vmem:[%s3799_s13 + $0xaa8] sm:$0xff] }
 0x22b   : > { %2846 = vmatmul.f32.vlgmr.msra.gmra.mxu3 %v4427_v54  ;;  %2904 = vmatmul.f32.vlgmr.msrb.gmra.mxu1 %v4570_v48  ;;  %v2086_v54 = vld [vmem:[%s3799_s13 + $0xac8] sm:$0xff] }
 0x22c   : > { %v5116_v17 = vpop.f32.mrf.mxu3  ;;  %2946 = vmatpush.msrb.mxu3 %v2092_v61  ;;  %3004 = vmatpush.msra.mxu1 %v2156_v8  ;;  %v2150_v48 = vld [vmem:[%s3799_s13 + $0xcc8] sm:$0xff]  ;;  %v2080_v8 = vld [vmem:[%s3799_s13 + $0xa98] sm:$0xff] }
 0x22d   : > { %3047 = vmatpush.msra.mxu2 %v2160_v49  ;;  %v2146_v61 = vld [vmem:[%s3799_s13 + $0xca8] sm:$0xff]  ;;  %v2144_v49 = vld [vmem:[%s3799_s13 + $0xc98] sm:$0xff] }
 0x22e   : > { %v5125_v59 = vpop.f32.mrf.mxu1  ;;  %2947 = vmatpush.msrb.mxu3 %v2090_v30  ;;  %3005 = vmatpush.msra.mxu1 %v2154_v19  ;;  %v2078_v30 = vld [vmem:[%s3799_s13 + $0xa88] sm:$0xff] }
 0x22f   : > { %3048 = vmatpush.msra.mxu2 %v2158_v28  ;;  %v2142_v19 = vld [vmem:[%s3799_s13 + $0xc88] sm:$0xff] }
 0x230   : > { %2948 = vmatpush.msrb.mxu3 %v2088_v15  ;;  %3049 = vmatmul.f32.vlgmr.msra.gmra.mxu2 %v4907_v12  ;;  %v5143_v12 = vpop.f32.mrf.mxu2  ;;  %v2140_v15 = vld [vmem:[%s3799_s13 + $0xc78] sm:$0xff] }
 0x231   : > { %3006 = vmatpush.msra.mxu1 %v2152_v40  ;;  %v5158_v40 = vpop.f32.mrf.mxu0 }
 0x232   : > { %2949 = vmatpush.msrb.mxu3 %v2086_v54  ;;  %v2138_v54 = vld [vmem:[%s3799_s13 + $0xc68] sm:$0xff] }
 0x233   : > { %3007 = vmatpush.msra.mxu1 %v2150_v48  ;;  %2849 = vmatmul.f32.gmra.mxu3 %v4459_v50  ;;  %v2268_v50 = vadd.f32 %v5007_v60, %v4815_v27  ;;  %v2074_v27 = vld [vmem:[%s3799_s13 + $0xa68] sm:$0xff]  ;;  %v2072_v48 = vld [vmem:[%s3799_s13 + $0xa58] sm:$0xff] }
 0x234   : > { %v5136_v21 = vpop.f32.mrf.mxu3  ;;  %2907 = vmatmul.f32.gmra.mxu1 %v4604_v34  ;;  %2950 = vmatpush.msrb.mxu3 %v2084_v46  ;;  %v2076_v34 = vld [vmem:[%s3799_s13 + $0xa78] sm:$0xff] }
 0x235   : > { %3008 = vmatpush.msra.mxu1 %v2148_v4  ;;  %v2136_v4 = vld [vmem:[%s3799_s13 + $0xc58] sm:$0xff] }
 0x236   : > { %v5141_v25 = vpop.f32.mrf.mxu1  ;;  %2951 = vmatpush.msrb.mxu3 %v2082_v53 }
 0x237   : > { %3009 = vmatpush.msra.mxu1 %v2146_v61 }
 0x238   : > { %2952 = vmatpush.msrb.mxu3 %v2080_v8  ;;  %3052 = vmatmul.f32.gmra.mxu2 %v4932_v1  ;;  %v2297_v1 = vadd.f32 %v4944_v18, %v2268_v50  ;;  %v5168_v46 = vpop.f32.mrf.mxu2  ;;  %v2134_v18 = vld [vmem:[%s3799_s13 + $0xc48] sm:$0xff]  ;;  %v2271_v8 = vadd.f32 %v5031_v45, %v4847_v16  ;;  %v2064_v16 = vld [vmem:[%s3799_s13 + $0xa18] sm:$0xff] }
 0x239   : > { %3010 = vmatpush.msra.mxu1 %v2144_v49  ;;  %v2132_v49 = vld [vmem:[%s3799_s13 + $0xc38] sm:$0xff]  ;;  %v2130_v50 = vld [vmem:[%s3799_s13 + $0xc28] sm:$0xff] }
 0x23a   : > { %2953 = vmatpush.msrb.mxu3 %v2078_v30  ;;  %v2326_v53 = vadd.f32 %v4991_v9, %v2297_v1  ;;  %v2066_v9 = vld [vmem:[%s3799_s13 + $0xa28] sm:$0xff]  ;;  %v2300_v45 = vadd.f32 %v4972_v44, %v2271_v8 }
 0x23b   : > { %3011 = vmatpush.msra.mxu1 %v2142_v19  ;;  %2852 = vmatmul.f32.gmra.mxu3 %v4495_v39  ;;  %v2070_v39 = vld [vmem:[%s3799_s13 + $0xa48] sm:$0xff]  ;;  %v5186_v19 = vpop.f32.mrf.mxu0 }
 0x23c   : > { %v5155_v28 = vpop.f32.mrf.mxu3  ;;  %2910 = vmatmul.f32.gmra.mxu1 %v4644_v35  ;;  %2954 = vmatpush.msrb.mxu3 %v2076_v34  ;;  %v2068_v35 = vld [vmem:[%s3799_s13 + $0xa38] sm:$0xff] }
 0x23d   : > { %3012 = vmatpush.msra.mxu1 %v2140_v15  ;;  %v2062_v15 = vld [vmem:[%s3799_s13 + $0xa08] sm:$0xff] }
 0x23e   : > { %v5162_v60 = vpop.f32.mrf.mxu1  ;;  %2955 = vmatpush.msrb.mxu3 %v2074_v27  ;;  %v2220_v27 = vld [vmem:[%s3799_s13 + $0xef8] sm:$0xff] }
 0x23f   : > { %3013 = vmatpush.msra.mxu1 %v2138_v54  ;;  %v2218_v54 = vld [vmem:[%s3799_s13 + $0xee8] sm:$0xff] }
 0x240   : > { %2956 = vmatpush.msrb.mxu3 %v2072_v48  ;;  %3055 = vmatmul.f32.gmra.mxu2 %v4960_v32  ;;  %v2355_v32 = vadd.f32 %v4925_v63, %v2326_v53  ;;  %v5193_v63 = vpop.f32.mrf.mxu2  ;;  %v2214_v53 = vld [vmem:[%s3799_s13 + $0xec8] sm:$0xff] }
 0x241   : > { %3014 = vmatpush.msra.mxu1 %v2136_v4  ;;  %v2216_v4 = vld [vmem:[%s3799_s13 + $0xed8] sm:$0xff] }
 0x242   : > { %2957 = vmatpush.msrb.mxu3 %v2070_v39  ;;  %v2384_v34 = vadd.f32 %v5095_v33, %v2355_v32  ;;  %v2329_v33 = vadd.f32 %v5016_v62, %v2300_v45  ;;  %v2200_v45 = vld [vmem:[%s3799_s13 + $0xe58] sm:$0xff] }
 0x243   : > { %3015 = vmatpush.msra.mxu1 %v2134_v18  ;;  %2855 = vmatmul.f32.gmra.mxu3 %v4531_v51  ;;  %v2128_v51 = vld [vmem:[%s3799_s13 + $0xc18] sm:$0xff]  ;;  %v5210_v39 = vpop.f32.mrf.mxu0 }
 0x244   : > { %v2499_v61 = vpop.f32.mrf.mxu3  ;;  %2913 = vmatmul.f32.gmra.mxu1 %v4676_v6  ;;  %2958 = vmatpush.msrb.mxu3 %v2068_v35  ;;  %v2126_v6 = vld [vmem:[%s3799_s13 + $0xc08] sm:$0xff]  ;;  %v2413_v44 = vadd.f32 %v5055_v13, %v2384_v34  ;;  %v2358_v13 = vadd.f32 %v4953_v37, %v2329_v33 }
 0x245   : > { %3016 = vmatpush.msra.mxu1 %v2132_v49  ;;  %v2208_v49 = vld [vmem:[%s3799_s13 + $0xe98] sm:$0xff] }
 0x246   : > { %v5181_v30 = vpop.f32.mrf.mxu1  ;;  %2959 = vmatpush.msrb.mxu3 %v2066_v9  ;;  %v2442_v62 = vadd.f32 %v5079_v31, %v2413_v44  ;;  %v2387_v18 = vadd.f32 %v5116_v17, %v2358_v13  ;;  %v2210_v31 = vld [vmem:[%s3799_s13 + $0xea8] sm:$0xff] }
 0x247   : > { %3017 = vmatpush.msra.mxu1 %v2130_v50  ;;  %v2206_v9 = vld [vmem:[%s3799_s13 + $0xe88] sm:$0xff] }
 0x248   : > { %2960 = vmatpush.msrb.mxu3 %v2064_v16  ;;  %3058 = vmatmul.f32.gmra.mxu2 %v4987_v47  ;;  %v2274_v47 = vadd.f32 %v5052_v22, %v4877_v55  ;;  %v2212_v55 = vld [vmem:[%s3799_s13 + $0xeb8] sm:$0xff]  ;;  %v5218_v22 = vpop.f32.mrf.mxu2  ;;  %v2471_v37 = vadd.f32 %v5040_v5, %v2442_v62  ;;  %v2277_v5 = vadd.f32 %v5075_v29, %v4902_v23  ;;  %v2202_v23 = vld [vmem:[%s3799_s13 + $0xe68] sm:$0xff] }
 0x249   : > { %3018 = vmatpush.msra.mxu1 %v2128_v51  ;;  %v2198_v51 = vld [vmem:[%s3799_s13 + $0xe48] sm:$0xff] }
 0x24a   : > { %2961 = vmatpush.msrb.mxu3 %v2062_v15  ;;  %v2500_v8 = vadd.f32 %v2499_v61, %v2471_v37  ;;  %v2306_v61 = vadd.f32 %v5029_v24, %v2277_v5  ;;  %v2194_v44 = vld [vmem:[%s3799_s13 + $0xe28] sm:$0xff]  ;;  %v3359_v5 = vld [vmem:[#allocation2 + $0xc] sm:$0xff] }
 0x24b   : > { %3019 = vmatpush.msra.mxu1 %v2126_v6  ;;  %2962 = vmatmul.f32.vlgmr.msrb.gmra.mxu3 %v4575_v14  ;;  %v2303_v14 = vadd.f32 %v5001_v52, %v2274_v47  ;;  %v2416_v52 = vadd.f32 %v5083_v20, %v2387_v18  ;;  %v2204_v20 = vld [vmem:[%s3799_s13 + $0xe78] sm:$0xff]  ;;  %v2190_v13 = vld [vmem:[%s3799_s13 + $0xe08] sm:$0xff] }
 0x24c   : > { %v2502_v1 = vpop.f32.mrf.mxu3  ;;  %3020 = vmatmul.f32.vlgmr.msra.gmra.mxu1 %v4711_v3  ;;  %3062 = vmatpush.msra.mxu3 %v2220_v27  ;;  %v2529_v32 = vadd.f32 %v5158_v40, %v2500_v8  ;;  %v2335_v34 = vadd.f32 %v5059_v57, %v2306_v61  ;;  %v3358_v18 = vld [vmem:[#allocation2 + $0x4] sm:$0xff] }
 0x24d   : > { %v2332_v17 = vadd.f32 %v5036_v56, %v2303_v14  ;;  %v2445_v50 = vadd.f32 %v5102_v42, %v2416_v52  ;;  %v5235_v56 = vpop.f32.mrf.mxu0 }
 0x24e   : > { %v5202_v48 = vpop.f32.mrf.mxu1  ;;  %3063 = vmatpush.msra.mxu3 %v2218_v54  ;;  %v2558_v40 = vadd.f32 %v5162_v60, %v2529_v32  ;;  %v2364_v60 = vadd.f32 %v5011_v7, %v2335_v34  ;;  %v5335_v7 = vld [vmem:[#allocation22_spill] sm:$0xff] }
 0x24f   : > { %v2474_v29 = vadd.f32 %v5066_v10, %v2445_v50 }
 0x250   : > { %3064 = vmatpush.msra.mxu3 %v2216_v4  ;;  %v2587_v10 = vadd.f32 %v5143_v12, %v2558_v40  ;;  %v2393_v12 = vadd.f32 %v5155_v28, %v2364_v60 }
 0x252   : > { %3065 = vmatpush.msra.mxu3 %v2214_v53  ;;  %v2422_v53 = vadd.f32 %v5133_v11, %v2393_v12 }
 0x253   : > { %2965 = vmatmul.f32.gmra.mxu3 %v4609_v58  ;;  %v2361_v58 = vadd.f32 %v4980_v36, %v2332_v17  ;;  %v2702_v36 = vpop.f32.mrf.mxu2 }
 0x254   : > { %v5216_v3 = vpop.f32.mrf.mxu3  ;;  %3023 = vmatmul.f32.gmra.mxu1 %v4735_v43  ;;  %3066 = vmatpush.msra.mxu3 %v2212_v55  ;;  %v2451_v37 = vadd.f32 %v5141_v25, %v2422_v53 }
 0x255   : > { %v2390_v16 = vadd.f32 %v5136_v21, %v2361_v58  ;;  %v2644_v57 = vpop.f32.mrf.mxu0 }
 0x256   : > { %v5223_v35 = vpop.f32.mrf.mxu1  ;;  %3067 = vmatpush.msra.mxu3 %v2210_v31  ;;  %v2480_v11 = vadd.f32 %v5118_v2, %v2451_v37 }
 0x257   : > { %v2419_v21 = vadd.f32 %v5109_v41, %v2390_v16 }
 0x258   : > { %3068 = vmatpush.msra.mxu3 %v2208_v49 }
 0x259   : > { %v2448_v27 = vadd.f32 %v5125_v59, %v2419_v21  ;;  %v2192_v59 = vld [vmem:[%s3799_s13 + $0xe18] sm:$0xff] }
 0x25a   : > { %3069 = vmatpush.msra.mxu3 %v2206_v9 }
 0x25b   : > { %2968 = vmatmul.f32.gmra.mxu3 %v4649_v26  ;;  %v2503_v26 = vadd.f32 %v2502_v1, %v2474_v29  ;;  %v5334_v1 = vld [vmem:[#allocation21_spill] sm:$0xff]  ;;  %v2705_v33 = vpop.f32.mrf.mxu2  ;;  %v2477_v54 = vadd.f32 %v5090_v0, %v2448_v27 }
 0x25c   : > { %v5238_v43 = vpop.f32.mrf.mxu3  ;;  %3026 = vmatmul.f32.gmra.mxu1 %v4764_v38  ;;  %3070 = vmatpush.msra.mxu3 %v2204_v20  ;;  %v2196_v38 = vld [vmem:[%s3799_s13 + $0xe38] sm:$0xff] }
 0x25d   : > { %v2532_v6 = vadd.f32 %v5186_v19, %v2503_v26  ;;  %v2506_v28 = vadd.f32 %v5216_v3, %v2477_v54 }
 0x25e   : > { %v2673_v42 = vpop.f32.mrf.mxu1  ;;  %3071 = vmatpush.msra.mxu3 %v2202_v23 }
 0x25f   : > { %v5248_v24 = vadd.f32 %v2702_v36, %v2673_v42  ;;  %v2561_v4 = vadd.f32 %v5181_v30, %v2532_v6  ;;  %v2535_v0 = vadd.f32 %v5210_v39, %v2506_v28  ;;  %v2647_v30 = vpop.f32.mrf.mxu0  ;;  %v3361_v42 = vld [vmem:[#allocation2 + $0x24] sm:$0xff] }
 0x260   : > { %3072 = vmatpush.msra.mxu3 %v2200_v45 }
 0x261   : > { %v2590_v14 = vadd.f32 %v5168_v46, %v2561_v4  ;;  %v2564_v8 = vadd.f32 %v5202_v48, %v2535_v0  ;;  %v2509_v46 = vadd.f32 %v5238_v43, %v2480_v11  ;;  %v3360_v48 = vld [vmem:[#allocation2 + $0x1c] sm:$0xff] }
 0x262   : > { %3073 = vmatpush.msra.mxu3 %v2198_v51 }
 0x263   : > { %2971 = vmatmul.f32.gmra.mxu3 %v5334_v1  ;;  %v2708_v17 = vpop.f32.mrf.mxu2  ;;  %v2593_v39 = vadd.f32 %v5193_v63, %v2564_v8  ;;  %v2538_v25 = vadd.f32 %v5235_v56, %v2509_v46 }
 0x264   : > { %v2615_v15 = vpop.f32.mrf.mxu3  ;;  %3029 = vmatmul.f32.gmra.mxu1 %v5335_v7  ;;  %3074 = vmatpush.msra.mxu3 %v2196_v38 }
 0x265   : > { %v2616_v41 = vadd.f32 %v2615_v15, %v2587_v10  ;;  %v2567_v61 = vadd.f32 %v5223_v35, %v2538_v25 }
 0x266   : > { %3075 = vmatpush.msra.mxu3 %v2194_v44  ;;  %v2676_v47 = vpop.f32.mrf.mxu1 }
 0x267   : > { %v2645_v19 = vadd.f32 %v2644_v57, %v2616_v41  ;;  %v2706_v62 = vadd.f32 %v2705_v33, %v2676_v47  ;;  %v2650_v32 = vpop.f32.mrf.mxu0  ;;  %v2596_v43 = vadd.f32 %v5218_v22, %v2567_v61 }
 0x268   : > { %3076 = vmatpush.msra.mxu3 %v2192_v59 }
 0x269   : > { %3091 = vst [vmem:[%s5264_s21] sm:$0xff] %v2645_v19 }
 0x26a   : > { %3077 = vmatpush.msra.mxu3 %v2190_v13 }
 0x26b   : > { %3078 = vmatmul.f32.vlgmr.msra.gmra.mxu3 %v3358_v18  ;;  %v2711_v20 = vpop.f32.mrf.mxu2 }
 0x26c   : > { %v2618_v55 = vpop.f32.mrf.mxu3 }
 0x26d   : > { %v2619_v31 = vadd.f32 %v2618_v55, %v2590_v14 }
 0x26f   : > { %v2648_v52 = vadd.f32 %v2647_v30, %v2619_v31  ;;  %v2653_v63 = vpop.f32.mrf.mxu0 }
 0x270   : > { %v2679_v3 = vpop.f32.mrf.mxu1 }
 0x271   : > { %3093 = vst [vmem:[%s5264_s21 + $0x10] sm:$0xff] %v2648_v52  ;;  %v2709_v49 = vadd.f32 %v2708_v17, %v2679_v3 }
 0x273   : > { %3081 = vmatmul.f32.gmra.mxu3 %v3359_v5  ;;  %v2818_v35 = vpop.f32.mrf.mxu2 }
 0x275   : > { %v2621_v9 = vpop.f32.mrf.mxu3 }
 0x276   : > { %v2622_v58 = vadd.f32 %v2621_v9, %v2593_v39 }
 0x277   : > { %v2760_v45 = vpop.f32.mrf.mxu0 }
 0x278   : > { %v2651_v50 = vadd.f32 %v2650_v32, %v2622_v58 }
 0x27a   : > { %3095 = vst [vmem:[%s5264_s21 + $0x20] sm:$0xff] %v2651_v50  ;;  %v2682_v2 = vpop.f32.mrf.mxu1 }
 0x27b   : > { %3084 = vmatmul.f32.gmra.mxu3 %v3360_v48  ;;  %v2712_v16 = vadd.f32 %v2711_v20, %v2682_v2  ;;  %v2821_v22 = vpop.f32.mrf.mxu2 }
 0x27f   : > { %v2624_v23 = vpop.f32.mrf.mxu3  ;;  %v2763_v51 = vpop.f32.mrf.mxu0 }
 0x280   : > { %v2625_v36 = vadd.f32 %v2624_v23, %v2596_v43 }
 0x282   : > { %v2654_v29 = vadd.f32 %v2653_v63, %v2625_v36 }
 0x283   : > { %3087 = vmatmul.f32.gmra.mxu3 %v3361_v42  ;;  %v2824_v57 = vpop.f32.mrf.mxu2 }
 0x284   : > { %3097 = vst [vmem:[%s5264_s21 + $0x30] sm:$0xff] %v2654_v29  ;;  %v2789_v21 = vpop.f32.mrf.mxu1 }
 0x287   : > { %v2766_v60 = vpop.f32.mrf.mxu0 }
 0x289   : > { %v2731_v56 = vpop.f32.mrf.mxu3 }
 0x28a   : > { %v2732_v40 = vadd.f32 %v2731_v56, %v5248_v24 }
 0x28b   : > { %v2827_v7 = vpop.f32.mrf.mxu2 }
 0x28c   : > { %v2761_v53 = vadd.f32 %v2760_v45, %v2732_v40 }
 0x28d   : > { %v2792_v10 = vpop.f32.mrf.mxu1 }
 0x28e   : > { %v2790_v14 = vadd.f32 %v2789_v21, %v2761_v53 }
 0x28f   : > { %v2769_v1 = vpop.f32.mrf.mxu0 }
 0x290   : > { %v2819_v37 = vadd.f32 %v2818_v35, %v2790_v14 }
 0x293   : > { %v2734_v34 = vpop.f32.mrf.mxu3  ;;  %v2934_v33 = vpop.f32.mrf.mxu2 }
 0x294   : > { %v2735_v26 = vadd.f32 %v2734_v34, %v2706_v62 }
 0x296   : > { %v2795_v27 = vpop.f32.mrf.mxu1  ;;  %v2764_v0 = vadd.f32 %v2763_v51, %v2735_v26 }
 0x297   : > { %v2876_v24 = vpop.f32.mrf.mxu0 }
 0x298   : > { %v2793_v17 = vadd.f32 %v2792_v10, %v2764_v0 }
 0x29a   : > { %v2822_v46 = vadd.f32 %v2821_v22, %v2793_v17 }
 0x29b   : > { %v2937_v62 = vpop.f32.mrf.mxu2 }
 0x29c   : > { %v2737_v38 = vpop.f32.mrf.mxu3 }
 0x29d   : > { %v2738_v15 = vadd.f32 %v2737_v38, %v2709_v49 }
 0x29f   : > { %v2798_v12 = vpop.f32.mrf.mxu1  ;;  %v2879_v47 = vpop.f32.mrf.mxu0  ;;  %v2767_v49 = vadd.f32 %v2766_v60, %v2738_v15 }
 0x2a1   : > { %v2796_v25 = vadd.f32 %v2795_v27, %v2767_v49 }
 0x2a3   : > { %v2940_v31 = vpop.f32.mrf.mxu2  ;;  %v2825_v61 = vadd.f32 %v2824_v57, %v2796_v25 }
 0x2a5   : > { %v2740_v6 = vpop.f32.mrf.mxu3 }
 0x2a6   : > { %v2741_v41 = vadd.f32 %v2740_v6, %v2712_v16 }
 0x2a7   : > { %v2882_v28 = vpop.f32.mrf.mxu0 }
 0x2a8   : > { %v2905_v59 = vpop.f32.mrf.mxu1  ;;  %v2770_v2 = vadd.f32 %v2769_v1, %v2741_v41 }
 0x2aa   : > { %v2799_v36 = vadd.f32 %v2798_v12, %v2770_v2 }
 0x2ab   : > { %v2943_v9 = vpop.f32.mrf.mxu2 }
 0x2ac   : > { %v2828_v21 = vadd.f32 %v2827_v7, %v2799_v36 }
 0x2ae   : > { %v2847_v44 = vpop.f32.mrf.mxu3 }
 0x2af   : > { %v2848_v30 = vadd.f32 %v2847_v44, %v2819_v37  ;;  %v2885_v52 = vpop.f32.mrf.mxu0 }
 0x2b1   : > { %v2908_v4 = vpop.f32.mrf.mxu1  ;;  %v2877_v3 = vadd.f32 %v2876_v24, %v2848_v30 }
 0x2b3   : > { %v2906_v39 = vadd.f32 %v2905_v59, %v2877_v3  ;;  %v3050_v29 = vpop.f32.mrf.mxu2 }
 0x2b5   : > { %v2935_v20 = vadd.f32 %v2934_v33, %v2906_v39 }
 0x2b6   : > { %v2850_v19 = vpop.f32.mrf.mxu3 }
 0x2b7   : > { %v2851_v5 = vadd.f32 %v2850_v19, %v2822_v46  ;;  %v2992_v58 = vpop.f32.mrf.mxu0 }
 0x2b9   : > { %v2911_v18 = vpop.f32.mrf.mxu1  ;;  %v2880_v50 = vadd.f32 %v2879_v47, %v2851_v5 }
 0x2bb   : > { %v2909_v23 = vadd.f32 %v2908_v4, %v2880_v50  ;;  %v3053_v41 = vpop.f32.mrf.mxu2 }
 0x2bd   : > { %v2938_v40 = vadd.f32 %v2937_v62, %v2909_v23 }
 0x2be   : > { %v2853_v54 = vpop.f32.mrf.mxu3 }
 0x2bf   : > { %v2854_v43 = vadd.f32 %v2853_v54, %v2825_v61  ;;  %v2995_v45 = vpop.f32.mrf.mxu0 }
 0x2c1   : > { %v2914_v8 = vpop.f32.mrf.mxu1  ;;  %v2883_v56 = vadd.f32 %v2882_v28, %v2854_v43 }
 0x2c3   : > { %v2912_v51 = vadd.f32 %v2911_v18, %v2883_v56 }
 0x2c5   : > { %v2941_v6 = vadd.f32 %v2940_v31, %v2912_v51 }
 0x2c6   : > { %v2856_v13 = vpop.f32.mrf.mxu3 }
 0x2c7   : > { %v2857_v35 = vadd.f32 %v2856_v13, %v2828_v21  ;;  %v2998_v44 = vpop.f32.mrf.mxu0  ;;  %v3056_v13 = vpop.f32.mrf.mxu2 }
 0x2c9   : > { %v3021_v16 = vpop.f32.mrf.mxu1  ;;  %v2886_v60 = vadd.f32 %v2885_v52, %v2857_v35 }
 0x2cb   : > { %v2915_v12 = vadd.f32 %v2914_v8, %v2886_v60 }
 0x2cd   : > { %v2944_v33 = vadd.f32 %v2943_v9, %v2915_v12 }
 0x2ce   : > { %v2963_v55 = vpop.f32.mrf.mxu3 }
 0x2cf   : > { %v2964_v48 = vadd.f32 %v2963_v55, %v2935_v20  ;;  %v3001_v62 = vpop.f32.mrf.mxu0  ;;  %v3059_v37 = vpop.f32.mrf.mxu2 }
 0x2d1   : > { %v2993_v63 = vadd.f32 %v2992_v58, %v2964_v48  ;;  %v3024_v10 = vpop.f32.mrf.mxu1 }
 0x2d3   : > { %v3022_v26 = vadd.f32 %v3021_v16, %v2993_v63 }
 0x2d5   : > { %v3051_v15 = vadd.f32 %v3050_v29, %v3022_v26 }
 0x2d6   : > { %v2966_v11 = vpop.f32.mrf.mxu3 }
 0x2d7   : > { %v2967_v34 = vadd.f32 %v2966_v11, %v2938_v40 }
 0x2d9   : > { %v2996_v38 = vadd.f32 %v2995_v45, %v2967_v34  ;;  %v3027_v19 = vpop.f32.mrf.mxu1 }
 0x2db   : > { %v3025_v1 = vadd.f32 %v3024_v10, %v2996_v38 }
 0x2dd   : > { %v3054_v7 = vadd.f32 %v3053_v41, %v3025_v1 }
 0x2de   : > { %v2969_v32 = vpop.f32.mrf.mxu3 }
 0x2df   : > { %v2970_v57 = vadd.f32 %v2969_v32, %v2941_v6 }
 0x2e1   : > { %v2999_v24 = vadd.f32 %v2998_v44, %v2970_v57  ;;  %v3030_v55 = vpop.f32.mrf.mxu1 }
 0x2e3   : > { %v3028_v4 = vadd.f32 %v3027_v19, %v2999_v24 }
 0x2e5   : > { %v3057_v28 = vadd.f32 %v3056_v13, %v3028_v4 }
 0x2e6   : > { %v2972_v42 = vpop.f32.mrf.mxu3 }
 0x2e7   : > { %v2973_v47 = vadd.f32 %v2972_v42, %v2944_v33 }
 0x2e9   : > { %v3002_v53 = vadd.f32 %v3001_v62, %v2973_v47 }
 0x2eb   : > { %v3031_v0 = vadd.f32 %v3030_v55, %v3002_v53 }
 0x2ed   : > { %v3060_v31 = vadd.f32 %v3059_v37, %v3031_v0 }
 0x2ee   : > { %v3079_v22 = vpop.f32.mrf.mxu3 }
 0x2ef   : > { %v3080_v27 = vadd.f32 %v3079_v22, %v3051_v15 }
 0x2f1   : > { %3092 = vst [vmem:[%s5264_s21 + $0x8] sm:$0xff] %v3080_v27 }
 0x2f6   : > { %v3082_v59 = vpop.f32.mrf.mxu3 }
 0x2f7   : > { %v3083_v54 = vadd.f32 %v3082_v59, %v3054_v7 }
 0x2f9   : > { %3094 = vst [vmem:[%s5264_s21 + $0x18] sm:$0xff] %v3083_v54 }
 0x2fe   : > { %v3085_v14 = vpop.f32.mrf.mxu3 }
 0x2ff   : > { %v3086_v18 = vadd.f32 %v3085_v14, %v3057_v28 }
 0x301   : > { %3096 = vst [vmem:[%s5264_s21 + $0x28] sm:$0xff] %v3086_v18 }
 0x306   : > { %v3088_v30 = vpop.f32.mrf.mxu3 }
 0x307   : > { %v3089_v52 = vadd.f32 %v3088_v30, %v3060_v31 }
 0x309   : > { %3098 = vst [vmem:[%s5264_s21 + $0x38] sm:$0xff] %v3089_v52 }
 0x30a PF: > { %p17_p4 = scmp.ge.s32.totalorder %s3699_s19, 4   ;;  %s5336_s24 = smov %s3588_s25 }
 0x30b   : > { %s5337_s25 = smov %s3592_s26  ;;  %s5338_s26 = smov %s3710_s23 }
 0x30c   : > { %s5339_s27 = smov %s3699_s19  ;;  %19 = sbr.rel (!%p17_p4) target bundleno = 8 (0x8), region = 117 }
 0x311   :  { %3120 = vsyncpa [#allocation7], 1 }
 0x312   :  { %3122 = vsyncpa [#allocation7 + $0x1], 1 }
 0x313   :  { %3123 = vsyncpa [#allocation9], 1 }
 0x314   :  { %3124 = vsyncpa [#allocation13], 1 }

</bundles_post_ra>
